<compile_context>
chip_gen: v6e
topology: v6e:2x2x1
jax: 0.10.0
libtpu: 0.0.40
codegen_flags: <defaults>
</compile_context>

<pallas_src>
import numpy as np

import jax
import jax.numpy as jnp
from jax.experimental import pallas as pl
from jax.experimental.pallas import tpu as pltpu


# --------------------------------------------------------------------------- #
# Fused kernel: ReLU -> AvgPool(5,2) -> Conv1x1+BN -> ReLU -> Conv2x2 -> ReLU
#               -> Linear classifier
# --------------------------------------------------------------------------- #
def _aux_head_kernel(x_ref, pool_ref, w1_ref, shift_ref, w2_ref,
                     wcls_ref, bcls_ref, o_ref):
    # x_ref     : (B*S, C)     f32  input, rows ordered (batch, spatial), channels last
    # pool_ref  : (P*B, B*S)   f32  block-diagonal avg-pool matrix, rows ordered (p, b)
    # w1_ref    : (C, 128)     bf16 1x1-conv weight with BN scale folded in
    # shift_ref : (1, 128)     f32  BN shift (beta - mean * scale)
    # w2_ref    : (P*128, 768) bf16 2x2-conv weight, tap-major rows
    # wcls_ref  : (768, NCP)   bf16 classifier weight (transposed, lane-padded)
    # bcls_ref  : (1, NCP)     f32  classifier bias (lane-padded)
    # o_ref     : (B, NCP)     f32  logits (lane-dense)
    B = o_ref.shape[0]
    P = w2_ref.shape[0] // 128

    # Stage 1: ReLU + AvgPool2d(5, stride=2) for every batch in one matmul.
    xr = jnp.maximum(x_ref[...], 0.0)                                          # (B*S, C)
    pooled = jnp.dot(pool_ref[...], xr,
                     preferred_element_type=jnp.float32)                       # (P*B, C)

    # Stage 2: Conv2d(C, 128, 1) + folded BatchNorm + ReLU, all (p, b) rows at once.
    h = jnp.dot(pooled.astype(jnp.bfloat16), w1_ref[...],
                preferred_element_type=jnp.float32) + shift_ref[...]           # (P*B, 128)
    h = jnp.maximum(h, 0.0)
    hb = h.astype(jnp.bfloat16)

    # Stage 3: Conv2d(128, 768, 2) on the 2x2 pooled map == accumulate the P taps.
    # Rows for tap p are the contiguous block [p*B, (p+1)*B) -> M=B matmuls.
    acc = jnp.dot(hb[0:B, :], w2_ref[0:128, :],
                  preferred_element_type=jnp.float32)                          # (B, 768)
    for p in range(1, P):                       # P=4 is an architecture constant
        acc = acc + jnp.dot(hb[p * B:(p + 1) * B, :],
                            w2_ref[p * 128:(p + 1) * 128, :],
                            preferred_element_type=jnp.float32)
    feat = jnp.maximum(acc, 0.0)                                               # (B, 768)

    # Stage 4: Linear(768, num_classes) on the flattened (1x1 spatial) features.
    o_ref[...] = (jnp.dot(feat.astype(jnp.bfloat16), wcls_ref[...],
                          preferred_element_type=jnp.float32) + bcls_ref[...])


def _avgpool_matrix(H, W, k, stride):
    """(Ho*Wo, H*W) matrix implementing AvgPool2d(k, stride, pad=0) as a matmul."""
    Ho = (H - k) // stride + 1
    Wo = (W - k) // stride + 1
    m = np.zeros((Ho * Wo, H * W), dtype=np.float32)
    inv = 1.0 / float(k * k)          # padding=0 => count_include_pad is irrelevant
    for oh in range(Ho):
        for ow in range(Wo):
            for kh in range(k):
                for kw in range(k):
                    m[oh * Wo + ow, (oh * stride + kh) * W + (ow * stride + kw)] = inv
    return m, Ho, Wo


def auxiliary_head_forward(x, kparams):
    """x: (B, C, H, W) float32 -> logits (B, num_classes)."""
    B, C, H, W = x.shape
    num_classes = kparams["num_classes"]
    NCP = kparams["bcls"].shape[-1]
    S = H * W
    PB = kparams["pool"].shape[0]                 # P * B

    # Layout plumbing outside the kernel: rows = (batch, spatial), lanes = channels.
    x_rows = jnp.transpose(x, (0, 2, 3, 1)).reshape(B * S, C)

    flops = 2 * (PB * (B * S) * C            # pool matmul
                 + PB * C * 128              # 1x1 conv
                 + B * (PB // B) * 128 * 768  # 2x2 conv taps
                 + B * 768 * NCP)            # classifier
    bytes_accessed = (x_rows.size * 4 + kparams["pool"].size * 4
                      + kparams["w1f"].size * 2 + kparams["shift"].size * 4
                      + kparams["w2f"].size * 2 + kparams["wcls_t"].size * 2
                      + kparams["bcls"].size * 4 + B * NCP * 4)

    out = pl.pallas_call(
        _aux_head_kernel,
        out_shape=jax.ShapeDtypeStruct((B, NCP), jnp.float32),
        compiler_params=pltpu.CompilerParams(vmem_limit_bytes=32 * 1024 * 1024),
        cost_estimate=pl.CostEstimate(flops=int(flops), transcendentals=0,
                                      bytes_accessed=int(bytes_accessed)),
    )(x_rows, kparams["pool"], kparams["w1f"], kparams["shift"],
      kparams["w2f"], kparams["wcls_t"], kparams["bcls"])
    return out[:, :num_classes]


# --------------------------------------------------------------------------- #
# Deterministic parameters (torch layout) + pre-folded kernel parameters
# --------------------------------------------------------------------------- #
def make_params(key, B, C, num_classes, H, W):
    ks = jax.random.split(key, 8)
    # torch-layout raw weights
    w1 = jax.random.normal(ks[0], (128, C), jnp.float32) * 0.1          # Conv2d(C,128,1) (O,I)
    gamma = 1.0 + jax.random.normal(ks[1], (128,), jnp.float32) * 0.1   # BatchNorm2d(128)
    beta = jax.random.normal(ks[2], (128,), jnp.float32) * 0.1
    mean = jax.random.normal(ks[3], (128,), jnp.float32) * 0.1
    var = jax.random.uniform(ks[4], (128,), jnp.float32, minval=0.5, maxval=1.5)
    w2 = jax.random.normal(ks[5], (768, 128, 2, 2), jnp.float32) * 0.05  # Conv2d(128,768,2)
    wcls = jax.random.normal(ks[6], (num_classes, 768), jnp.float32) * 0.05
    bcls = jax.random.normal(ks[7], (num_classes,), jnp.float32) * 0.05
    raw = dict(w1=w1, gamma=gamma, beta=beta, mean=mean, var=var,
               w2=w2, wcls=wcls, bcls=bcls)

    # Fold BN (eval mode) into the 1x1-conv weight; keep only the shift epilogue.
    eps = 1e-5
    scale = gamma / jnp.sqrt(var + eps)
    shift = (beta - mean * scale).reshape(1, 128)

    pool_np, Ho, Wo = _avgpool_matrix(H, W, 5, 2)
    assert Ho == 2 and Wo == 2, "Conv2d(128,768,2) must reduce the pooled map to 1x1"
    P = Ho * Wo
    S = H * W

    # Block-diagonal pool matrix: rows ordered (p, b), cols ordered (b, s).
    pool_bd = np.zeros((P * B, B * S), dtype=np.float32)
    for b in range(B):
        pool_bd[b::B, b * S:(b + 1) * S] = pool_np

    # Lane-pad the classifier to a multiple of 128 (zeros contribute nothing).
    NCP = ((num_classes + 127) // 128) * 128
    wcls_t = jnp.zeros((768, NCP), jnp.float32).at[:, :num_classes].set(wcls.T)
    bcls_p = jnp.zeros((1, NCP), jnp.float32).at[:, :num_classes].set(bcls)

    kparams = dict(
        num_classes=num_classes,
        pool=jnp.asarray(pool_bd),                                        # (P*B, B*S) f32
        w1f=(w1.T * scale[None, :]).astype(jnp.bfloat16),                 # (C, 128)  bf16
        shift=shift,                                                      # (1, 128)  f32
        w2f=jnp.transpose(w2, (2, 3, 1, 0)).reshape(P * 128, 768)
            .astype(jnp.bfloat16),                                        # (512, 768) bf16
        wcls_t=wcls_t.astype(jnp.bfloat16),                               # (768, NCP) bf16
        bcls=bcls_p,                                                      # (1, NCP)  f32
    )
    return raw, kparams


# --------------------------------------------------------------------------- #
# Pure-JAX reference (mirrors the PyTorch module op-for-op, eval-mode BN, f32)
# --------------------------------------------------------------------------- #
def reference_forward(x, raw):
    x = jnp.maximum(x, 0.0)
    x = jax.lax.reduce_window(x, 0.0, jax.lax.add,
                              (1, 1, 5, 5), (1, 1, 2, 2), "VALID") / 25.0
    x = jnp.einsum("bchw,oc->bohw", x, raw["w1"])
    eps = 1e-5
    scale = raw["gamma"] / jnp.sqrt(raw["var"] + eps)
    shift = raw["beta"] - raw["mean"] * scale
    x = x * scale[None, :, None, None] + shift[None, :, None, None]
    x = jnp.maximum(x, 0.0)
    x = jax.lax.conv_general_dilated(x, raw["w2"], (1, 1), "VALID",
                                     dimension_numbers=("NCHW", "OIHW", "NCHW"))
    x = jnp.maximum(x, 0.0)
    feat = x.reshape(x.shape[0], -1)
    return feat @ raw["wcls"].T + raw["bcls"]


if __name__ == "__main__":
    B, C, H, W = 2, 64, 7, 7        # 7x7 is the spatial size DARTS feeds this head
    num_classes = 1000

    key = jax.random.PRNGKey(0)
    kx, kp = jax.random.split(key)
    x = jax.random.normal(kx, (B, C, H, W), jnp.float32)
    raw, kparams = make_params(kp, B, C, num_classes, H, W)

    out = auxiliary_head_forward(x, kparams)
    out = jax.block_until_ready(out)

    assert out.shape == (B, num_classes), out.shape
    assert bool(jnp.all(jnp.isfinite(out)))

    ref = reference_forward(x, raw)
    err = float(jnp.max(jnp.abs(out - ref)))
    # bf16 weights + bf16 activation casts at the MXU vs a pure-f32 reference:
    # expected drift is ~1e-2; allow comfortable margin while still catching
    # any layout / ordering bug (which would produce O(0.3+) errors).
    assert err < 6e-2, f"max abs err vs reference: {err}"

    print("KERNEL_OK")
</pallas_src>

<mosaic_0001>
module attributes {stable_mosaic.version = 11 : i64} {
  func.func @_aux_head_kernel(%arg0: memref<98x64xf32, #tpu.memory_space<vmem>>, %arg1: memref<8x98xf32, #tpu.memory_space<vmem>>, %arg2: memref<64x128xbf16, #tpu.memory_space<vmem>>, %arg3: memref<1x128xf32, #tpu.memory_space<vmem>>, %arg4: memref<512x768xbf16, #tpu.memory_space<vmem>>, %arg5: memref<768x1024xbf16, #tpu.memory_space<vmem>>, %arg6: memref<1x1024xf32, #tpu.memory_space<vmem>>, %arg7: memref<2x1024xf32, #tpu.memory_space<vmem>>) attributes {dimension_semantics = [], scalar_prefetch = 0 : i64, scratch_operands = 0 : i64, tpu.core_type = #tpu.core_type<tc>} {
    %c0 = arith.constant 0 : index
    %c0_0 = arith.constant 0 : index
    %0 = vector.load %arg0[%c0, %c0_0] : memref<98x64xf32, #tpu.memory_space<vmem>>, vector<98x64xf32>
    %cst = arith.constant 0.000000e+00 : f32
    %1 = vector.broadcast %cst : f32 to vector<98x64xf32>
    %2 = arith.maximumf %0, %1 : vector<98x64xf32>
    %c0_1 = arith.constant 0 : index
    %c0_2 = arith.constant 0 : index
    %3 = vector.load %arg1[%c0_1, %c0_2] : memref<8x98xf32, #tpu.memory_space<vmem>>, vector<8x98xf32>
    %cst_3 = arith.constant dense<0.000000e+00> : vector<8x64xf32>
    %4 = tpu.matmul %3, %2, %cst_3 {dimension_numbers = #tpu.dot_dimension_numbers<[1], [0], [0], [1], [0, 0, 1, 1], [], []>} : vector<8x98xf32>, vector<98x64xf32>, vector<8x64xf32> -> vector<8x64xf32>
    %5 = arith.truncf %4 : vector<8x64xf32> to vector<8x64xbf16>
    %c0_4 = arith.constant 0 : index
    %c0_5 = arith.constant 0 : index
    %6 = vector.load %arg2[%c0_4, %c0_5] : memref<64x128xbf16, #tpu.memory_space<vmem>>, vector<64x128xbf16>
    %cst_6 = arith.constant dense<0.000000e+00> : vector<8x128xf32>
    %7 = tpu.matmul %5, %6, %cst_6 {dimension_numbers = #tpu.dot_dimension_numbers<[1], [0], [0], [1], [0, 0, 1, 1], [], []>} : vector<8x64xbf16>, vector<64x128xbf16>, vector<8x128xf32> -> vector<8x128xf32>
    %c0_7 = arith.constant 0 : index
    %c0_8 = arith.constant 0 : index
    %8 = vector.load %arg3[%c0_7, %c0_8] : memref<1x128xf32, #tpu.memory_space<vmem>>, vector<1x128xf32>
    %9 = vector.broadcast %8 : vector<1x128xf32> to vector<8x128xf32>
    %10 = arith.addf %7, %9 : vector<8x128xf32>
    %cst_9 = arith.constant 0.000000e+00 : f32
    %11 = vector.broadcast %cst_9 : f32 to vector<8x128xf32>
    %12 = arith.maximumf %10, %11 : vector<8x128xf32>
    %13 = arith.truncf %12 : vector<8x128xf32> to vector<8x128xbf16>
    %14 = vector.extract_strided_slice %13 {offsets = [0, 0], sizes = [2, 128], strides = [1, 1]} : vector<8x128xbf16> to vector<2x128xbf16>
    %c0_10 = arith.constant 0 : index
    %c0_11 = arith.constant 0 : index
    %15 = vector.load %arg4[%c0_10, %c0_11] : memref<512x768xbf16, #tpu.memory_space<vmem>>, vector<128x768xbf16>
    %cst_12 = arith.constant dense<0.000000e+00> : vector<2x768xf32>
    %16 = tpu.matmul %14, %15, %cst_12 {dimension_numbers = #tpu.dot_dimension_numbers<[1], [0], [0], [1], [0, 0, 1, 1], [], []>} : vector<2x128xbf16>, vector<128x768xbf16>, vector<2x768xf32> -> vector<2x768xf32>
    %17 = vector.extract_strided_slice %13 {offsets = [2, 0], sizes = [2, 128], strides = [1, 1]} : vector<8x128xbf16> to vector<2x128xbf16>
    %c128 = arith.constant 128 : index
    %c0_13 = arith.constant 0 : index
    %18 = vector.load %arg4[%c128, %c0_13] : memref<512x768xbf16, #tpu.memory_space<vmem>>, vector<128x768xbf16>
    %cst_14 = arith.constant dense<0.000000e+00> : vector<2x768xf32>
    %19 = tpu.matmul %17, %18, %cst_14 {dimension_numbers = #tpu.dot_dimension_numbers<[1], [0], [0], [1], [0, 0, 1, 1], [], []>} : vector<2x128xbf16>, vector<128x768xbf16>, vector<2x768xf32> -> vector<2x768xf32>
    %20 = arith.addf %16, %19 : vector<2x768xf32>
    %21 = vector.extract_strided_slice %13 {offsets = [4, 0], sizes = [2, 128], strides = [1, 1]} : vector<8x128xbf16> to vector<2x128xbf16>
    %c256 = arith.constant 256 : index
    %c0_15 = arith.constant 0 : index
    %22 = vector.load %arg4[%c256, %c0_15] : memref<512x768xbf16, #tpu.memory_space<vmem>>, vector<128x768xbf16>
    %cst_16 = arith.constant dense<0.000000e+00> : vector<2x768xf32>
    %23 = tpu.matmul %21, %22, %cst_16 {dimension_numbers = #tpu.dot_dimension_numbers<[1], [0], [0], [1], [0, 0, 1, 1], [], []>} : vector<2x128xbf16>, vector<128x768xbf16>, vector<2x768xf32> -> vector<2x768xf32>
    %24 = arith.addf %20, %23 : vector<2x768xf32>
    %25 = vector.extract_strided_slice %13 {offsets = [6, 0], sizes = [2, 128], strides = [1, 1]} : vector<8x128xbf16> to vector<2x128xbf16>
    %c384 = arith.constant 384 : index
    %c0_17 = arith.constant 0 : index
    %26 = vector.load %arg4[%c384, %c0_17] : memref<512x768xbf16, #tpu.memory_space<vmem>>, vector<128x768xbf16>
    %cst_18 = arith.constant dense<0.000000e+00> : vector<2x768xf32>
    %27 = tpu.matmul %25, %26, %cst_18 {dimension_numbers = #tpu.dot_dimension_numbers<[1], [0], [0], [1], [0, 0, 1, 1], [], []>} : vector<2x128xbf16>, vector<128x768xbf16>, vector<2x768xf32> -> vector<2x768xf32>
    %28 = arith.addf %24, %27 : vector<2x768xf32>
    %cst_19 = arith.constant 0.000000e+00 : f32
    %29 = vector.broadcast %cst_19 : f32 to vector<2x768xf32>
    %30 = arith.maximumf %28, %29 : vector<2x768xf32>
    %31 = arith.truncf %30 : vector<2x768xf32> to vector<2x768xbf16>
    %c0_20 = arith.constant 0 : index
    %c0_21 = arith.constant 0 : index
    %32 = vector.load %arg5[%c0_20, %c0_21] : memref<768x1024xbf16, #tpu.memory_space<vmem>>, vector<768x1024xbf16>
    %cst_22 = arith.constant dense<0.000000e+00> : vector<2x1024xf32>
    %33 = tpu.matmul %31, %32, %cst_22 {dimension_numbers = #tpu.dot_dimension_numbers<[1], [0], [0], [1], [0, 0, 1, 1], [], []>} : vector<2x768xbf16>, vector<768x1024xbf16>, vector<2x1024xf32> -> vector<2x1024xf32>
    %c0_23 = arith.constant 0 : index
    %c0_24 = arith.constant 0 : index
    %34 = vector.load %arg6[%c0_23, %c0_24] : memref<1x1024xf32, #tpu.memory_space<vmem>>, vector<1x1024xf32>
    %35 = vector.broadcast %34 : vector<1x1024xf32> to vector<2x1024xf32>
    %36 = arith.addf %33, %35 : vector<2x1024xf32>
    %c0_25 = arith.constant 0 : index
    %c0_26 = arith.constant 0 : index
    %37 = vector.load %arg7[%c0_25, %c0_26] : memref<2x1024xf32, #tpu.memory_space<vmem>>, vector<2x1024xf32>
    tpu.vector_store %arg7[%c0_25, %c0_26], %36 {strides = array<i32>} : memref<2x1024xf32, #tpu.memory_space<vmem>>, vector<2x1024xf32>,
    return
  }
}

</mosaic_0001>

<bundles_post_ra>
// kernel: tpu_custom_call.1
= control target key start
LH: loop header
LB: loop body
LE: loop exit
PB: predicated region body
PF: predicated region fallthrough
CT: control target
= control target key end

     0   :  { %12 = vsyncpa [#allocation3], 0  ;;  %s6282_s0 = inlined_call_operand.vmem [shape: f32[98,64], index: 0, kind: input, shape index: {}]   ;;  %s6283_s1 = inlined_call_operand.hbm [shape: f32[8,98], index: 1, kind: input, shape index: {}]   ;;  %s6284_s2 = inlined_call_operand.hbm [shape: bf16[64,128], index: 2, kind: input, shape index: {}]   ;;  %s6285_s3 = inlined_call_operand.hbm [shape: f32[1,128], index: 3, kind: input, shape index: {}]   ;;  %s6286_s4 = inlined_call_operand.hbm [shape: bf16[512,768], index: 4, kind: input, shape index: {}]   ;;  %s6287_s5 = inlined_call_operand.hbm [shape: bf16[768,1024], index: 5, kind: input, shape index: {}]   ;;  %s6288_s6 = inlined_call_operand.hbm [shape: f32[1,1024], index: 6, kind: input, shape index: {}]   ;;  %s6289_s7 = inlined_call_operand.hbm [shape: f32[2,1024], index: 7, kind: output, shape index: {}]  }
   0x1   :  { %13 = vsyncpa [#allocation6], 0 }
   0x2   :  { %14 = vsyncpa [#allocation9], 0 }
   0x3   :  { %15 = vsyncpa [#allocation12], 0 }
   0x4   :  { %16 = vsyncpa [#allocation4], 0  ;;  %s5975_s24 = smov [#allocation5]  }
   0x5   :  { %s34_s25 = sshll.u32 %s5975_s24, 4  ;;  %s35_s25 = int_to_ptr.vmem [resolvable:$true] %s34_s25 }
   0x6   :  { %s5833_s26 = scalar_lea.vmem %s35_s25, 512  ;;  %p5838_p1 = scmp.lt.s32.totalorder %s35_s25, %s35_s25 }
   0x7   :  { %p5834_p0 = scmp.ne.s32.totalorder %s35_s25, %s5833_s26  ;;  %p5839_p2 = scmp.lt.s32.totalorder %s5833_s26, %s5833_s26 }
   0x9   :  { %p5840_p3 = por %p5839_p2, %p5838_p1 }
   0xb   :  { %p5841_p4 = pnand %p5840_p3, %p5834_p0 }
   0xd   :  { %5844 = shalt.err (!%p5841_p4)
}
   0xe   :  { %s5976_s27 = smov 64   ;;  %s5977_s28 = smov 4  }
   0xf   :  { %40 = dma.hbm_to_vmem [thread:$0]  %s6284_s2, 512, %s35_s25, [#allocation6], %s5976_s27, %s5976_s27, %s5977_s28  }
  0x10   :  { %s5978_s8 = smov [#allocation8]  }
  0x11   :  { %s56_s9 = sshll.u32 %s5978_s8, 4  ;;  %s57_s9 = int_to_ptr.vmem [resolvable:$true] %s56_s9 }
  0x12   :  { %s5853_s10 = scalar_lea.vmem %s57_s9, 24576  ;;  %p5858_p6 = scmp.lt.s32.totalorder %s57_s9, %s57_s9 }
  0x13   :  { %p5854_p5 = scmp.ne.s32.totalorder %s57_s9, %s5853_s10  ;;  %p5859_p7 = scmp.lt.s32.totalorder %s5853_s10, %s5853_s10 }
  0x15   :  { %p5860_p8 = por %p5859_p7, %p5858_p6 }
  0x17   :  { %p5861_p9 = pnand %p5860_p8, %p5854_p5 }
  0x19   :  { %5864 = shalt.err (!%p5861_p9)
}
  0x1a   :  { %s5979_s11 = smov 384   ;;  %s5980_s12 = smov 24  }
  0x1b   :  { %62 = dma.hbm_to_vmem [thread:$0]  %s6286_s4, 24576, %s57_s9, [#allocation9], %s5979_s11, %s5979_s11, %s5980_s12  }
  0x1c   :  { %s5981_s15 = smov [#allocation2]   ;;  %s5982_s17 = smov [#allocation7]  }
  0x1d   :  { %s25_s16 = sshll.u32 %s5981_s15, 4  ;;  %s47_s2 = sshll.u32 %s5982_s17, 4  ;;  %s26_s16 = int_to_ptr.vmem [resolvable:$true] %s25_s16  ;;  %s48_s2 = int_to_ptr.vmem [resolvable:$true] %s47_s2 }
  0x1e   :  { %s5873_s18 = scalar_lea.vmem %s26_s16, 128  ;;  %p5878_p11 = scmp.lt.s32.totalorder %s26_s16, %s26_s16 }
  0x1f   :  { %p5874_p10 = scmp.ne.s32.totalorder %s26_s16, %s5873_s18  ;;  %p5879_p12 = scmp.lt.s32.totalorder %s5873_s18, %s5873_s18 }
  0x21   :  { %p5880_p13 = por %p5879_p12, %p5878_p11 }
  0x23   :  { %p5881_p0 = pnand %p5880_p13, %p5874_p10 }
  0x25   :  { %5884 = shalt.err (!%p5881_p0)
}
  0x26   :  { %28 = dma.hbm_to_vmem [thread:$0]  %s6283_s1, 128, %s26_s16, [#allocation3]  }
  0x27   :  { %s5893_s21 = scalar_lea.vmem %s48_s2, 16  ;;  %s5897_s4 = scalar_lea.vmem %s48_s2, 32 }
  0x28   :  { %p5894_p1 = scmp.ne.s32.totalorder %s48_s2, %s5893_s21  ;;  %p5898_p2 = scmp.lt.s32.totalorder %s48_s2, %s48_s2 }
  0x29   :  { %p5899_p3 = scmp.lt.s32.totalorder %s5897_s4, %s5893_s21 }
  0x2b   :  { %p5900_p4 = por %p5899_p3, %p5898_p2 }
  0x2d   :  { %p5901_p5 = pnand %p5900_p4, %p5894_p1 }
  0x2f   :  { %5904 = shalt.err (!%p5901_p5)
}
  0x30   :  { %50 = dma.hbm_to_vmem [thread:$0]  %s6285_s3, 16, %s48_s2, [#allocation6]  }
  0x31   :  { %s5983_s24 = smov [#allocation10]  }
  0x32   :  { %s68_s25 = sshll.u32 %s5983_s24, 4  ;;  %s69_s25 = int_to_ptr.vmem [resolvable:$true] %s68_s25 }
  0x33   :  { %s5913_s26 = scalar_lea.vmem %s69_s25, 49152  ;;  %p5918_p7 = scmp.lt.s32.totalorder %s69_s25, %s69_s25 }
  0x34   :  { %p5914_p6 = scmp.ne.s32.totalorder %s69_s25, %s5913_s26  ;;  %p5919_p8 = scmp.lt.s32.totalorder %s5913_s26, %s5913_s26 }
  0x36   :  { %p5920_p9 = por %p5919_p8, %p5918_p7 }
  0x38   :  { %p5921_p10 = pnand %p5920_p9, %p5914_p6 }
  0x3a   :  { %5924 = shalt.err (!%p5921_p10)
}
  0x3b   :  { %s5984_s1 = smov 512   ;;  %s5985_s27 = smov 32  }
  0x3c   :  { %74 = dma.hbm_to_vmem [thread:$0]  %s6287_s5, 49152, %s69_s25, [#allocation9], %s5984_s1, %s5984_s1, %s5985_s27  }
  0x3d   :  { %s5986_s30 = smov [#allocation11]  }
  0x3e   :  { %s81_s8 = sshll.u32 %s5986_s30, 4  ;;  %s82_s8 = int_to_ptr.vmem [resolvable:$true] %s81_s8 }
  0x3f   :  { %s5933_s3 = scalar_lea.vmem %s82_s8, 128  ;;  %p5938_p12 = scmp.lt.s32.totalorder %s82_s8, %s82_s8 }
  0x40   :  { %p5934_p11 = scmp.ne.s32.totalorder %s82_s8, %s5933_s3  ;;  %p5939_p13 = scmp.lt.s32.totalorder %s5933_s3, %s5933_s3 }
  0x42   :  { %p5940_p0 = por %p5939_p13, %p5938_p12 }
  0x44   :  { %p5941_p1 = pnand %p5940_p0, %p5934_p11 }
  0x46   :  { %5944 = shalt.err (!%p5941_p1)
}
  0x47   :  { %84 = dma.hbm_to_vmem [thread:$0]  %s6288_s6, 128, %s82_s8, [#allocation12]  }
  0x48   :  { %5965 = dma.done.wait [#allocation3], 128  }
  0x49   :  { %5966 = vsyncadd [#allocation3], 4294967168 }
  0x4a   :  { %5967 = dma.done.wait [#allocation6], 528  }
  0x4b   :  { %5968 = vsyncadd [#allocation6], 4294966768 }
  0x4c   :  { %5969 = dma.done.wait [#allocation9], 73728  }
  0x4d   :  { %5970 = vsyncadd [#allocation9], 4294893568 }
  0x4e   :  { %5971 = dma.done.wait [#allocation12], 128  }
  0x4f   :  { %5972 = vsyncadd [#allocation12], 4294967168  ;;  %v5987_v0 = vmov 0.0   ;;  %vm5988_vm0 = vmmov 0   ;;  %v116_v1 = vld [vmem:[%s6282_s0 + $0x60] sm:$0x3] }
  0x50   :  { %5475 = vmatprep.subr.mxu0 %v5987_v0  ;;  %5501 = vmatprep.mubr.msk.f32.mxu0 %vm5988_vm0, %v5987_v0  ;;  %vm135_vm1 = vcmask 1041408   ;;  %v115_v2 = vld [vmem:[%s6282_s0 + $0x58] sm:$0xff]  ;;  %v114_v3 = vld [vmem:[%s6282_s0 + $0x50] sm:$0xff]  ;;  %v129_v4 = vmax.f32 %v116_v1, 0.0  ;;  %v113_v6 = vld [vmem:[%s6282_s0 + $0x48] sm:$0xff]  ;;  %vm131_vm2 = vcmask 801792  }
  0x51   :  { %5504 = vmatprep.subr.bf16.mxu1 %v5987_v0  ;;  %5512 = vmatprep.mubr.msk.bf16.mxu1 %vm5988_vm0, %v5987_v0  ;;  %v128_v5 = vmax.f32 %v115_v2, 0.0  ;;  %v127_v7 = vmax.f32 %v114_v3, 0.0  ;;  %v112_v8 = vld [vmem:[%s6282_s0 + $0x40] sm:$0xff]  ;;  %v111_v9 = vld [vmem:[%s6282_s0 + $0x38] sm:$0xff]  ;;  %v126_v11 = vmax.f32 %v113_v6, 0.0  ;;  %v110_v14 = vld [vmem:[%s6282_s0 + $0x30] sm:$0xff] }
  0x52   :  { %5476 = vmatpush3.msk.msra.mxu0 %vm135_vm1, %v129_v4  ;;  %v5533_v10 = vld [vmem:[#allocation5 + $0x18] sm:$0xff]   ;;  %v5534_v12 = vld [vmem:[#allocation5 + $0x10] sm:$0xff]   ;;  %v125_v13 = vmax.f32 %v112_v8, 0.0  ;;  %v109_v15 = vld [vmem:[%s6282_s0 + $0x28] sm:$0xff]  ;;  %v124_v17 = vmax.f32 %v111_v9, 0.0  ;;  %v123_v19 = vmax.f32 %v110_v14, 0.0 }
  0x53   :  { %5477 = vmatprep.subr.mxu0 %v5987_v0  ;;  %5505 = vmatpush3.bf16.msra.mxu1 %v5533_v10  ;;  %v5535_v16 = vld [vmem:[#allocation5 + $0x8] sm:$0xff]   ;;  %v108_v18 = vld [vmem:[%s6282_s0 + $0x20] sm:$0xff]  ;;  %v107_v20 = vld [vmem:[%s6282_s0 + $0x18] sm:$0xff]  ;;  %v122_v21 = vmax.f32 %v109_v15, 0.0  ;;  %vm249_vm3 = vcmask 523264   ;;  %v5989_v4 = vmov 0  }
  0x54   :  { %5478 = vmatpush3.msra.mxu0 %v128_v5  ;;  %5506 = vmatprep.subr.bf16.mxu1 %v5987_v0  ;;  %v106_v22 = vld [vmem:[%s6282_s0 + $0x10] sm:$0xff]  ;;  %v121_v23 = vmax.f32 %v108_v18, 0.0  ;;  %v105_v24 = vld [vmem:[%s6282_s0 + $0x8] sm:$0xff]  ;;  %v120_v25 = vmax.f32 %v107_v20, 0.0  ;;  %v104_v26 = vld [vmem:[%s6282_s0] sm:$0xff]  ;;  %s5991_s0 = smov [#allocation13]  }
  0x55   :  { %5479 = vmatprep.subr.mxu0 %v5987_v0  ;;  %v119_v27 = vmax.f32 %v106_v22, 0.0  ;;  %v118_v28 = vmax.f32 %v105_v24, 0.0  ;;  %v117_v29 = vmax.f32 %v104_v26, 0.0  ;;  %v130_v30 = vld [vmem:[#allocation2] sm:$0xff]  ;;  %v5536_v31 = vld [vmem:[#allocation5] sm:$0xff]   ;;  %s4860_s3 = sshll.u32 %s5991_s0, 4  ;;  %s4861_s3 = int_to_ptr.vmem [resolvable:$true] %s4860_s3 }
  0x56   :  { %5480 = vmatpush3.msra.mxu0 %v127_v7  ;;  %v5539_v32 = vld [vmem:[#allocation8 + $0x2d4] ss:$24 sps:$4 sm:$0xff]   ;;  %v5540_v33 = vld [vmem:[#allocation8 + $0x2d8] ss:$24 sps:$4 sm:$0xff]   ;;  %v5546_v36 = vld [vmem:[#allocation8 + $0x2a8] ss:$24 sps:$4 sm:$0xff]   ;;  %p5950_p3 = scmp.lt.s32.totalorder %s4861_s3, %s4861_s3 }
  0x57   :  { %5481 = vmatprep.subr.mxu0 %v5987_v0  ;;  %5507 = vmatpush3.bf16.msra.mxu1 %v5534_v12  ;;  %v5542_v34 = vld [vmem:[#allocation8 + $0x2dc] ss:$24 sps:$4 sm:$0xff]   ;;  %v5548_v35 = vld [vmem:[#allocation8 + $0x2ac] ss:$24 sps:$4 sm:$0xff]   ;;  %v5552_v38 = vld [vmem:[#allocation8 + $0x278] ss:$24 sps:$4 sm:$0xff]  }
  0x58   :  { %5482 = vmatpush3.msra.mxu0 %v126_v11  ;;  %5508 = vmatprep.subr.bf16.mxu1 %v5987_v0  ;;  %v5554_v37 = vld [vmem:[#allocation8 + $0x27c] ss:$24 sps:$4 sm:$0xff]   ;;  %v5560_v39 = vld [vmem:[#allocation8 + $0x24c] ss:$24 sps:$4 sm:$0xff]   ;;  %v5558_v40 = vld [vmem:[#allocation8 + $0x248] ss:$24 sps:$4 sm:$0xff]  }
  0x59   :  { %5483 = vmatprep.subr.mxu0 %v5987_v0  ;;  %v5566_v41 = vld [vmem:[#allocation8 + $0x21c] ss:$24 sps:$4 sm:$0xff]   ;;  %v5564_v42 = vld [vmem:[#allocation8 + $0x218] ss:$24 sps:$4 sm:$0xff]   ;;  %v5572_v43 = vld [vmem:[#allocation8 + $0x1ec] ss:$24 sps:$4 sm:$0xff]  }
  0x5a   :  { %5484 = vmatpush3.msra.mxu0 %v125_v13  ;;  %v5570_v44 = vld [vmem:[#allocation8 + $0x1e8] ss:$24 sps:$4 sm:$0xff]   ;;  %v5545_v48 = vld [vmem:[#allocation8 + $0x2a4] ss:$24 sps:$4 sm:$0xff]   ;;  %v5551_v51 = vld [vmem:[#allocation8 + $0x274] ss:$24 sps:$4 sm:$0xff]  }
  0x5b   :  { %5485 = vmatprep.subr.mxu0 %v5987_v0  ;;  %5509 = vmatpush3.bf16.msra.mxu1 %v5535_v16  ;;  %v5537_v46 = vld [vmem:[#allocation8 + $0x2d0] ss:$24 sps:$4 sm:$0xff]   ;;  %v5543_v50 = vld [vmem:[#allocation8 + $0x2a0] ss:$24 sps:$4 sm:$0xff]   ;;  %v5557_v53 = vld [vmem:[#allocation8 + $0x244] ss:$24 sps:$4 sm:$0xff]  }
  0x5c   :  { %5486 = vmatpush3.msra.mxu0 %v124_v17  ;;  %5510 = vmatprep.subr.bf16.mxu1 %v5987_v0  ;;  %v5549_v52 = vld [vmem:[#allocation8 + $0x270] ss:$24 sps:$4 sm:$0xff]   ;;  %v5555_v54 = vld [vmem:[#allocation8 + $0x240] ss:$24 sps:$4 sm:$0xff]   ;;  %v5563_v55 = vld [vmem:[#allocation8 + $0x214] ss:$24 sps:$4 sm:$0xff]  }
  0x5d   :  { %5487 = vmatprep.subr.mxu0 %v5987_v0  ;;  %v5561_v56 = vld [vmem:[#allocation8 + $0x210] ss:$24 sps:$4 sm:$0xff]   ;;  %v5569_v57 = vld [vmem:[#allocation8 + $0x1e4] ss:$24 sps:$4 sm:$0xff]   ;;  %v5567_v58 = vld [vmem:[#allocation8 + $0x1e0] ss:$24 sps:$4 sm:$0xff]  }
  0x5e   :  { %5488 = vmatpush3.msra.mxu0 %v123_v19  ;;  %v5575_v59 = vld [vmem:[#allocation8 + $0x1b4] ss:$24 sps:$4 sm:$0xff]   ;;  %v5573_v61 = vld [vmem:[#allocation8 + $0x1b0] ss:$24 sps:$4 sm:$0xff]   ;;  %v5581_v63 = vld [vmem:[#allocation8 + $0x184] ss:$24 sps:$4 sm:$0xff]  }
  0x5f   :  { %5489 = vmatprep.subr.mxu0 %v5987_v0  ;;  %5511 = vmatpush3.bf16.msra.mxu1 %v5536_v31  ;;  %v5578_v60 = vld [vmem:[#allocation8 + $0x1bc] ss:$24 sps:$4 sm:$0xff]   ;;  %v5576_v62 = vld [vmem:[#allocation8 + $0x1b8] ss:$24 sps:$4 sm:$0xff]   ;;  %v5582_v2 = vld [vmem:[#allocation8 + $0x188] ss:$24 sps:$4 sm:$0xff]  }
  0x60   :  { %5490 = vmatpush3.msra.mxu0 %v122_v21  ;;  %634 = vmatprep.subr.bf16.mxu1 %v5539_v32  ;;  %v5579_v1 = vld [vmem:[#allocation8 + $0x180] ss:$24 sps:$4 sm:$0xff]   ;;  %v5587_v3 = vld [vmem:[#allocation8 + $0x2e4] ss:$24 sps:$4 sm:$0xff]   ;;  %v5590_v5 = vld [vmem:[#allocation8 + $0x154] ss:$24 sps:$4 sm:$0xff]  }
  0x61   :  { %5491 = vmatprep.subr.mxu0 %v5987_v0  ;;  %v4874_v6 = vld [vmem:[#allocation7] ss:$0 sm:$0xff]  ;;  %v5585_v14 = vld [vmem:[#allocation8 + $0x2e0] ss:$24 sps:$4 sm:$0xff]   ;;  %v5588_v15 = vld [vmem:[#allocation8 + $0x150] ss:$24 sps:$4 sm:$0xff]  }
  0x62   :  { %5492 = vmatpush3.msra.mxu0 %v121_v23  ;;  %v5593_v17 = vld [vmem:[#allocation8 + $0x2b4] ss:$24 sps:$4 sm:$0xff]   ;;  %v5596_v18 = vld [vmem:[#allocation8 + $0x124] ss:$24 sps:$4 sm:$0xff]   ;;  %v5591_v19 = vld [vmem:[#allocation8 + $0x2b0] ss:$24 sps:$4 sm:$0xff]  }
  0x63   :  { %5493 = vmatprep.subr.mxu0 %v5987_v0  ;;  %v5594_v20 = vld [vmem:[#allocation8 + $0x120] ss:$24 sps:$4 sm:$0xff]   ;;  %v5599_v21 = vld [vmem:[#allocation8 + $0x284] ss:$24 sps:$4 sm:$0xff]   ;;  %v5602_v22 = vld [vmem:[#allocation8 + $0xf4] ss:$24 sps:$4 sm:$0xff]  }
  0x64   :  { %5494 = vmatpush3.msra.mxu0 %v120_v25  ;;  %v5597_v23 = vld [vmem:[#allocation8 + $0x280] ss:$24 sps:$4 sm:$0xff]   ;;  %v5600_v24 = vld [vmem:[#allocation8 + $0xf0] ss:$24 sps:$4 sm:$0xff]   ;;  %v5605_v25 = vld [vmem:[#allocation8 + $0x254] ss:$24 sps:$4 sm:$0xff]  }
  0x65   :  { %5495 = vmatprep.subr.mxu0 %v5987_v0  ;;  %v5608_v26 = vld [vmem:[#allocation8 + $0xc4] ss:$24 sps:$4 sm:$0xff]   ;;  %v5609_v31 = vld [vmem:[#allocation8 + $0x220] ss:$24 sps:$4 sm:$0xff]   ;;  %v5612_v32 = vld [vmem:[#allocation8 + $0x90] ss:$24 sps:$4 sm:$0xff]  }
  0x66   :  { %5496 = vmatpush3.msra.mxu0 %v119_v27  ;;  %v5603_v27 = vld [vmem:[#allocation8 + $0x250] ss:$24 sps:$4 sm:$0xff]   ;;  %s5945_s9 = scalar_lea.vmem %s4861_s3, 256 }
  0x67   :  { %5497 = vmatprep.subr.mxu0 %v5987_v0  ;;  %p5946_p2 = scmp.ne.s32.totalorder %s4861_s3, %s5945_s9  ;;  %p5951_p4 = scmp.lt.s32.totalorder %s5945_s9, %s5945_s9 }
  0x68   :  { %5498 = vmatpush3.msra.mxu0 %v118_v28  ;;  %v5606_v28 = vld [vmem:[#allocation8 + $0xc0] ss:$24 sps:$4 sm:$0xff]  }
  0x69   :  { %5499 = vmatprep.subr.mxu0 %v5987_v0  ;;  %v5584_v0 = vld [vmem:[#allocation8 + $0x18c] ss:$24 sps:$4 sm:$0xff]   ;;  %p5952_p5 = por %p5951_p4, %p5950_p3 }
  0x6a   :  { %5500 = vmatpush3.msra.mxu0 %v117_v29  ;;  %v5611_v29 = vld [vmem:[#allocation8 + $0x224] ss:$24 sps:$4 sm:$0xff]  }
  0x6b   :  { %5502 = vmatmul.mubr.msk.f32.vlgmr.msra.gmra.mxu0 %vm131_vm2, %v130_v30  ;;  %675 = vmatprep.subr.bf16.mxu0 %v5542_v34  ;;  %v5614_v30 = vld [vmem:[#allocation8 + $0x94] ss:$24 sps:$4 sm:$0xff]   ;;  %v5620_v34 = vld [vmem:[#allocation8 + $0x64] ss:$24 sps:$4 sm:$0xff]   ;;  %p5953_p6 = pnand %p5952_p5, %p5946_p2 }
  0x6c   :  { %676 = vmatpush1.bf16.msra.mxu0 %v5540_v33  ;;  %707 = vmatprep.mubr.bf16.mxu0 %v5989_v4  ;;  %v5617_v33 = vld [vmem:[#allocation8 + $0x1f4] ss:$24 sps:$4 sm:$0xff]  }
  0x6d   :  { %677 = vmatprep.subr.bf16.mxu0 %v5548_v35  ;;  %v5615_v35 = vld [vmem:[#allocation8 + $0x1f0] ss:$24 sps:$4 sm:$0xff]  }
  0x70   :  { %678 = vmatpush1.bf16.msra.mxu0 %v5546_v36  ;;  %v5618_v36 = vld [vmem:[#allocation8 + $0x60] ss:$24 sps:$4 sm:$0xff]  }
  0x71   :  { %679 = vmatprep.subr.bf16.mxu0 %v5554_v37  ;;  %v5623_v37 = vld [vmem:[#allocation8 + $0x1c4] ss:$24 sps:$4 sm:$0xff]  }
  0x74   :  { %680 = vmatpush1.bf16.msra.mxu0 %v5552_v38  ;;  %v5626_v38 = vld [vmem:[#allocation8 + $0x34] ss:$24 sps:$4 sm:$0xff]  }
  0x75   :  { %681 = vmatprep.subr.bf16.mxu0 %v5560_v39  ;;  %v5621_v39 = vld [vmem:[#allocation8 + $0x1c0] ss:$24 sps:$4 sm:$0xff]  }
  0x78   :  { %682 = vmatpush1.bf16.msra.mxu0 %v5558_v40  ;;  %v5624_v40 = vld [vmem:[#allocation8 + $0x30] ss:$24 sps:$4 sm:$0xff]  }
  0x79   :  { %683 = vmatprep.subr.bf16.mxu0 %v5566_v41  ;;  %v5629_v41 = vld [vmem:[#allocation8 + $0x194] ss:$24 sps:$4 sm:$0xff]  }
  0x7c   :  { %684 = vmatpush1.bf16.msra.mxu0 %v5564_v42  ;;  %v5632_v42 = vld [vmem:[#allocation8 + $0x4] ss:$24 sps:$4 sm:$0xff]  }
  0x7d   :  { %685 = vmatprep.subr.bf16.mxu0 %v5572_v43  ;;  %v5627_v43 = vld [vmem:[#allocation8 + $0x190] ss:$24 sps:$4 sm:$0xff]  }
  0x80   :  { %686 = vmatpush1.bf16.msra.mxu0 %v5570_v44  ;;  %v5630_v44 = vld [vmem:[#allocation8] ss:$24 sps:$4 sm:$0xff]  }
  0x81   :  { %687 = vmatprep.subr.bf16.mxu0 %v5578_v60  ;;  %v5654_v60 = vld [vmem:[#allocation8 + $0xd0] ss:$24 sps:$4 sm:$0xff]  }
  0x84   :  { %688 = vmatpush1.bf16.msra.mxu0 %v5576_v62  ;;  %v5662_v62 = vld [vmem:[#allocation8 + $0xa4] ss:$24 sps:$4 sm:$0xff]  }
  0x85   :  { %689 = vmatprep.subr.bf16.mxu0 %v5584_v0  ;;  %v5660_v0 = vld [vmem:[#allocation8 + $0xa0] ss:$24 sps:$4 sm:$0xff]  }
  0x88   :  { %690 = vmatpush1.bf16.msra.mxu0 %v5582_v2  ;;  %v5668_v2 = vld [vmem:[#allocation8 + $0x74] ss:$24 sps:$4 sm:$0xff]  }
  0x89   :  { %997 = vmatprep.subr.bf16.mxu0 %v5590_v5  ;;  %v5666_v5 = vld [vmem:[#allocation8 + $0x70] ss:$24 sps:$4 sm:$0xff]  }
 0x12b   :  { %v205_v45 = vpop.f32.mrf.mxu0 }
 0x12c   :  { %v209_v47 = vpack.c.bf16 %v205_v45, %v205_v45  ;;  %v5635_v45 = vld [vmem:[#allocation8 + $0x15c] ss:$24 sps:$4 sm:$0xff]  }
 0x12d   :  { %v5503_v49 = vpop.f32.mrf.mxu0 }
 0x12e   :  { %5513 = vmatmul.mubr.msk.bf16.vlgmr.msra.gmra.mxu1 %vm249_vm3, %v209_v47  ;;  %v5633_v47 = vld [vmem:[#allocation8 + $0x158] ss:$24 sps:$4 sm:$0xff]   ;;  %v5641_v49 = vld [vmem:[#allocation8 + $0x12c] ss:$24 sps:$4 sm:$0xff]  }
 0x12f   :  { %635 = vmatpush1.bf16.msra.mxu1 %v5537_v46  ;;  %666 = vmatprep.mubr.bf16.mxu1 %v5989_v4  ;;  %v5638_v46 = vld [vmem:[#allocation8 + $0x164] ss:$24 sps:$4 sm:$0xff]  }
 0x130   :  { %636 = vmatprep.subr.bf16.mxu1 %v5545_v48  ;;  %v5636_v48 = vld [vmem:[#allocation8 + $0x160] ss:$24 sps:$4 sm:$0xff]  }
 0x133   :  { %637 = vmatpush1.bf16.msra.mxu1 %v5543_v50  ;;  %v5644_v50 = vld [vmem:[#allocation8 + $0x134] ss:$24 sps:$4 sm:$0xff]  }
 0x134   :  { %638 = vmatprep.subr.bf16.mxu1 %v5551_v51  ;;  %v5639_v51 = vld [vmem:[#allocation8 + $0x128] ss:$24 sps:$4 sm:$0xff]  }
 0x137   :  { %639 = vmatpush1.bf16.msra.mxu1 %v5549_v52  ;;  %v5642_v52 = vld [vmem:[#allocation8 + $0x130] ss:$24 sps:$4 sm:$0xff]  }
 0x138   :  { %640 = vmatprep.subr.bf16.mxu1 %v5557_v53  ;;  %v5647_v53 = vld [vmem:[#allocation8 + $0xfc] ss:$24 sps:$4 sm:$0xff]  }
 0x13b   :  { %641 = vmatpush1.bf16.msra.mxu1 %v5555_v54  ;;  %v5650_v54 = vld [vmem:[#allocation8 + $0x104] ss:$24 sps:$4 sm:$0xff]  }
 0x13c   :  { %642 = vmatprep.subr.bf16.mxu1 %v5563_v55  ;;  %v5645_v55 = vld [vmem:[#allocation8 + $0xf8] ss:$24 sps:$4 sm:$0xff]  }
 0x13f   :  { %643 = vmatpush1.bf16.msra.mxu1 %v5561_v56  ;;  %v5648_v56 = vld [vmem:[#allocation8 + $0x100] ss:$24 sps:$4 sm:$0xff]  }
 0x140   :  { %644 = vmatprep.subr.bf16.mxu1 %v5569_v57  ;;  %v5653_v57 = vld [vmem:[#allocation8 + $0xcc] ss:$24 sps:$4 sm:$0xff]  }
 0x143   :  { %645 = vmatpush1.bf16.msra.mxu1 %v5567_v58  ;;  %v5656_v58 = vld [vmem:[#allocation8 + $0xd4] ss:$24 sps:$4 sm:$0xff]  }
 0x144   :  { %646 = vmatprep.subr.bf16.mxu1 %v5575_v59  ;;  %v5651_v59 = vld [vmem:[#allocation8 + $0xc8] ss:$24 sps:$4 sm:$0xff]  }
 0x147   :  { %647 = vmatpush1.bf16.msra.mxu1 %v5573_v61  ;;  %v5659_v61 = vld [vmem:[#allocation8 + $0x9c] ss:$24 sps:$4 sm:$0xff]  }
 0x148   :  { %648 = vmatprep.subr.bf16.mxu1 %v5581_v63  ;;  %v5657_v63 = vld [vmem:[#allocation8 + $0x98] ss:$24 sps:$4 sm:$0xff]  }
 0x14b   :  { %649 = vmatpush1.bf16.msra.mxu1 %v5579_v1  ;;  %v5665_v1 = vld [vmem:[#allocation8 + $0x6c] ss:$24 sps:$4 sm:$0xff]  }
 0x14c   :  { %716 = vmatprep.subr.bf16.mxu1 %v5587_v3  ;;  %v5663_v3 = vld [vmem:[#allocation8 + $0x68] ss:$24 sps:$4 sm:$0xff]  }
 0x1ee   :  { %v287_v7 = vpop.f32.mrf.mxu1 }
 0x1ef   :  { %v288_v8 = vadd.f32 %v4874_v6, %v287_v7  ;;  %v5671_v6 = vld [vmem:[#allocation8 + $0x3c] ss:$24 sps:$4 sm:$0xff]  }
 0x1f0   :  { %v5514_v9 = vpop.f32.mrf.mxu1  ;;  %v5674_v7 = vld [vmem:[#allocation8 + $0x44] ss:$24 sps:$4 sm:$0xff]  }
 0x1f1   :  { %v293_v10 = vmax.f32 %v288_v8, 0.0  ;;  %v5669_v8 = vld [vmem:[#allocation8 + $0x38] ss:$24 sps:$4 sm:$0xff]  }
 0x1f2   :  { %v290_v11 = vpop.f32.mrf.mxu1  ;;  %v5672_v9 = vld [vmem:[#allocation8 + $0x40] ss:$24 sps:$4 sm:$0xff]  }
 0x1f3   :  { %v6110_v12 = vpack.c.bf16 %v293_v10, %v293_v10  ;;  %v5677_v10 = vld [vmem:[#allocation8 + $0xc] ss:$24 sps:$4 sm:$0xff]  }
 0x1f4   :  { %v5515_v13 = vpop.f32.mrf.mxu1  ;;  %v5680_v11 = vld [vmem:[#allocation8 + $0x14] ss:$24 sps:$4 sm:$0xff]  }
 0x1f5   :  { %v6113_v16 = vrot.slane %v6110_v12, 1  ;;  %v5675_v13 = vld [vmem:[#allocation8 + $0x8] ss:$24 sps:$4 sm:$0xff]  }
 0x1f7   :  { %667 = vmatmul.mubr.bf16.vlgmr.msra.gmra.mxu1 %v6113_v16  ;;  %708 = vmatmul.mubr.bf16.vlgmr.msra.gmra.mxu0 %v6113_v16 }
 0x1f8   :  { %717 = vmatpush1.bf16.msra.mxu1 %v5585_v14  ;;  %998 = vmatpush1.bf16.msra.mxu0 %v5588_v15  ;;  %v5678_v14 = vld [vmem:[#allocation8 + $0x10] ss:$24 sps:$4 sm:$0xff]   ;;  %v5683_v15 = vld [vmem:[#allocation8 + $0x454] ss:$24 sps:$4 sm:$0xff]  }
 0x1f9   :  { %718 = vmatprep.subr.bf16.mxu1 %v5593_v17  ;;  %999 = vmatprep.subr.bf16.mxu0 %v5596_v18  ;;  %v5681_v17 = vld [vmem:[#allocation8 + $0x450] ss:$24 sps:$4 sm:$0xff]  }
 0x1fa   :  { %748 = vmatprep.mubr.bf16.mxu1 %v5989_v4  ;;  %1029 = vmatprep.mubr.bf16.mxu0 %v5989_v4  ;;  %v5684_v18 = vld [vmem:[#allocation8 + $0x458] ss:$24 sps:$4 sm:$0xff]  }
 0x1fc   :  { %719 = vmatpush1.bf16.msra.mxu1 %v5591_v19  ;;  %1000 = vmatpush1.bf16.msra.mxu0 %v5594_v20  ;;  %v5689_v19 = vld [vmem:[#allocation8 + $0x424] ss:$24 sps:$4 sm:$0xff]  }
 0x1fd   :  { %720 = vmatprep.subr.bf16.mxu1 %v5599_v21  ;;  %1001 = vmatprep.subr.bf16.mxu0 %v5602_v22  ;;  %v5692_v20 = vld [vmem:[#allocation8 + $0x42c] ss:$24 sps:$4 sm:$0xff]   ;;  %v5687_v21 = vld [vmem:[#allocation8 + $0x420] ss:$24 sps:$4 sm:$0xff]  }
 0x1fe   :  { %v5690_v22 = vld [vmem:[#allocation8 + $0x428] ss:$24 sps:$4 sm:$0xff]  }
 0x200   :  { %721 = vmatpush1.bf16.msra.mxu1 %v5597_v23  ;;  %1002 = vmatpush1.bf16.msra.mxu0 %v5600_v24  ;;  %v5695_v23 = vld [vmem:[#allocation8 + $0x3f4] ss:$24 sps:$4 sm:$0xff]  }
 0x201   :  { %722 = vmatprep.subr.bf16.mxu1 %v5605_v25  ;;  %1003 = vmatprep.subr.bf16.mxu0 %v5608_v26  ;;  %v5698_v24 = vld [vmem:[#allocation8 + $0x3fc] ss:$24 sps:$4 sm:$0xff]   ;;  %v5693_v25 = vld [vmem:[#allocation8 + $0x3f0] ss:$24 sps:$4 sm:$0xff]  }
 0x202   :  { %v5696_v26 = vld [vmem:[#allocation8 + $0x3f8] ss:$24 sps:$4 sm:$0xff]  }
 0x204   :  { %723 = vmatpush1.bf16.msra.mxu1 %v5603_v27  ;;  %1004 = vmatpush1.bf16.msra.mxu0 %v5606_v28  ;;  %v5701_v27 = vld [vmem:[#allocation8 + $0x3c4] ss:$24 sps:$4 sm:$0xff]  }
 0x205   :  { %724 = vmatprep.subr.bf16.mxu1 %v5611_v29  ;;  %1005 = vmatprep.subr.bf16.mxu0 %v5614_v30  ;;  %v5704_v28 = vld [vmem:[#allocation8 + $0x3cc] ss:$24 sps:$4 sm:$0xff]   ;;  %v5699_v29 = vld [vmem:[#allocation8 + $0x3c0] ss:$24 sps:$4 sm:$0xff]  }
 0x206   :  { %v5702_v30 = vld [vmem:[#allocation8 + $0x3c8] ss:$24 sps:$4 sm:$0xff]  }
 0x208   :  { %725 = vmatpush1.bf16.msra.mxu1 %v5609_v31  ;;  %1006 = vmatpush1.bf16.msra.mxu0 %v5612_v32  ;;  %v5707_v31 = vld [vmem:[#allocation8 + $0x394] ss:$24 sps:$4 sm:$0xff]  }
 0x209   :  { %726 = vmatprep.subr.bf16.mxu1 %v5617_v33  ;;  %1007 = vmatprep.subr.bf16.mxu0 %v5620_v34  ;;  %v5710_v32 = vld [vmem:[#allocation8 + $0x39c] ss:$24 sps:$4 sm:$0xff]   ;;  %v5705_v33 = vld [vmem:[#allocation8 + $0x390] ss:$24 sps:$4 sm:$0xff]  }
 0x20a   :  { %v5708_v34 = vld [vmem:[#allocation8 + $0x398] ss:$24 sps:$4 sm:$0xff]  }
 0x20c   :  { %727 = vmatpush1.bf16.msra.mxu1 %v5615_v35  ;;  %1008 = vmatpush1.bf16.msra.mxu0 %v5618_v36  ;;  %v5713_v35 = vld [vmem:[#allocation8 + $0x364] ss:$24 sps:$4 sm:$0xff]  }
 0x20d   :  { %728 = vmatprep.subr.bf16.mxu1 %v5623_v37  ;;  %1009 = vmatprep.subr.bf16.mxu0 %v5626_v38  ;;  %v5716_v36 = vld [vmem:[#allocation8 + $0x36c] ss:$24 sps:$4 sm:$0xff]   ;;  %v5711_v37 = vld [vmem:[#allocation8 + $0x360] ss:$24 sps:$4 sm:$0xff]  }
 0x20e   :  { %v5714_v38 = vld [vmem:[#allocation8 + $0x368] ss:$24 sps:$4 sm:$0xff]  }
 0x210   :  { %729 = vmatpush1.bf16.msra.mxu1 %v5621_v39  ;;  %1010 = vmatpush1.bf16.msra.mxu0 %v5624_v40  ;;  %v5719_v39 = vld [vmem:[#allocation8 + $0x334] ss:$24 sps:$4 sm:$0xff]  }
 0x211   :  { %730 = vmatprep.subr.bf16.mxu1 %v5629_v41  ;;  %1011 = vmatprep.subr.bf16.mxu0 %v5632_v42  ;;  %v5722_v40 = vld [vmem:[#allocation8 + $0x33c] ss:$24 sps:$4 sm:$0xff]   ;;  %v5717_v41 = vld [vmem:[#allocation8 + $0x330] ss:$24 sps:$4 sm:$0xff]  }
 0x212   :  { %v5720_v42 = vld [vmem:[#allocation8 + $0x338] ss:$24 sps:$4 sm:$0xff]  }
 0x214   :  { %731 = vmatpush1.bf16.msra.mxu1 %v5627_v43  ;;  %1012 = vmatpush1.bf16.msra.mxu0 %v5630_v44  ;;  %v5725_v43 = vld [vmem:[#allocation8 + $0x304] ss:$24 sps:$4 sm:$0xff]  }
 0x215   :  { %1038 = vmatprep.subr.bf16.mxu1 %v5635_v45  ;;  %1079 = vmatprep.subr.bf16.mxu0 %v5638_v46  ;;  %v5728_v44 = vld [vmem:[#allocation8 + $0x30c] ss:$24 sps:$4 sm:$0xff]   ;;  %v5723_v45 = vld [vmem:[#allocation8 + $0x300] ss:$24 sps:$4 sm:$0xff]  }
 0x216   :  { %v5726_v46 = vld [vmem:[#allocation8 + $0x308] ss:$24 sps:$4 sm:$0xff]  }
 0x217   :  { %749 = vmatmul.mubr.bf16.vlgmr.msra.gmra.mxu1 %v6113_v16  ;;  %1030 = vmatmul.mubr.bf16.vlgmr.msra.gmra.mxu0 %v6110_v12  ;;  %v5686_v16 = vld [vmem:[#allocation8 + $0x45c] ss:$24 sps:$4 sm:$0xff]  }
 0x218   :  { %1039 = vmatpush1.bf16.msra.mxu1 %v5633_v47  ;;  %1080 = vmatpush1.bf16.msra.mxu0 %v5636_v48  ;;  %v5731_v47 = vld [vmem:[#allocation8 + $0x464] ss:$24 sps:$4 sm:$0xff]   ;;  %v5734_v48 = vld [vmem:[#allocation8 + $0x5d4] ss:$24 sps:$4 sm:$0xff]  }
 0x219   :  { %1040 = vmatprep.subr.bf16.mxu1 %v5641_v49  ;;  %1081 = vmatprep.subr.bf16.mxu0 %v5644_v50  ;;  %v5729_v49 = vld [vmem:[#allocation8 + $0x460] ss:$24 sps:$4 sm:$0xff]   ;;  %v5732_v50 = vld [vmem:[#allocation8 + $0x5d0] ss:$24 sps:$4 sm:$0xff]  }
 0x21a   :  { %1070 = vmatprep.mubr.bf16.mxu1 %v5989_v4  ;;  %1111 = vmatprep.mubr.bf16.mxu0 %v5989_v4 }
 0x21c   :  { %1041 = vmatpush1.bf16.msra.mxu1 %v5639_v51  ;;  %1082 = vmatpush1.bf16.msra.mxu0 %v5642_v52  ;;  %v6128_v51 = vrot.slane %v6110_v12, 2  ;;  %v5737_v52 = vld [vmem:[#allocation8 + $0x434] ss:$24 sps:$4 sm:$0xff]  }
 0x21d   :  { %1042 = vmatprep.subr.bf16.mxu1 %v5647_v53  ;;  %1083 = vmatprep.subr.bf16.mxu0 %v5650_v54  ;;  %v5740_v53 = vld [vmem:[#allocation8 + $0x5a4] ss:$24 sps:$4 sm:$0xff]   ;;  %v5735_v54 = vld [vmem:[#allocation8 + $0x430] ss:$24 sps:$4 sm:$0xff]  }
 0x220   :  { %1043 = vmatpush1.bf16.msra.mxu1 %v5645_v55  ;;  %1084 = vmatpush1.bf16.msra.mxu0 %v5648_v56  ;;  %v5738_v55 = vld [vmem:[#allocation8 + $0x5a0] ss:$24 sps:$4 sm:$0xff]   ;;  %v5743_v56 = vld [vmem:[#allocation8 + $0x404] ss:$24 sps:$4 sm:$0xff]  }
 0x221   :  { %1044 = vmatprep.subr.bf16.mxu1 %v5653_v57  ;;  %1085 = vmatprep.subr.bf16.mxu0 %v5656_v58  ;;  %v5746_v57 = vld [vmem:[#allocation8 + $0x574] ss:$24 sps:$4 sm:$0xff]   ;;  %v5741_v58 = vld [vmem:[#allocation8 + $0x400] ss:$24 sps:$4 sm:$0xff]  }
 0x224   :  { %1045 = vmatpush1.bf16.msra.mxu1 %v5651_v59  ;;  %1086 = vmatpush1.bf16.msra.mxu0 %v5654_v60  ;;  %v5744_v59 = vld [vmem:[#allocation8 + $0x570] ss:$24 sps:$4 sm:$0xff]   ;;  %v5749_v60 = vld [vmem:[#allocation8 + $0x3d4] ss:$24 sps:$4 sm:$0xff]  }
 0x225   :  { %1046 = vmatprep.subr.bf16.mxu1 %v5659_v61  ;;  %1087 = vmatprep.subr.bf16.mxu0 %v5662_v62  ;;  %v5752_v61 = vld [vmem:[#allocation8 + $0x544] ss:$24 sps:$4 sm:$0xff]   ;;  %v5747_v62 = vld [vmem:[#allocation8 + $0x3d0] ss:$24 sps:$4 sm:$0xff]  }
 0x228   :  { %1047 = vmatpush1.bf16.msra.mxu1 %v5657_v63  ;;  %1088 = vmatpush1.bf16.msra.mxu0 %v5660_v0  ;;  %v5750_v63 = vld [vmem:[#allocation8 + $0x540] ss:$24 sps:$4 sm:$0xff]   ;;  %v5755_v0 = vld [vmem:[#allocation8 + $0x3a4] ss:$24 sps:$4 sm:$0xff]  }
 0x229   :  { %1048 = vmatprep.subr.bf16.mxu1 %v5665_v1  ;;  %1089 = vmatprep.subr.bf16.mxu0 %v5668_v2  ;;  %v5758_v1 = vld [vmem:[#allocation8 + $0x514] ss:$24 sps:$4 sm:$0xff]   ;;  %v5753_v2 = vld [vmem:[#allocation8 + $0x3a0] ss:$24 sps:$4 sm:$0xff]  }
 0x22c   :  { %1049 = vmatpush1.bf16.msra.mxu1 %v5663_v3  ;;  %1090 = vmatpush1.bf16.msra.mxu0 %v5666_v5  ;;  %v5756_v3 = vld [vmem:[#allocation8 + $0x510] ss:$24 sps:$4 sm:$0xff]   ;;  %v5761_v5 = vld [vmem:[#allocation8 + $0x374] ss:$24 sps:$4 sm:$0xff]  }
 0x22d   :  { %1050 = vmatprep.subr.bf16.mxu1 %v5671_v6  ;;  %1091 = vmatprep.subr.bf16.mxu0 %v5674_v7  ;;  %v5764_v6 = vld [vmem:[#allocation8 + $0x4e4] ss:$24 sps:$4 sm:$0xff]   ;;  %v5759_v7 = vld [vmem:[#allocation8 + $0x370] ss:$24 sps:$4 sm:$0xff]  }
 0x230   :  { %1051 = vmatpush1.bf16.msra.mxu1 %v5669_v8  ;;  %1092 = vmatpush1.bf16.msra.mxu0 %v5672_v9  ;;  %v5762_v8 = vld [vmem:[#allocation8 + $0x4e0] ss:$24 sps:$4 sm:$0xff]   ;;  %v5767_v9 = vld [vmem:[#allocation8 + $0x344] ss:$24 sps:$4 sm:$0xff]  }
 0x231   :  { %1052 = vmatprep.subr.bf16.mxu1 %v5677_v10  ;;  %1093 = vmatprep.subr.bf16.mxu0 %v5680_v11  ;;  %v5770_v10 = vld [vmem:[#allocation8 + $0x4b4] ss:$24 sps:$4 sm:$0xff]   ;;  %v5765_v11 = vld [vmem:[#allocation8 + $0x340] ss:$24 sps:$4 sm:$0xff]  }
 0x234   :  { %1053 = vmatpush1.bf16.msra.mxu1 %v5675_v13  ;;  %1094 = vmatpush1.bf16.msra.mxu0 %v5678_v14  ;;  %v5768_v13 = vld [vmem:[#allocation8 + $0x4b0] ss:$24 sps:$4 sm:$0xff]   ;;  %v5773_v14 = vld [vmem:[#allocation8 + $0x314] ss:$24 sps:$4 sm:$0xff]  }
 0x235   :  { %1410 = vmatprep.subr.bf16.mxu1 %v5683_v15  ;;  %1451 = vmatprep.subr.bf16.mxu0 %v5686_v16  ;;  %v5776_v15 = vld [vmem:[#allocation8 + $0x484] ss:$24 sps:$4 sm:$0xff]   ;;  %v5771_v16 = vld [vmem:[#allocation8 + $0x310] ss:$24 sps:$4 sm:$0xff]  }
 0x237   :  { %1071 = vmatmul.mubr.bf16.vlgmr.msra.gmra.mxu1 %v6110_v12  ;;  %1112 = vmatmul.mubr.bf16.vlgmr.msra.gmra.mxu0 %v6110_v12 }
 0x238   :  { %1411 = vmatpush1.bf16.msra.mxu1 %v5681_v17  ;;  %1452 = vmatpush1.bf16.msra.mxu0 %v5684_v18  ;;  %v5774_v17 = vld [vmem:[#allocation8 + $0x480] ss:$24 sps:$4 sm:$0xff]   ;;  %v5779_v18 = vld [vmem:[#allocation8 + $0x5dc] ss:$24 sps:$4 sm:$0xff]  }
 0x239   :  { %1412 = vmatprep.subr.bf16.mxu1 %v5689_v19  ;;  %1453 = vmatprep.subr.bf16.mxu0 %v5692_v20  ;;  %v5782_v19 = vld [vmem:[#allocation8 + $0x5e4] ss:$24 sps:$4 sm:$0xff]   ;;  %v5777_v20 = vld [vmem:[#allocation8 + $0x5d8] ss:$24 sps:$4 sm:$0xff]  }
 0x23a   :  { %1442 = vmatprep.mubr.bf16.mxu1 %v5989_v4  ;;  %1483 = vmatprep.mubr.bf16.mxu0 %v5989_v4 }
 0x23c   :  { %1413 = vmatpush1.bf16.msra.mxu1 %v5687_v21  ;;  %1454 = vmatpush1.bf16.msra.mxu0 %v5690_v22  ;;  %v5780_v21 = vld [vmem:[#allocation8 + $0x5e0] ss:$24 sps:$4 sm:$0xff]   ;;  %v6135_v22 = vrot.slane %v6110_v12, 3 }
 0x23d   :  { %1414 = vmatprep.subr.bf16.mxu1 %v5695_v23  ;;  %1455 = vmatprep.subr.bf16.mxu0 %v5698_v24  ;;  %v5785_v23 = vld [vmem:[#allocation8 + $0x5ac] ss:$24 sps:$4 sm:$0xff]   ;;  %v5789_v12 = vld [vmem:[#allocation8 + $0x578] ss:$24 sps:$4 sm:$0xff]  }
 0x23e   :  { %v5788_v24 = vld [vmem:[#allocation8 + $0x5b4] ss:$24 sps:$4 sm:$0xff]  }
 0x240   :  { %1415 = vmatpush1.bf16.msra.mxu1 %v5693_v25  ;;  %1456 = vmatpush1.bf16.msra.mxu0 %v5696_v26  ;;  %v5783_v25 = vld [vmem:[#allocation8 + $0x5a8] ss:$24 sps:$4 sm:$0xff]  }
 0x241   :  { %1416 = vmatprep.subr.bf16.mxu1 %v5701_v27  ;;  %1457 = vmatprep.subr.bf16.mxu0 %v5704_v28  ;;  %v5786_v26 = vld [vmem:[#allocation8 + $0x5b0] ss:$24 sps:$4 sm:$0xff]   ;;  %v5791_v27 = vld [vmem:[#allocation8 + $0x57c] ss:$24 sps:$4 sm:$0xff]  }
 0x242   :  { %v5794_v28 = vld [vmem:[#allocation8 + $0x584] ss:$24 sps:$4 sm:$0xff]  }
 0x244   :  { %1417 = vmatpush1.bf16.msra.mxu1 %v5699_v29  ;;  %1458 = vmatpush1.bf16.msra.mxu0 %v5702_v30  ;;  %v5792_v29 = vld [vmem:[#allocation8 + $0x580] ss:$24 sps:$4 sm:$0xff]   ;;  %v5797_v30 = vld [vmem:[#allocation8 + $0x54c] ss:$24 sps:$4 sm:$0xff]  }
 0x245   :  { %1418 = vmatprep.subr.bf16.mxu1 %v5707_v31  ;;  %1459 = vmatprep.subr.bf16.mxu0 %v5710_v32  ;;  %v5800_v31 = vld [vmem:[#allocation8 + $0x554] ss:$24 sps:$4 sm:$0xff]   ;;  %v5795_v32 = vld [vmem:[#allocation8 + $0x548] ss:$24 sps:$4 sm:$0xff]  }
 0x248   :  { %1419 = vmatpush1.bf16.msra.mxu1 %v5705_v33  ;;  %1460 = vmatpush1.bf16.msra.mxu0 %v5708_v34  ;;  %v5798_v33 = vld [vmem:[#allocation8 + $0x550] ss:$24 sps:$4 sm:$0xff]   ;;  %v5803_v34 = vld [vmem:[#allocation8 + $0x51c] ss:$24 sps:$4 sm:$0xff]  }
 0x249   :  { %1420 = vmatprep.subr.bf16.mxu1 %v5713_v35  ;;  %1461 = vmatprep.subr.bf16.mxu0 %v5716_v36  ;;  %v5806_v35 = vld [vmem:[#allocation8 + $0x524] ss:$24 sps:$4 sm:$0xff]   ;;  %v5801_v36 = vld [vmem:[#allocation8 + $0x518] ss:$24 sps:$4 sm:$0xff]  }
 0x24c   :  { %1421 = vmatpush1.bf16.msra.mxu1 %v5711_v37  ;;  %1462 = vmatpush1.bf16.msra.mxu0 %v5714_v38  ;;  %v5809_v37 = vld [vmem:[#allocation8 + $0x4ec] ss:$24 sps:$4 sm:$0xff]  }
 0x24d   :  { %1422 = vmatprep.subr.bf16.mxu1 %v5719_v39  ;;  %1463 = vmatprep.subr.bf16.mxu0 %v5722_v40  ;;  %v5812_v38 = vld [vmem:[#allocation8 + $0x4f4] ss:$24 sps:$4 sm:$0xff]   ;;  %v5807_v39 = vld [vmem:[#allocation8 + $0x4e8] ss:$24 sps:$4 sm:$0xff]  }
 0x24e   :  { %v5810_v40 = vld [vmem:[#allocation8 + $0x4f0] ss:$24 sps:$4 sm:$0xff]  }
 0x250   :  { %1423 = vmatpush1.bf16.msra.mxu1 %v5717_v41  ;;  %1464 = vmatpush1.bf16.msra.mxu0 %v5720_v42  ;;  %v5815_v41 = vld [vmem:[#allocation8 + $0x4bc] ss:$24 sps:$4 sm:$0xff]  }
 0x251   :  { %1424 = vmatprep.subr.bf16.mxu1 %v5725_v43  ;;  %1465 = vmatprep.subr.bf16.mxu0 %v5728_v44  ;;  %v5818_v42 = vld [vmem:[#allocation8 + $0x4c4] ss:$24 sps:$4 sm:$0xff]   ;;  %v5813_v43 = vld [vmem:[#allocation8 + $0x4b8] ss:$24 sps:$4 sm:$0xff]  }
 0x252   :  { %v5816_v44 = vld [vmem:[#allocation8 + $0x4c0] ss:$24 sps:$4 sm:$0xff]  }
 0x254   :  { %1425 = vmatpush1.bf16.msra.mxu1 %v5723_v45  ;;  %1466 = vmatpush1.bf16.msra.mxu0 %v5726_v46  ;;  %v5821_v45 = vld [vmem:[#allocation8 + $0x48c] ss:$24 sps:$4 sm:$0xff]  }
 0x255   :  { %1492 = vmatprep.subr.bf16.mxu1 %v5731_v47  ;;  %1829 = vmatprep.subr.bf16.mxu0 %v5734_v48  ;;  %v5824_v46 = vld [vmem:[#allocation8 + $0x494] ss:$24 sps:$4 sm:$0xff]   ;;  %v2026_v47 = vld [vmem:[#allocation10 + $0x1c0] sm:$0xff] }
 0x256   :  { %v2030_v48 = vld [vmem:[#allocation10 + $0x1e0] sm:$0xff] }
 0x257   :  { %1443 = vmatmul.mubr.bf16.vlgmr.msra.gmra.mxu1 %v6128_v51  ;;  %1484 = vmatmul.mubr.bf16.vlgmr.msra.gmra.mxu0 %v6128_v51 }
 0x258   :  { %1493 = vmatpush1.bf16.msra.mxu1 %v5729_v49  ;;  %1830 = vmatpush1.bf16.msra.mxu0 %v5732_v50  ;;  %v5819_v49 = vld [vmem:[#allocation8 + $0x488] ss:$24 sps:$4 sm:$0xff]  }
 0x259   :  { %1494 = vmatprep.subr.bf16.mxu1 %v5737_v52  ;;  %1831 = vmatprep.subr.bf16.mxu0 %v5740_v53  ;;  %v5822_v50 = vld [vmem:[#allocation8 + $0x490] ss:$24 sps:$4 sm:$0xff]   ;;  %v2018_v52 = vld [vmem:[#allocation10 + $0x180] sm:$0xff] }
 0x25a   :  { %1524 = vmatprep.mubr.bf16.mxu1 %v5989_v4  ;;  %1861 = vmatprep.mubr.bf16.mxu0 %v5989_v4  ;;  %v2022_v53 = vld [vmem:[#allocation10 + $0x1a0] sm:$0xff] }
 0x25c   :  { %1495 = vmatpush1.bf16.msra.mxu1 %v5735_v54  ;;  %1832 = vmatpush1.bf16.msra.mxu0 %v5738_v55  ;;  %v5128_v54 = vcombine.low %v2026_v47, %v2030_v48  ;;  %v5121_v55 = vcombine.high %v2018_v52, %v2022_v53 }
 0x25d   :  { %1496 = vmatprep.subr.bf16.mxu1 %v5743_v56  ;;  %1833 = vmatprep.subr.bf16.mxu0 %v5746_v57  ;;  %v2010_v56 = vld [vmem:[#allocation10 + $0x140] sm:$0xff] }
 0x25e   :  { %v2014_v57 = vld [vmem:[#allocation10 + $0x160] sm:$0xff] }
 0x260   :  { %1497 = vmatpush1.bf16.msra.mxu1 %v5741_v58  ;;  %1834 = vmatpush1.bf16.msra.mxu0 %v5744_v59  ;;  %v5120_v58 = vcombine.low %v2018_v52, %v2022_v53  ;;  %v5113_v59 = vcombine.high %v2010_v56, %v2014_v57 }
 0x261   :  { %1498 = vmatprep.subr.bf16.mxu1 %v5749_v60  ;;  %1835 = vmatprep.subr.bf16.mxu0 %v5752_v61  ;;  %v2002_v60 = vld [vmem:[#allocation10 + $0x100] sm:$0xff] }
 0x262   :  { %v2006_v61 = vld [vmem:[#allocation10 + $0x120] sm:$0xff] }
 0x264   :  { %1499 = vmatpush1.bf16.msra.mxu1 %v5747_v62  ;;  %1836 = vmatpush1.bf16.msra.mxu0 %v5750_v63  ;;  %v5112_v62 = vcombine.low %v2010_v56, %v2014_v57  ;;  %v5105_v63 = vcombine.high %v2002_v60, %v2006_v61 }
 0x265   :  { %1500 = vmatprep.subr.bf16.mxu1 %v5755_v0  ;;  %1837 = vmatprep.subr.bf16.mxu0 %v5758_v1  ;;  %v2154_v0 = vld [vmem:[#allocation10 + $0x5c0] sm:$0xff] }
 0x266   :  { %v1994_v1 = vld [vmem:[#allocation10 + $0xc0] sm:$0xff] }
 0x268   :  { %1501 = vmatpush1.bf16.msra.mxu1 %v5753_v2  ;;  %1838 = vmatpush1.bf16.msra.mxu0 %v5756_v3  ;;  %v1998_v2 = vld [vmem:[#allocation10 + $0xe0] sm:$0xff] }
 0x269   :  { %1502 = vmatprep.subr.bf16.mxu1 %v5761_v5  ;;  %1839 = vmatprep.subr.bf16.mxu0 %v5764_v6  ;;  %v2158_v3 = vld [vmem:[#allocation10 + $0x5e0] sm:$0xff] }
 0x26a   :  { %v5256_v5 = vcombine.low %v2154_v0, %v2158_v3  ;;  %v5257_v6 = vcombine.high %v2154_v0, %v2158_v3 }
 0x26c   :  { %1503 = vmatpush1.bf16.msra.mxu1 %v5759_v7  ;;  %1840 = vmatpush1.bf16.msra.mxu0 %v5762_v8  ;;  %v2146_v7 = vld [vmem:[#allocation10 + $0x580] sm:$0xff] }
 0x26d   :  { %1504 = vmatprep.subr.bf16.mxu1 %v5767_v9  ;;  %1841 = vmatprep.subr.bf16.mxu0 %v5770_v10  ;;  %v2150_v8 = vld [vmem:[#allocation10 + $0x5a0] sm:$0xff]  ;;  %v5104_v9 = vcombine.low %v2002_v60, %v2006_v61 }
 0x26e   :  { %v5249_v10 = vcombine.high %v2146_v7, %v2150_v8  ;;  %v2098_v60 = vld [vmem:[#allocation10 + $0x400] sm:$0xff] }
 0x26f   :  { %v2066_v61 = vld [vmem:[#allocation10 + $0x300] sm:$0xff] }
 0x270   :  { %1505 = vmatpush1.bf16.msra.mxu1 %v5765_v11  ;;  %1842 = vmatpush1.bf16.msra.mxu0 %v5768_v13  ;;  %v2138_v11 = vld [vmem:[#allocation10 + $0x540] sm:$0xff] }
 0x271   :  { %1506 = vmatprep.subr.bf16.mxu1 %v5773_v14  ;;  %1843 = vmatprep.subr.bf16.mxu0 %v5776_v15  ;;  %v2142_v13 = vld [vmem:[#allocation10 + $0x560] sm:$0xff]  ;;  %v5097_v14 = vcombine.high %v1994_v1, %v1998_v2 }
 0x272   :  { %v1986_v15 = vld [vmem:[#allocation10 + $0x80] sm:$0xff] }
 0x274   :  { %1507 = vmatpush1.bf16.msra.mxu1 %v5771_v16  ;;  %1844 = vmatpush1.bf16.msra.mxu0 %v5774_v17  ;;  %v1990_v16 = vld [vmem:[#allocation10 + $0xa0] sm:$0xff]  ;;  %v5248_v17 = vcombine.low %v2146_v7, %v2150_v8 }
 0x275   :  { %1870 = vmatprep.subr.bf16.mxu1 %v5779_v18  ;;  %1911 = vmatprep.subr.bf16.mxu0 %v5782_v19  ;;  %v5241_v18 = vcombine.high %v2138_v11, %v2142_v13  ;;  %v5096_v19 = vcombine.low %v1994_v1, %v1998_v2 }
 0x277   :  { %1525 = vmatmul.mubr.bf16.vlgmr.msra.gmra.mxu1 %v6128_v51  ;;  %1862 = vmatmul.mubr.bf16.vlgmr.msra.gmra.mxu0 %v6135_v22  ;;  %v5129_v51 = vcombine.high %v2026_v47, %v2030_v48  ;;  %v2106_v48 = vld [vmem:[#allocation10 + $0x440] sm:$0xff] }
 0x278   :  { %1871 = vmatpush1.bf16.msra.mxu1 %v5777_v20  ;;  %1912 = vmatpush1.bf16.msra.mxu0 %v5780_v21  ;;  %v2130_v20 = vld [vmem:[#allocation10 + $0x500] sm:$0xff] }
 0x279   :  { %1872 = vmatprep.subr.bf16.mxu1 %v5785_v23  ;;  %1913 = vmatprep.subr.bf16.mxu0 %v5788_v24  ;;  %v2134_v21 = vld [vmem:[#allocation10 + $0x520] sm:$0xff] }
 0x27a   :  { %1902 = vmatprep.mubr.bf16.mxu1 %v5989_v4  ;;  %1943 = vmatprep.mubr.bf16.mxu0 %v5989_v4  ;;  %v5804_v4 = vld [vmem:[#allocation8 + $0x520] ss:$24 sps:$4 sm:$0xff]  }
 0x27b   :  { %v1978_v23 = vld [vmem:[#allocation10 + $0x40] sm:$0xff] }
 0x27c   :  { %1873 = vmatpush1.bf16.msra.mxu1 %v5783_v25  ;;  %1914 = vmatpush1.bf16.msra.mxu0 %v5786_v26  ;;  %v1982_v24 = vld [vmem:[#allocation10 + $0x60] sm:$0xff]  ;;  %v5240_v25 = vcombine.low %v2138_v11, %v2142_v13  ;;  %v5233_v26 = vcombine.high %v2130_v20, %v2134_v21 }
 0x27d   :  { %1874 = vmatprep.subr.bf16.mxu1 %v5791_v27  ;;  %1915 = vmatprep.subr.bf16.mxu0 %v5794_v28  ;;  %v5088_v27 = vcombine.low %v1986_v15, %v1990_v16  ;;  %v2122_v28 = vld [vmem:[#allocation10 + $0x4c0] sm:$0xff] }
 0x27e   :  { %v6151_v11 = vld [vmem:[#allocation10 + $0x9c0] sm:$0xff] }
 0x27f   :  { %v2058_v13 = vld [vmem:[#allocation10 + $0x2c0] sm:$0xff] }
 0x280   :  { %1875 = vmatpush1.bf16.msra.mxu1 %v5789_v12  ;;  %1916 = vmatpush1.bf16.msra.mxu0 %v5792_v29  ;;  %v2126_v12 = vld [vmem:[#allocation10 + $0x4e0] sm:$0xff]  ;;  %v5081_v29 = vcombine.high %v1978_v23, %v1982_v24 }
 0x281   :  { %1876 = vmatprep.subr.bf16.mxu1 %v5797_v30  ;;  %1917 = vmatprep.subr.bf16.mxu0 %v5800_v31  ;;  %v1970_v30 = vld [vmem:[#allocation10] sm:$0xff] }
 0x282   :  { %v1974_v31 = vld [vmem:[#allocation10 + $0x20] sm:$0xff] }
 0x284   :  { %1877 = vmatpush1.bf16.msra.mxu1 %v5795_v32  ;;  %1918 = vmatpush1.bf16.msra.mxu0 %v5798_v33  ;;  %v5232_v32 = vcombine.low %v2130_v20, %v2134_v21  ;;  %v5225_v33 = vcombine.high %v2122_v28, %v2126_v12  ;;  %v2050_v21 = vld [vmem:[#allocation10 + $0x280] sm:$0xff] }
 0x285   :  { %1878 = vmatprep.subr.bf16.mxu1 %v5803_v34  ;;  %1919 = vmatprep.subr.bf16.mxu0 %v5806_v35  ;;  %v5080_v34 = vcombine.low %v1978_v23, %v1982_v24  ;;  %v2114_v35 = vld [vmem:[#allocation10 + $0x480] sm:$0xff] }
 0x286   :  { %v2210_v23 = vld [vmem:[#allocation10 + $0x780] sm:$0xff] }
 0x287   :  { %v2214_v24 = vld [vmem:[#allocation10 + $0x7a0] sm:$0xff] }
 0x288   :  { %1879 = vmatpush1.bf16.msra.mxu1 %v5801_v36  ;;  %1920 = vmatpush1.bf16.msra.mxu0 %v5804_v4  ;;  %v2118_v36 = vld [vmem:[#allocation10 + $0x4a0] sm:$0xff]  ;;  %v5073_v4 = vcombine.high %v1970_v30, %v1974_v31 }
 0x289   :  { %1880 = vmatprep.subr.bf16.mxu1 %v5809_v37  ;;  %1921 = vmatprep.subr.bf16.mxu0 %v5812_v38  ;;  %v2090_v37 = vld [vmem:[#allocation10 + $0x3c0] sm:$0xff] }
 0x28a   :  { %v2094_v38 = vld [vmem:[#allocation10 + $0x3e0] sm:$0xff] }
 0x28c   :  { %1881 = vmatpush1.bf16.msra.mxu1 %v5807_v39  ;;  %1922 = vmatpush1.bf16.msra.mxu0 %v5810_v40  ;;  %v5224_v39 = vcombine.low %v2122_v28, %v2126_v12  ;;  %v5217_v40 = vcombine.high %v2114_v35, %v2118_v36  ;;  %v2042_v12 = vld [vmem:[#allocation10 + $0x240] sm:$0xff] }
 0x28d   :  { %1882 = vmatprep.subr.bf16.mxu1 %v5815_v41  ;;  %1923 = vmatprep.subr.bf16.mxu0 %v5818_v42  ;;  %v5072_v41 = vcombine.low %v1970_v30, %v1974_v31  ;;  %v5193_v42 = vcombine.high %v2090_v37, %v2094_v38  ;;  %v2202_v30 = vld [vmem:[#allocation10 + $0x740] sm:$0xff] }
 0x28e   :  { %v2206_v31 = vld [vmem:[#allocation10 + $0x760] sm:$0xff] }
 0x290   :  { %1883 = vmatpush1.bf16.msra.mxu1 %v5813_v43  ;;  %1924 = vmatpush1.bf16.msra.mxu0 %v5816_v44  ;;  %v2082_v43 = vld [vmem:[#allocation10 + $0x380] sm:$0xff] }
 0x291   :  { %1884 = vmatprep.subr.bf16.mxu1 %v5821_v45  ;;  %1925 = vmatprep.subr.bf16.mxu0 %v5824_v46  ;;  %v2086_v44 = vld [vmem:[#allocation10 + $0x3a0] sm:$0xff]  ;;  %v5216_v45 = vcombine.low %v2114_v35, %v2118_v36  ;;  %v5192_v46 = vcombine.low %v2090_v37, %v2094_v38 }
 0x292   :  { %v5185_v47 = vcombine.high %v2082_v43, %v2086_v44  ;;  %v5184_v56 = vcombine.low %v2082_v43, %v2086_v44  ;;  %v2034_v36 = vld [vmem:[#allocation10 + $0x200] sm:$0xff] }
 0x293   :  { %v2194_v37 = vld [vmem:[#allocation10 + $0x700] sm:$0xff] }
 0x294   :  { %1885 = vmatpush1.bf16.msra.mxu1 %v5819_v49  ;;  %1926 = vmatpush1.bf16.msra.mxu0 %v5822_v50  ;;  %v2074_v49 = vld [vmem:[#allocation10 + $0x340] sm:$0xff] }
 0x295   :  { %4316 = vmatprep.subr.bf16.mxu1 %v5129_v51  ;;  %4357 = vmatprep.subr.bf16.mxu0 %v5257_v6  ;;  %v2078_v50 = vld [vmem:[#allocation10 + $0x360] sm:$0xff] }
 0x296   :  { %v2110_v51 = vld [vmem:[#allocation10 + $0x460] sm:$0xff] }
 0x297   :  { %1903 = vmatmul.mubr.bf16.vlgmr.msra.gmra.mxu1 %v6135_v22  ;;  %1944 = vmatmul.mubr.bf16.vlgmr.msra.gmra.mxu0 %v6135_v22  ;;  %v5089_v22 = vcombine.high %v1986_v15, %v1990_v16  ;;  %v6153_v16 = vld [vmem:[#allocation10 + $0x9e0] sm:$0xff] }
 0x298   :  { %4317 = vmatpush1.bf16.msra.mxu1 %v5128_v54  ;;  %4358 = vmatpush1.bf16.msra.mxu0 %v5256_v5  ;;  %v5208_v54 = vcombine.low %v2106_v48, %v2110_v51  ;;  %v5176_v5 = vcombine.low %v2074_v49, %v2078_v50  ;;  %v2198_v38 = vld [vmem:[#allocation10 + $0x720] sm:$0xff] }
 0x299   :  { %4318 = vmatprep.subr.bf16.mxu1 %v5121_v55  ;;  %4359 = vmatprep.subr.bf16.mxu0 %v5249_v10  ;;  %v5209_v55 = vcombine.high %v2106_v48, %v2110_v51  ;;  %v2222_v10 = vld [vmem:[#allocation10 + $0x7e0] sm:$0xff]  ;;  %v5385_v48 = vcombine.high %v6151_v11, %v6153_v16 }
 0x29a   :  { %v2186_v43 = vld [vmem:[#allocation10 + $0x6c0] sm:$0xff] }
 0x29b   :  { %v2190_v44 = vld [vmem:[#allocation10 + $0x6e0] sm:$0xff] }
 0x29c   :  { %4319 = vmatpush1.bf16.msra.mxu1 %v5120_v58  ;;  %4360 = vmatpush1.bf16.msra.mxu0 %v5248_v17 }
 0x29d   :  { %4320 = vmatprep.subr.bf16.mxu1 %v5113_v59  ;;  %4361 = vmatprep.subr.bf16.mxu0 %v5241_v18  ;;  %v5177_v59 = vcombine.high %v2074_v49, %v2078_v50  ;;  %v5384_v18 = vcombine.low %v6151_v11, %v6153_v16  ;;  %v2178_v49 = vld [vmem:[#allocation10 + $0x680] sm:$0xff] }
 0x29e   :  { %v2182_v50 = vld [vmem:[#allocation10 + $0x6a0] sm:$0xff] }
 0x29f   :  { %v5280_v51 = vcombine.low %v2178_v49, %v2182_v50 }
 0x2a0   :  { %4321 = vmatpush1.bf16.msra.mxu1 %v5112_v62  ;;  %4362 = vmatpush1.bf16.msra.mxu0 %v5240_v25  ;;  %v2070_v62 = vld [vmem:[#allocation10 + $0x320] sm:$0xff]  ;;  %v5312_v25 = vcombine.low %v2210_v23, %v2214_v24 }
 0x2a1   :  { %4322 = vmatprep.subr.bf16.mxu1 %v5105_v63  ;;  %4363 = vmatprep.subr.bf16.mxu0 %v5233_v26  ;;  %v2102_v63 = vld [vmem:[#allocation10 + $0x420] sm:$0xff]  ;;  %v5169_v8 = vcombine.high %v2066_v61, %v2070_v62  ;;  %v5313_v26 = vcombine.high %v2210_v23, %v2214_v24 }
 0x2a2   :  { %v5200_v2 = vcombine.low %v2098_v60, %v2102_v63  ;;  %v5201_v3 = vcombine.high %v2098_v60, %v2102_v63 }
 0x2a4   :  { %4323 = vmatpush1.bf16.msra.mxu1 %v5104_v9  ;;  %4364 = vmatpush1.bf16.msra.mxu0 %v5232_v32  ;;  %v2218_v9 = vld [vmem:[#allocation10 + $0x7c0] sm:$0xff]  ;;  %v5304_v32 = vcombine.low %v2202_v30, %v2206_v31 }
 0x2a5   :  { %4324 = vmatprep.subr.bf16.mxu1 %v5097_v14  ;;  %4365 = vmatprep.subr.bf16.mxu0 %v5225_v33  ;;  %v2062_v14 = vld [vmem:[#allocation10 + $0x2e0] sm:$0xff]  ;;  %v5321_v15 = vcombine.high %v2218_v9, %v2222_v10  ;;  %v5320_v17 = vcombine.low %v2218_v9, %v2222_v10  ;;  %v5305_v33 = vcombine.high %v2202_v30, %v2206_v31 }
 0x2a6   :  { %v5161_v20 = vcombine.high %v2058_v13, %v2062_v14 }
 0x2a8   :  { %4325 = vmatpush1.bf16.msra.mxu1 %v5096_v19  ;;  %4366 = vmatpush1.bf16.msra.mxu0 %v5224_v39  ;;  %v5168_v19 = vcombine.low %v2066_v61, %v2070_v62  ;;  %v5296_v39 = vcombine.low %v2194_v37, %v2198_v38 }
 0x2a9   :  { %4326 = vmatprep.subr.bf16.mxu1 %v5089_v22  ;;  %4367 = vmatprep.subr.bf16.mxu0 %v5217_v40  ;;  %v2054_v22 = vld [vmem:[#allocation10 + $0x2a0] sm:$0xff]  ;;  %v5297_v40 = vcombine.high %v2194_v37, %v2198_v38 }
 0x2aa   :  { %v5153_v28 = vcombine.high %v2050_v21, %v2054_v22 }
 0x2ac   :  { %4327 = vmatpush1.bf16.msra.mxu1 %v5088_v27  ;;  %4368 = vmatpush1.bf16.msra.mxu0 %v5216_v45  ;;  %v5160_v27 = vcombine.low %v2058_v13, %v2062_v14  ;;  %v5288_v45 = vcombine.low %v2186_v43, %v2190_v44  ;;  %v6161_v14 = vld [vmem:[#allocation10 + $0x1c8] sm:$0xff] }
 0x2ad   :  { %4328 = vmatprep.subr.bf16.mxu1 %v5081_v29  ;;  %4369 = vmatprep.subr.bf16.mxu0 %v5209_v55  ;;  %v2046_v29 = vld [vmem:[#allocation10 + $0x260] sm:$0xff] }
 0x2ae   :  { %v5145_v35 = vcombine.high %v2042_v12, %v2046_v29  ;;  %v2170_v55 = vld [vmem:[#allocation10 + $0x640] sm:$0xff] }
 0x2b0   :  { %4329 = vmatpush1.bf16.msra.mxu1 %v5080_v34  ;;  %4370 = vmatpush1.bf16.msra.mxu0 %v5208_v54  ;;  %v5152_v34 = vcombine.low %v2050_v21, %v2054_v22  ;;  %v5281_v54 = vcombine.high %v2178_v49, %v2182_v50  ;;  %v2278_v49 = vld [vmem:[#allocation10 + $0x9a0] sm:$0xff] }
 0x2b1   :  { %4330 = vmatprep.subr.bf16.mxu1 %v5073_v4  ;;  %4371 = vmatprep.subr.bf16.mxu0 %v5201_v3  ;;  %v2038_v4 = vld [vmem:[#allocation10 + $0x220] sm:$0xff] }
 0x2b2   :  { %v2162_v3 = vld [vmem:[#allocation10 + $0x600] sm:$0xff] }
 0x2b4   :  { %4331 = vmatpush1.bf16.msra.mxu1 %v5072_v41  ;;  %4372 = vmatpush1.bf16.msra.mxu0 %v5200_v2  ;;  %v5144_v41 = vcombine.low %v2042_v12, %v2046_v29 }
 0x2b5   :  { %4332 = vmatprep.subr.bf16.mxu1 %v5193_v42  ;;  %4373 = vmatprep.subr.bf16.mxu0 %v5321_v15  ;;  %v5137_v42 = vcombine.high %v2034_v36, %v2038_v4 }
 0x2b7   :  { %v6143_v52 = vpop.f32.mrf.mxu1  ;;  %v6145_v53 = vpop.f32.mrf.mxu0 }
 0x2b8   :  { %4333 = vmatpush2.bf16.msra.mxu1 %v5192_v46  ;;  %4374 = vmatpush2.bf16.msra.mxu0 %v5320_v17  ;;  %v5289_v46 = vcombine.high %v2186_v43, %v2190_v44 }
 0x2b9   :  { %v6147_v57 = vpop.f32.mrf.mxu1  ;;  %v6149_v58 = vpop.f32.mrf.mxu0  ;;  %4334 = vmatprep.subr.bf16.mxu1 %v5185_v47  ;;  %4375 = vmatprep.subr.bf16.mxu0 %v5313_v26  ;;  %v5136_v47 = vcombine.low %v2034_v36, %v2038_v4 }
 0x2bb   :  { %v672_v0 = vpop.f32.mrf.mxu1  ;;  %v713_v1 = vpop.f32.mrf.mxu0 }
 0x2bc   :  { %4335 = vmatpush2.bf16.msra.mxu1 %v5184_v56  ;;  %4376 = vmatpush2.bf16.msra.mxu0 %v5312_v25  ;;  %v2174_v56 = vld [vmem:[#allocation10 + $0x660] sm:$0xff] }
 0x2bd   :  { %v673_v6 = vpop.f32.mrf.mxu1  ;;  %v714_v7 = vpop.f32.mrf.mxu0  ;;  %4336 = vmatprep.subr.bf16.mxu1 %v5177_v59  ;;  %4377 = vmatprep.subr.bf16.mxu0 %v5305_v33  ;;  %v5273_v61 = vcombine.high %v2170_v55, %v2174_v56  ;;  %v5272_v63 = vcombine.low %v2170_v55, %v2174_v56 }
 0x2c0   :  { %4337 = vmatpush2.bf16.msra.mxu1 %v5176_v5  ;;  %4378 = vmatpush2.bf16.msra.mxu0 %v5304_v32  ;;  %v2166_v5 = vld [vmem:[#allocation10 + $0x620] sm:$0xff] }
 0x2c1   :  { %4338 = vmatprep.subr.bf16.mxu1 %v5169_v8  ;;  %4379 = vmatprep.subr.bf16.mxu0 %v5297_v40  ;;  %v5265_v8 = vcombine.high %v2162_v3, %v2166_v5  ;;  %v5264_v9 = vcombine.low %v2162_v3, %v2166_v5  ;;  %v2250_v3 = vld [vmem:[#allocation10 + $0x8c0] sm:$0xff] }
 0x2c2   :  { %v2254_v5 = vld [vmem:[#allocation10 + $0x8e0] sm:$0xff] }
 0x2c3   :  { %v5352_v11 = vcombine.low %v2250_v3, %v2254_v5 }
 0x2c4   :  { %4339 = vmatpush2.bf16.msra.mxu1 %v5168_v19  ;;  %4380 = vmatpush2.bf16.msra.mxu0 %v5296_v39 }
 0x2c5   :  { %4340 = vmatprep.subr.bf16.mxu1 %v5161_v20  ;;  %4381 = vmatprep.subr.bf16.mxu0 %v5289_v46 }
 0x2c8   :  { %4341 = vmatpush2.bf16.msra.mxu1 %v5160_v27  ;;  %4382 = vmatpush2.bf16.msra.mxu0 %v5288_v45 }
 0x2c9   :  { %4342 = vmatprep.subr.bf16.mxu1 %v5153_v28  ;;  %4383 = vmatprep.subr.bf16.mxu0 %v5281_v54 }
 0x2cc   :  { %4343 = vmatpush2.bf16.msra.mxu1 %v5152_v34  ;;  %4384 = vmatpush2.bf16.msra.mxu0 %v5280_v51 }
 0x2cd   :  { %4344 = vmatprep.subr.bf16.mxu1 %v5145_v35  ;;  %4385 = vmatprep.subr.bf16.mxu0 %v5273_v61 }
 0x2d0   :  { %4345 = vmatpush2.bf16.msra.mxu1 %v5144_v41  ;;  %4386 = vmatpush2.bf16.msra.mxu0 %v5272_v63  ;;  %v2258_v63 = vld [vmem:[#allocation10 + $0x900] sm:$0xff] }
 0x2d1   :  { %4346 = vmatprep.subr.bf16.mxu1 %v5137_v42  ;;  %4387 = vmatprep.subr.bf16.mxu0 %v5265_v8  ;;  %v2242_v8 = vld [vmem:[#allocation10 + $0x880] sm:$0xff] }
 0x2d4   :  { %4347 = vmatpush2.bf16.msra.mxu1 %v5136_v47  ;;  %4388 = vmatpush2.bf16.msra.mxu0 %v5264_v9  ;;  %v2246_v9 = vld [vmem:[#allocation10 + $0x8a0] sm:$0xff] }
 0x2d5   :  { %4398 = vmatprep.subr.bf16.mxu1 %v5385_v48  ;;  %v2274_v48 = vld [vmem:[#allocation10 + $0x980] sm:$0xff]  ;;  %v5345_v16 = vcombine.high %v2242_v8, %v2246_v9 }
 0x2d6   :  { %v5377_v56 = vcombine.high %v2274_v48, %v2278_v49  ;;  %v5376_v61 = vcombine.low %v2274_v48, %v2278_v49  ;;  %v2330_v48 = vld [vmem:[#allocation10 + $0xb40] sm:$0xff] }
 0x2d7   :  { %v750_v59 = vpop.f32.mrf.mxu1  ;;  %v1031_v60 = vpop.f32.mrf.mxu0 }
 0x2d8   :  { %v1032_v62 = vadd.f32 %v1031_v60, %v6143_v52  ;;  %v6163_v52 = vld [vmem:[#allocation10 + $0x1e8] sm:$0xff]  ;;  %v2270_v60 = vld [vmem:[#allocation10 + $0x960] sm:$0xff] }
 0x2d9   :  { %v752_v0 = vpop.f32.mrf.mxu1  ;;  %v1033_v1 = vpop.f32.mrf.mxu0  ;;  %v5130_v15 = vcombine.low %v6161_v14, %v6163_v52 }
 0x2da   :  { %v1034_v2 = vadd.f32 %v1033_v1, %v6147_v57  ;;  %v5131_v57 = vcombine.high %v6161_v14, %v6163_v52 }
 0x2db   :  { %v754_v6 = vpop.f32.mrf.mxu1  ;;  %v1035_v7 = vpop.f32.mrf.mxu0 }
 0x2dc   :  { %4439 = vmatprep.subr.bf16.mxu0 %v5131_v57  ;;  %v5353_v7 = vcombine.high %v2250_v3, %v2254_v5 }
 0x2dd   :  { %v755_v10 = vpop.f32.mrf.mxu1  ;;  %v1036_v13 = vpop.f32.mrf.mxu0 }
 0x2de   :  { %v2238_v10 = vld [vmem:[#allocation10 + $0x860] sm:$0xff]  ;;  %v5344_v13 = vcombine.low %v2242_v8, %v2246_v9  ;;  %v1999_v8 = vld [vmem:[#allocation10 + $0xe8] sm:$0xff] }
 0x2f7   :  { %v1072_v17 = vpop.f32.mrf.mxu1  ;;  %v1113_v19 = vpop.f32.mrf.mxu0 }
 0x2f8   :  { %v1073_v20 = vadd.f32 %v1072_v17, %v6145_v53  ;;  %v1114_v21 = vadd.f32 %v1113_v19, %v750_v59  ;;  %v2266_v59 = vld [vmem:[#allocation10 + $0x940] sm:$0xff] }
 0x2f9   :  { %v1074_v22 = vpop.f32.mrf.mxu1  ;;  %v1115_v23 = vpop.f32.mrf.mxu0  ;;  %v5368_v1 = vcombine.low %v2266_v59, %v2270_v60  ;;  %v2226_v17 = vld [vmem:[#allocation10 + $0x800] sm:$0xff] }
 0x2fa   :  { %v6171_v24 = vadd.f32 %v1074_v22, %v6149_v58  ;;  %v6173_v25 = vadd.f32 %v1115_v23, %v752_v0  ;;  %v2262_v0 = vld [vmem:[#allocation10 + $0x920] sm:$0xff] }
 0x2fb   :  { %v1076_v26 = vpop.f32.mrf.mxu1  ;;  %v1117_v27 = vpop.f32.mrf.mxu0  ;;  %v5360_v6 = vcombine.low %v2258_v63, %v2262_v0  ;;  %v2230_v19 = vld [vmem:[#allocation10 + $0x820] sm:$0xff] }
 0x2fc   :  { %v5329_v23 = vcombine.high %v2226_v17, %v2230_v19 }
 0x2fd   :  { %v1077_v28 = vpop.f32.mrf.mxu1  ;;  %v1118_v12 = vpop.f32.mrf.mxu0 }
 0x2fe   :  { %v2346_v12 = vld [vmem:[#allocation10 + $0xbc0] sm:$0xff] }
 0x317   :  { %v1444_v29 = vpop.f32.mrf.mxu1  ;;  %v1485_v30 = vpop.f32.mrf.mxu0 }
 0x318   :  { %v6175_v31 = vadd.f32 %v1485_v30, %v1073_v20  ;;  %v1533_v4 = vadd.f32 %v1444_v29, %v1032_v62  ;;  %v5369_v62 = vcombine.high %v2266_v59, %v2270_v60  ;;  %v2350_v29 = vld [vmem:[#allocation10 + $0xbe0] sm:$0xff] }
 0x319   :  { %v1446_v32 = vpop.f32.mrf.mxu1  ;;  %v6177_v33 = vpop.f32.mrf.mxu0 }
 0x31a   :  { %v1534_v38 = vadd.f32 %v1446_v32, %v1034_v2  ;;  %v5361_v2 = vcombine.high %v2258_v63, %v2262_v0  ;;  %v1536_v26 = vadd.f32 %v6177_v33, %v6171_v24  ;;  %v2338_v24 = vld [vmem:[#allocation10 + $0xb80] sm:$0xff] }
 0x31b   :  { %v1448_v53 = vpop.f32.mrf.mxu1  ;;  %v1489_v34 = vpop.f32.mrf.mxu0  ;;  %v2342_v33 = vld [vmem:[#allocation10 + $0xba0] sm:$0xff] }
 0x31c   :  { %v5440_v59 = vcombine.low %v2338_v24, %v2342_v33  ;;  %v2322_v63 = vld [vmem:[#allocation10 + $0xb00] sm:$0xff] }
 0x31d   :  { %v1449_v35 = vpop.f32.mrf.mxu1  ;;  %v1490_v36 = vpop.f32.mrf.mxu0  ;;  %v2326_v0 = vld [vmem:[#allocation10 + $0xb20] sm:$0xff] }
 0x31e   :  { %v5328_v35 = vcombine.low %v2226_v17, %v2230_v19  ;;  %v5425_v14 = vcombine.high %v2322_v63, %v2326_v0  ;;  %v5424_v9 = vcombine.low %v2322_v63, %v2326_v0  ;;  %v1991_v17 = vld [vmem:[#allocation10 + $0xa8] sm:$0xff] }
 0x31f   :  { %v2079_v0 = vld [vmem:[#allocation10 + $0x368] sm:$0xff] }
 0x337   :  { %v1526_v58 = vpop.f32.mrf.mxu1  ;;  %v1863_v37 = vpop.f32.mrf.mxu0 }
 0x338   :  { %v6179_v39 = vadd.f32 %v1526_v58, %v1114_v21  ;;  %v1952_v40 = vadd.f32 %v1863_v37, %v1533_v4  ;;  %v5449_v37 = vcombine.high %v2346_v12, %v2350_v29 }
 0x339   :  { %v1528_v41 = vpop.f32.mrf.mxu1  ;;  %v1865_v42 = vpop.f32.mrf.mxu0 }
 0x33a   :  { %v1953_v43 = vadd.f32 %v1865_v42, %v1534_v38  ;;  %v1958_v44 = vmax.f32 %v1952_v40, 0.0  ;;  %v1538_v27 = vadd.f32 %v1528_v41, %v6173_v25  ;;  %v2023_v42 = vld [vmem:[#allocation10 + $0x1a8] sm:$0xff] }
 0x33b   :  { %v1530_v45 = vpop.f32.mrf.mxu1  ;;  %v1867_v46 = vpop.f32.mrf.mxu0 }
 0x33c   :  { %v1959_v47 = vmax.f32 %v1953_v43, 0.0  ;;  %v6183_v55 = vpack.c.bf16 %v1958_v44, %v1958_v44  ;;  %v5448_v45 = vcombine.low %v2346_v12, %v2350_v29  ;;  %v1983_v12 = vld [vmem:[#allocation10 + $0x68] sm:$0xff] }
 0x33d   :  { %v1531_v50 = vpop.f32.mrf.mxu1  ;;  %v1868_v51 = vpop.f32.mrf.mxu0 }
 0x33e   :  { %v6181_v54 = vpack.c.bf16 %v1959_v47, %v1959_v47  ;;  %v5441_v47 = vcombine.high %v2338_v24, %v2342_v33  ;;  %v2334_v50 = vld [vmem:[#allocation10 + $0xb60] sm:$0xff]  ;;  %v2011_v51 = vld [vmem:[#allocation10 + $0x148] sm:$0xff] }
 0x33f   :  { %v5432_v3 = vcombine.low %v2330_v48, %v2334_v50  ;;  %v2091_v33 = vld [vmem:[#allocation10 + $0x3c8] sm:$0xff] }
 0x340   :  { %4348 = vmatprep.mubr.bf16.mxu1 %v6181_v54 }
 0x341   :  { %4349 = vmatmul.mubr.bf16.vlgmr.msra.gmra.mxu1 %v6183_v55 }
 0x342   :  { %4399 = vmatpush1.bf16.msra.mxu1 %v5384_v18  ;;  %v2234_v18 = vld [vmem:[#allocation10 + $0x840] sm:$0xff] }
 0x343   :  { %4400 = vmatprep.subr.bf16.mxu1 %v5377_v56  ;;  %v5337_v57 = vcombine.high %v2234_v18, %v2238_v10  ;;  %v5336_v20 = vcombine.low %v2234_v18, %v2238_v10  ;;  %v2015_v56 = vld [vmem:[#allocation10 + $0x168] sm:$0xff]  ;;  %v2306_v10 = vld [vmem:[#allocation10 + $0xa80] sm:$0xff] }
 0x344   :  { %v5114_v5 = vcombine.low %v2011_v51, %v2015_v56 }
 0x346   :  { %4401 = vmatpush1.bf16.msra.mxu1 %v5376_v61  ;;  %v5433_v61 = vcombine.high %v2330_v48, %v2334_v50  ;;  %v2083_v50 = vld [vmem:[#allocation10 + $0x388] sm:$0xff] }
 0x347   :  { %4402 = vmatprep.subr.bf16.mxu1 %v5369_v62  ;;  %v5115_v62 = vcombine.high %v2011_v51, %v2015_v56  ;;  %v2087_v51 = vld [vmem:[#allocation10 + $0x3a8] sm:$0xff] }
 0x34a   :  { %4403 = vmatpush1.bf16.msra.mxu1 %v5368_v1  ;;  %v2003_v1 = vld [vmem:[#allocation10 + $0x108] sm:$0xff] }
 0x34b   :  { %4404 = vmatprep.subr.bf16.mxu1 %v5361_v2  ;;  %v2007_v2 = vld [vmem:[#allocation10 + $0x128] sm:$0xff] }
 0x34c   :  { %v5107_v52 = vcombine.high %v2003_v1, %v2007_v2 }
 0x34e   :  { %4405 = vmatpush1.bf16.msra.mxu1 %v5360_v6  ;;  %v2318_v6 = vld [vmem:[#allocation10 + $0xae0] sm:$0xff] }
 0x34f   :  { %4406 = vmatprep.subr.bf16.mxu1 %v5353_v7  ;;  %v1995_v7 = vld [vmem:[#allocation10 + $0xc8] sm:$0xff] }
 0x350   :  { %v5099_v18 = vcombine.high %v1995_v7, %v1999_v8 }
 0x352   :  { %4407 = vmatpush1.bf16.msra.mxu1 %v5352_v11  ;;  %v5106_v11 = vcombine.low %v2003_v1, %v2007_v2  ;;  %v2139_v1 = vld [vmem:[#allocation10 + $0x548] sm:$0xff] }
 0x353   :  { %4408 = vmatprep.subr.bf16.mxu1 %v5345_v16  ;;  %v2143_v2 = vld [vmem:[#allocation10 + $0x568] sm:$0xff] }
 0x356   :  { %4409 = vmatpush1.bf16.msra.mxu1 %v5344_v13  ;;  %v2310_v13 = vld [vmem:[#allocation10 + $0xaa0] sm:$0xff] }
 0x357   :  { %v1904_v21 = vpop.f32.mrf.mxu1  ;;  %v6190_v22 = vpop.f32.mrf.mxu0  ;;  %4410 = vmatprep.subr.bf16.mxu1 %v5337_v57  ;;  %v1987_v57 = vld [vmem:[#allocation10 + $0x88] sm:$0xff]  ;;  %v5408_v29 = vcombine.low %v2306_v10, %v2310_v13 }
 0x358   :  { %v1954_v28 = vadd.f32 %v1904_v21, %v6175_v31  ;;  %v2019_v31 = vld [vmem:[#allocation10 + $0x188] sm:$0xff]  ;;  %v5409_v21 = vcombine.high %v2306_v10, %v2310_v13 }
 0x359   :  { %v1906_v30 = vpop.f32.mrf.mxu1  ;;  %v1947_v32 = vpop.f32.mrf.mxu0  ;;  %v5123_v49 = vcombine.high %v2019_v31, %v2023_v42  ;;  %v5122_v60 = vcombine.low %v2019_v31, %v2023_v42  ;;  %v2159_v31 = vld [vmem:[#allocation10 + $0x5e8] sm:$0xff] }
 0x35a   :  { %v1955_v53 = vadd.f32 %v1906_v30, %v1536_v26  ;;  %v1957_v34 = vadd.f32 %v1947_v32, %v1538_v27  ;;  %4411 = vmatpush1.bf16.msra.mxu1 %v5336_v20  ;;  %v1960_v36 = vmax.f32 %v1954_v28, 0.0  ;;  %v5098_v20 = vcombine.low %v1995_v7, %v1999_v8  ;;  %v2298_v26 = vld [vmem:[#allocation10 + $0xa40] sm:$0xff]  ;;  %v1979_v28 = vld [vmem:[#allocation10 + $0x48] sm:$0xff] }
 0x35b   :  { %v1908_v4 = vpop.f32.mrf.mxu1  ;;  %v1949_v58 = vpop.f32.mrf.mxu0  ;;  %4412 = vmatprep.subr.bf16.mxu1 %v5329_v23  ;;  %v5091_v23 = vcombine.high %v1987_v57, %v1991_v17  ;;  %v2302_v27 = vld [vmem:[#allocation10 + $0xa60] sm:$0xff]  ;;  %v5090_v30 = vcombine.low %v1987_v57, %v1991_v17  ;;  %v2131_v7 = vld [vmem:[#allocation10 + $0x508] sm:$0xff] }
 0x35c   :  { %v1961_v38 = vmax.f32 %v1955_v53, 0.0  ;;  %v1963_v40 = vmax.f32 %v1957_v34, 0.0  ;;  %v6200_v46 = vpack.c.bf16 %v1960_v36, %v1960_v36  ;;  %v5401_v32 = vcombine.high %v2298_v26, %v2302_v27  ;;  %v2290_v34 = vld [vmem:[#allocation10 + $0xa00] sm:$0xff]  ;;  %v1971_v36 = vld [vmem:[#allocation10 + $0x8] sm:$0xff] }
 0x35d   :  { %v1909_v25 = vpop.f32.mrf.mxu1  ;;  %v1950_v41 = vpop.f32.mrf.mxu0  ;;  %v5083_v53 = vcombine.high %v1979_v28, %v1983_v12  ;;  %v1975_v4 = vld [vmem:[#allocation10 + $0x28] sm:$0xff]  ;;  %v5400_v58 = vcombine.low %v2298_v26, %v2302_v27 }
 0x35e   :  { %v6196_v43 = vpack.c.bf16 %v1961_v38, %v1961_v38  ;;  %v6198_v44 = vpack.c.bf16 %v1963_v40, %v1963_v40  ;;  %4413 = vmatpush1.bf16.msra.mxu1 %v5328_v35  ;;  %v2294_v35 = vld [vmem:[#allocation10 + $0xa20] sm:$0xff]  ;;  %v1956_v38 = vadd.f32 %v6190_v22, %v6179_v39  ;;  %v5075_v24 = vcombine.high %v1971_v36, %v1975_v4  ;;  %v2095_v25 = vld [vmem:[#allocation10 + $0x3e8] sm:$0xff] }
 0x35f   :  { %4414 = vmatprep.subr.bf16.mxu1 %v5449_v37  ;;  %v5082_v37 = vcombine.low %v1979_v28, %v1983_v12  ;;  %v5393_v40 = vcombine.high %v2290_v34, %v2294_v35  ;;  %v2155_v41 = vld [vmem:[#allocation10 + $0x5c8] sm:$0xff]  ;;  %v5392_v42 = vcombine.low %v2290_v34, %v2294_v35  ;;  %v5195_v48 = vcombine.high %v2091_v33, %v2095_v25 }
 0x360   :  { %4389 = vmatprep.mubr.bf16.mxu0 %v6196_v43  ;;  %4430 = vmatprep.mubr.bf16.mxu1 %v6198_v44  ;;  %v2147_v39 = vld [vmem:[#allocation10 + $0x588] sm:$0xff]  ;;  %v5194_v56 = vcombine.low %v2091_v33, %v2095_v25 }
 0x361   :  { %4390 = vmatmul.mubr.bf16.vlgmr.msra.gmra.mxu0 %v6200_v46  ;;  %v2151_v22 = vld [vmem:[#allocation10 + $0x5a8] sm:$0xff] }
 0x362   :  { %4415 = vmatpush2.bf16.msra.mxu1 %v5448_v45  ;;  %4440 = vmatpush1.bf16.msra.mxu0 %v5130_v15  ;;  %v2314_v15 = vld [vmem:[#allocation10 + $0xac0] sm:$0xff]  ;;  %v5074_v45 = vcombine.low %v1971_v36, %v1975_v4  ;;  %v5251_v63 = vcombine.high %v2147_v39, %v2151_v22  ;;  %v2135_v8 = vld [vmem:[#allocation10 + $0x528] sm:$0xff] }
 0x363   :  { %4471 = vmatprep.mubr.bf16.mxu0 %v6181_v54  ;;  %4416 = vmatprep.subr.bf16.mxu1 %v5441_v47  ;;  %v5417_v16 = vcombine.high %v2314_v15, %v2318_v6  ;;  %v5416_v19 = vcombine.low %v2314_v15, %v2318_v6  ;;  %v1962_v47 = vmax.f32 %v1956_v38, 0.0  ;;  %v2067_v15 = vld [vmem:[#allocation10 + $0x308] sm:$0xff] }
 0x364   :  { %4441 = vmatprep.subr.bf16.mxu0 %v5123_v49  ;;  %v5259_v49 = vcombine.high %v2155_v41, %v2159_v31  ;;  %v2071_v6 = vld [vmem:[#allocation10 + $0x328] sm:$0xff] }
 0x365   :  { %v2059_v10 = vld [vmem:[#allocation10 + $0x2c8] sm:$0xff] }
 0x366   :  { %4417 = vmatpush2.bf16.msra.mxu1 %v5440_v59  ;;  %4442 = vmatpush1.bf16.msra.mxu0 %v5122_v60  ;;  %v5258_v59 = vcombine.low %v2155_v41, %v2159_v31  ;;  %v6211_v60 = vpack.c.bf16 %v1962_v47, %v1962_v47  ;;  %v2063_v13 = vld [vmem:[#allocation10 + $0x2e8] sm:$0xff] }
 0x367   :  { %4418 = vmatprep.subr.bf16.mxu1 %v5433_v61  ;;  %4443 = vmatprep.subr.bf16.mxu0 %v5115_v62  ;;  %v5187_v61 = vcombine.high %v2083_v50, %v2087_v51  ;;  %v2075_v62 = vld [vmem:[#allocation10 + $0x348] sm:$0xff] }
 0x368   :  { %v2123_v57 = vld [vmem:[#allocation10 + $0x4c8] sm:$0xff] }
 0x369   :  { %v2127_v17 = vld [vmem:[#allocation10 + $0x4e8] sm:$0xff] }
 0x36a   :  { %4419 = vmatpush2.bf16.msra.mxu1 %v5432_v3  ;;  %4444 = vmatpush1.bf16.msra.mxu0 %v5114_v5  ;;  %v5186_v3 = vcombine.low %v2083_v50, %v2087_v51  ;;  %v5250_v5 = vcombine.low %v2147_v39, %v2151_v22  ;;  %v2051_v26 = vld [vmem:[#allocation10 + $0x288] sm:$0xff] }
 0x36b   :  { %4420 = vmatprep.subr.bf16.mxu1 %v5425_v14  ;;  %4445 = vmatprep.subr.bf16.mxu0 %v5107_v52  ;;  %v5179_v14 = vcombine.high %v2075_v62, %v2079_v0  ;;  %v5243_v52 = vcombine.high %v2139_v1, %v2143_v2  ;;  %v2055_v27 = vld [vmem:[#allocation10 + $0x2a8] sm:$0xff] }
 0x36c   :  { %v2115_v28 = vld [vmem:[#allocation10 + $0x488] sm:$0xff] }
 0x36d   :  { %v2119_v12 = vld [vmem:[#allocation10 + $0x4a8] sm:$0xff] }
 0x36e   :  { %4421 = vmatpush2.bf16.msra.mxu1 %v5424_v9  ;;  %4446 = vmatpush1.bf16.msra.mxu0 %v5106_v11  ;;  %v5178_v9 = vcombine.low %v2075_v62, %v2079_v0  ;;  %v5242_v11 = vcombine.low %v2139_v1, %v2143_v2  ;;  %v2043_v34 = vld [vmem:[#allocation10 + $0x248] sm:$0xff] }
 0x36f   :  { %4422 = vmatprep.subr.bf16.mxu1 %v5417_v16  ;;  %4447 = vmatprep.subr.bf16.mxu0 %v5099_v18  ;;  %v5171_v16 = vcombine.high %v2067_v15, %v2071_v6  ;;  %v5235_v18 = vcombine.high %v2131_v7, %v2135_v8  ;;  %v2047_v35 = vld [vmem:[#allocation10 + $0x268] sm:$0xff] }
 0x370   :  { %v2107_v36 = vld [vmem:[#allocation10 + $0x448] sm:$0xff]  ;;  %v5147_v38 = vcombine.high %v2043_v34, %v2047_v35  ;;  %v5146_v31 = vcombine.low %v2043_v34, %v2047_v35 }
 0x371   :  { %v2111_v4 = vld [vmem:[#allocation10 + $0x468] sm:$0xff] }
 0x372   :  { %4423 = vmatpush2.bf16.msra.mxu1 %v5416_v19  ;;  %4448 = vmatpush1.bf16.msra.mxu0 %v5098_v20  ;;  %v5170_v19 = vcombine.low %v2067_v15, %v2071_v6  ;;  %v5234_v20 = vcombine.low %v2131_v7, %v2135_v8  ;;  %v2039_v33 = vld [vmem:[#allocation10 + $0x228] sm:$0xff] }
 0x373   :  { %4424 = vmatprep.subr.bf16.mxu1 %v5409_v21  ;;  %4449 = vmatprep.subr.bf16.mxu0 %v5091_v23  ;;  %v5163_v21 = vcombine.high %v2059_v10, %v2063_v13  ;;  %v5227_v23 = vcombine.high %v2123_v57, %v2127_v17  ;;  %v2099_v25 = vld [vmem:[#allocation10 + $0x408] sm:$0xff] }
 0x374   :  { %v2103_v41 = vld [vmem:[#allocation10 + $0x428] sm:$0xff] }
 0x375   :  { %v5203_v47 = vcombine.high %v2099_v25, %v2103_v41  ;;  %v2283_v50 = vld [vmem:[#allocation10 + $0x9c8] sm:$0xff]  ;;  %v5202_v22 = vcombine.low %v2099_v25, %v2103_v41 }
 0x376   :  { %4425 = vmatpush2.bf16.msra.mxu1 %v5408_v29  ;;  %4450 = vmatpush1.bf16.msra.mxu0 %v5090_v30  ;;  %v5162_v29 = vcombine.low %v2059_v10, %v2063_v13  ;;  %v5226_v30 = vcombine.low %v2123_v57, %v2127_v17  ;;  %v2287_v51 = vld [vmem:[#allocation10 + $0x9e8] sm:$0xff] }
 0x377   :  { %4426 = vmatprep.subr.bf16.mxu1 %v5401_v32  ;;  %4451 = vmatprep.subr.bf16.mxu0 %v5083_v53  ;;  %v5155_v32 = vcombine.high %v2051_v26, %v2055_v27  ;;  %v5219_v53 = vcombine.high %v2115_v28, %v2119_v12  ;;  %v2215_v62 = vld [vmem:[#allocation10 + $0x7a8] sm:$0xff]  ;;  %v5386_v2 = vcombine.low %v2283_v50, %v2287_v51 }
 0x378   :  { %v2279_v0 = vld [vmem:[#allocation10 + $0x9a8] sm:$0xff] }
 0x379   :  { %v2267_v15 = vld [vmem:[#allocation10 + $0x948] sm:$0xff] }
 0x37a   :  { %4427 = vmatpush2.bf16.msra.mxu1 %v5400_v58  ;;  %4452 = vmatpush1.bf16.msra.mxu0 %v5082_v37  ;;  %v5154_v58 = vcombine.low %v2051_v26, %v2055_v27  ;;  %v5218_v37 = vcombine.low %v2115_v28, %v2119_v12  ;;  %v2271_v6 = vld [vmem:[#allocation10 + $0x968] sm:$0xff] }
 0x37b   :  { %4428 = vmatprep.subr.bf16.mxu1 %v5393_v40  ;;  %4453 = vmatprep.subr.bf16.mxu0 %v5075_v24  ;;  %v5211_v40 = vcombine.high %v2107_v36, %v2111_v4  ;;  %v2035_v24 = vld [vmem:[#allocation10 + $0x208] sm:$0xff]  ;;  %v5370_v17 = vcombine.low %v2267_v15, %v2271_v6 }
 0x37c   :  { %v5138_v39 = vcombine.low %v2035_v24, %v2039_v33  ;;  %v2259_v10 = vld [vmem:[#allocation10 + $0x908] sm:$0xff] }
 0x37d   :  { %v2263_v13 = vld [vmem:[#allocation10 + $0x928] sm:$0xff] }
 0x37e   :  { %4429 = vmatpush2.bf16.msra.mxu1 %v5392_v42  ;;  %4454 = vmatpush1.bf16.msra.mxu0 %v5074_v45  ;;  %v5210_v42 = vcombine.low %v2107_v36, %v2111_v4  ;;  %v5139_v45 = vcombine.high %v2035_v24, %v2039_v33  ;;  %v2251_v26 = vld [vmem:[#allocation10 + $0x8c8] sm:$0xff]  ;;  %v5362_v12 = vcombine.low %v2259_v10, %v2263_v13 }
 0x37f   :  { %4455 = vmatprep.subr.bf16.mxu0 %v5195_v48  ;;  %4480 = vmatprep.subr.bf16.mxu1 %v5259_v49  ;;  %v2219_v48 = vld [vmem:[#allocation10 + $0x7c8] sm:$0xff] }
 0x380   :  { %v2223_v49 = vld [vmem:[#allocation10 + $0x7e8] sm:$0xff] }
 0x381   :  { %4431 = vmatmul.mubr.bf16.vlgmr.msra.gmra.mxu1 %v6211_v60  ;;  %v5322_v1 = vcombine.low %v2219_v48, %v2223_v49  ;;  %v2255_v27 = vld [vmem:[#allocation10 + $0x8e8] sm:$0xff] }
 0x382   :  { %4456 = vmatpush2.bf16.msra.mxu0 %v5194_v56  ;;  %4481 = vmatpush1.bf16.msra.mxu1 %v5258_v59  ;;  %v5323_v56 = vcombine.high %v2219_v48, %v2223_v49  ;;  %v5387_v59 = vcombine.high %v2283_v50, %v2287_v51  ;;  %v2243_v34 = vld [vmem:[#allocation10 + $0x888] sm:$0xff]  ;;  %v5354_v4 = vcombine.low %v2251_v26, %v2255_v27 }
 0x383   :  { %4512 = vmatprep.mubr.bf16.mxu1 %v6196_v43  ;;  %4457 = vmatprep.subr.bf16.mxu0 %v5187_v61  ;;  %v2211_v61 = vld [vmem:[#allocation10 + $0x788] sm:$0xff] }
 0x384   :  { %4482 = vmatprep.subr.bf16.mxu1 %v5251_v63  ;;  %v2275_v63 = vld [vmem:[#allocation10 + $0x988] sm:$0xff]  ;;  %v5314_v7 = vcombine.low %v2211_v61, %v2215_v62 }
 0x385   :  { %v5378_v8 = vcombine.low %v2275_v63, %v2279_v0  ;;  %v2247_v35 = vld [vmem:[#allocation10 + $0x8a8] sm:$0xff] }
 0x386   :  { %4458 = vmatpush2.bf16.msra.mxu0 %v5186_v3  ;;  %4483 = vmatpush1.bf16.msra.mxu1 %v5250_v5  ;;  %v5315_v3 = vcombine.high %v2211_v61, %v2215_v62  ;;  %v2203_v5 = vld [vmem:[#allocation10 + $0x748] sm:$0xff]  ;;  %v5346_v41 = vcombine.low %v2243_v34, %v2247_v35  ;;  %v2028_v61 = vld [vmem:[#allocation10 + $0x1d0] sm:$0xff] }
 0x387   :  { %4459 = vmatprep.subr.bf16.mxu0 %v5179_v14  ;;  %4484 = vmatprep.subr.bf16.mxu1 %v5243_v52  ;;  %v5379_v14 = vcombine.high %v2275_v63, %v2279_v0  ;;  %v2207_v52 = vld [vmem:[#allocation10 + $0x768] sm:$0xff]  ;;  %v2032_v62 = vld [vmem:[#allocation10 + $0x1f0] sm:$0xff] }
 0x388   :  { %v5306_v57 = vcombine.low %v2203_v5, %v2207_v52  ;;  %v2235_v24 = vld [vmem:[#allocation10 + $0x848] sm:$0xff] }
 0x389   :  { %v2239_v33 = vld [vmem:[#allocation10 + $0x868] sm:$0xff] }
 0x38a   :  { %4460 = vmatpush2.bf16.msra.mxu0 %v5178_v9  ;;  %4485 = vmatpush1.bf16.msra.mxu1 %v5242_v11  ;;  %v5307_v9 = vcombine.high %v2203_v5, %v2207_v52  ;;  %v5371_v11 = vcombine.high %v2267_v15, %v2271_v6  ;;  %v2227_v48 = vld [vmem:[#allocation10 + $0x808] sm:$0xff]  ;;  %v5338_v51 = vcombine.low %v2235_v24, %v2239_v33  ;;  %v2024_v52 = vld [vmem:[#allocation10 + $0x1b0] sm:$0xff] }
 0x38b   :  { %4461 = vmatprep.subr.bf16.mxu0 %v5171_v16  ;;  %4486 = vmatprep.subr.bf16.mxu1 %v5235_v18  ;;  %v2195_v16 = vld [vmem:[#allocation10 + $0x708] sm:$0xff]  ;;  %v5132_v6 = vcombine.low %v2028_v61, %v2032_v62 }
 0x38c   :  { %v2199_v18 = vld [vmem:[#allocation10 + $0x728] sm:$0xff] }
 0x38d   :  { %v5298_v28 = vcombine.low %v2195_v16, %v2199_v18  ;;  %v2231_v49 = vld [vmem:[#allocation10 + $0x828] sm:$0xff] }
 0x38e   :  { %4462 = vmatpush2.bf16.msra.mxu0 %v5170_v19  ;;  %4487 = vmatpush1.bf16.msra.mxu1 %v5234_v20  ;;  %v5299_v19 = vcombine.high %v2195_v16, %v2199_v18  ;;  %v5363_v20 = vcombine.high %v2259_v10, %v2263_v13  ;;  %v5330_v0 = vcombine.low %v2227_v48, %v2231_v49  ;;  %v2343_v5 = vld [vmem:[#allocation10 + $0xba8] sm:$0xff]  ;;  %v2012_v16 = vld [vmem:[#allocation10 + $0x150] sm:$0xff] }
 0x38f   :  { %4463 = vmatprep.subr.bf16.mxu0 %v5163_v21  ;;  %4488 = vmatprep.subr.bf16.mxu1 %v5227_v23  ;;  %v2187_v21 = vld [vmem:[#allocation10 + $0x6c8] sm:$0xff]  ;;  %v2016_v18 = vld [vmem:[#allocation10 + $0x170] sm:$0xff] }
 0x390   :  { %v2191_v23 = vld [vmem:[#allocation10 + $0x6e8] sm:$0xff] }
 0x391   :  { %v5290_v36 = vcombine.low %v2187_v21, %v2191_v23 }
 0x392   :  { %4464 = vmatpush2.bf16.msra.mxu0 %v5162_v29  ;;  %4489 = vmatpush1.bf16.msra.mxu1 %v5226_v30  ;;  %v5291_v29 = vcombine.high %v2187_v21, %v2191_v23  ;;  %v5355_v30 = vcombine.high %v2251_v26, %v2255_v27  ;;  %v2004_v21 = vld [vmem:[#allocation10 + $0x110] sm:$0xff]  ;;  %v5116_v27 = vcombine.low %v2012_v16, %v2016_v18 }
 0x393   :  { %4465 = vmatprep.subr.bf16.mxu0 %v5155_v32  ;;  %4490 = vmatprep.subr.bf16.mxu1 %v5219_v53  ;;  %v2179_v32 = vld [vmem:[#allocation10 + $0x688] sm:$0xff]  ;;  %v2008_v23 = vld [vmem:[#allocation10 + $0x130] sm:$0xff] }
 0x394   :  { %v2183_v53 = vld [vmem:[#allocation10 + $0x6a8] sm:$0xff] }
 0x395   :  { %v5282_v25 = vcombine.low %v2179_v32, %v2183_v53 }
 0x396   :  { %4466 = vmatpush2.bf16.msra.mxu0 %v5154_v58  ;;  %4491 = vmatpush1.bf16.msra.mxu1 %v5218_v37  ;;  %v5283_v58 = vcombine.high %v2179_v32, %v2183_v53  ;;  %v5347_v37 = vcombine.high %v2243_v34, %v2247_v35  ;;  %v1996_v32 = vld [vmem:[#allocation10 + $0xd0] sm:$0xff]  ;;  %v5108_v35 = vcombine.low %v2004_v21, %v2008_v23 }
 0x397   :  { %4467 = vmatprep.subr.bf16.mxu0 %v5147_v38  ;;  %4492 = vmatprep.subr.bf16.mxu1 %v5211_v40  ;;  %v2171_v38 = vld [vmem:[#allocation10 + $0x648] sm:$0xff]  ;;  %v2000_v53 = vld [vmem:[#allocation10 + $0xf0] sm:$0xff] }
 0x398   :  { %v2175_v40 = vld [vmem:[#allocation10 + $0x668] sm:$0xff] }
 0x399   :  { %v5274_v50 = vcombine.low %v2171_v38, %v2175_v40 }
 0x39a   :  { %4468 = vmatpush2.bf16.msra.mxu0 %v5146_v31  ;;  %4493 = vmatpush1.bf16.msra.mxu1 %v5210_v42  ;;  %v5275_v31 = vcombine.high %v2171_v38, %v2175_v40  ;;  %v5339_v42 = vcombine.high %v2235_v24, %v2239_v33  ;;  %v1988_v38 = vld [vmem:[#allocation10 + $0x90] sm:$0xff]  ;;  %v5100_v33 = vcombine.low %v1996_v32, %v2000_v53 }
 0x39b   :  { %4469 = vmatprep.subr.bf16.mxu0 %v5139_v45  ;;  %4494 = vmatprep.subr.bf16.mxu1 %v5203_v47  ;;  %v2163_v45 = vld [vmem:[#allocation10 + $0x608] sm:$0xff]  ;;  %v1992_v40 = vld [vmem:[#allocation10 + $0xb0] sm:$0xff] }
 0x39c   :  { %v2167_v47 = vld [vmem:[#allocation10 + $0x628] sm:$0xff] }
 0x39d   :  { %v5266_v63 = vcombine.low %v2163_v45, %v2167_v47 }
 0x39e   :  { %4470 = vmatpush2.bf16.msra.mxu0 %v5138_v39  ;;  %4495 = vmatpush1.bf16.msra.mxu1 %v5202_v22  ;;  %v5267_v39 = vcombine.high %v2163_v45, %v2167_v47  ;;  %v5331_v22 = vcombine.high %v2227_v48, %v2231_v49  ;;  %v1980_v45 = vld [vmem:[#allocation10 + $0x50] sm:$0xff]  ;;  %v5092_v49 = vcombine.low %v1988_v38, %v1992_v40 }
 0x39f   :  { %4496 = vmatprep.subr.bf16.mxu1 %v5323_v56  ;;  %4521 = vmatprep.subr.bf16.mxu0 %v5387_v59  ;;  %v2347_v56 = vld [vmem:[#allocation10 + $0xbc8] sm:$0xff]  ;;  %v1984_v47 = vld [vmem:[#allocation10 + $0x70] sm:$0xff] }
 0x3a0   :  { %v2351_v59 = vld [vmem:[#allocation10 + $0xbe8] sm:$0xff] }
 0x3a1   :  { %4472 = vmatmul.mubr.bf16.vlgmr.msra.gmra.mxu0 %v6183_v55  ;;  %v5450_v15 = vcombine.low %v2347_v56, %v2351_v59 }
 0x3a2   :  { %4497 = vmatpush2.bf16.msra.mxu1 %v5322_v1  ;;  %4522 = vmatpush1.bf16.msra.mxu0 %v5386_v2  ;;  %v5451_v1 = vcombine.high %v2347_v56, %v2351_v59  ;;  %v5133_v2 = vcombine.high %v2028_v61, %v2032_v62  ;;  %v1972_v56 = vld [vmem:[#allocation10 + $0x10] sm:$0xff]  ;;  %v5084_v62 = vcombine.low %v1980_v45, %v1984_v47 }
 0x3a3   :  { %4553 = vmatprep.mubr.bf16.mxu0 %v6198_v44  ;;  %4498 = vmatprep.subr.bf16.mxu1 %v5315_v3  ;;  %v2339_v3 = vld [vmem:[#allocation10 + $0xb88] sm:$0xff]  ;;  %v1976_v59 = vld [vmem:[#allocation10 + $0x30] sm:$0xff] }
 0x3a4   :  { %4523 = vmatprep.subr.bf16.mxu0 %v5379_v14  ;;  %v2020_v14 = vld [vmem:[#allocation10 + $0x190] sm:$0xff]  ;;  %v5442_v10 = vcombine.low %v2339_v3, %v2343_v5 }
 0x3a5   :  { %v5124_v13 = vcombine.low %v2020_v14, %v2024_v52 }
 0x3a6   :  { %4499 = vmatpush2.bf16.msra.mxu1 %v5314_v7  ;;  %4524 = vmatpush1.bf16.msra.mxu0 %v5378_v8  ;;  %v5443_v7 = vcombine.high %v2339_v3, %v2343_v5  ;;  %v2331_v8 = vld [vmem:[#allocation10 + $0xb48] sm:$0xff]  ;;  %v2156_v3 = vld [vmem:[#allocation10 + $0x5d0] sm:$0xff] }
 0x3a7   :  { %4500 = vmatprep.subr.bf16.mxu1 %v5307_v9  ;;  %4525 = vmatprep.subr.bf16.mxu0 %v5371_v11  ;;  %v5125_v9 = vcombine.high %v2020_v14, %v2024_v52  ;;  %v2335_v11 = vld [vmem:[#allocation10 + $0xb68] sm:$0xff]  ;;  %v2160_v5 = vld [vmem:[#allocation10 + $0x5f0] sm:$0xff]  ;;  %v5076_v52 = vcombine.low %v1972_v56, %v1976_v59 }
 0x3a8   :  { %v5434_v26 = vcombine.low %v2331_v8, %v2335_v11 }
 0x3aa   :  { %4501 = vmatpush2.bf16.msra.mxu1 %v5306_v57  ;;  %4526 = vmatpush1.bf16.msra.mxu0 %v5370_v17  ;;  %v5435_v57 = vcombine.high %v2331_v8, %v2335_v11  ;;  %v5117_v17 = vcombine.high %v2012_v16, %v2016_v18  ;;  %v2088_v8 = vld [vmem:[#allocation10 + $0x3b0] sm:$0xff]  ;;  %v5260_v18 = vcombine.low %v2156_v3, %v2160_v5 }
 0x3ab   :  { %4502 = vmatprep.subr.bf16.mxu1 %v5299_v19  ;;  %4527 = vmatprep.subr.bf16.mxu0 %v5363_v20  ;;  %v2323_v19 = vld [vmem:[#allocation10 + $0xb08] sm:$0xff]  ;;  %v2152_v11 = vld [vmem:[#allocation10 + $0x5b0] sm:$0xff] }
 0x3ac   :  { %v2327_v20 = vld [vmem:[#allocation10 + $0xb28] sm:$0xff] }
 0x3ad   :  { %v5426_v34 = vcombine.low %v2323_v19, %v2327_v20 }
 0x3ae   :  { %4503 = vmatpush2.bf16.msra.mxu1 %v5298_v28  ;;  %4528 = vmatpush1.bf16.msra.mxu0 %v5362_v12  ;;  %v5427_v28 = vcombine.high %v2323_v19, %v2327_v20  ;;  %v5109_v12 = vcombine.high %v2004_v21, %v2008_v23  ;;  %v2140_v19 = vld [vmem:[#allocation10 + $0x550] sm:$0xff] }
 0x3af   :  { %4504 = vmatprep.subr.bf16.mxu1 %v5291_v29  ;;  %4529 = vmatprep.subr.bf16.mxu0 %v5355_v30  ;;  %v2315_v29 = vld [vmem:[#allocation10 + $0xac8] sm:$0xff]  ;;  %v2144_v20 = vld [vmem:[#allocation10 + $0x570] sm:$0xff] }
 0x3b0   :  { %v2319_v30 = vld [vmem:[#allocation10 + $0xae8] sm:$0xff] }
 0x3b1   :  { %v5418_v24 = vcombine.low %v2315_v29, %v2319_v30 }
 0x3b2   :  { %4505 = vmatpush2.bf16.msra.mxu1 %v5290_v36  ;;  %4530 = vmatpush1.bf16.msra.mxu0 %v5354_v4  ;;  %v5419_v36 = vcombine.high %v2315_v29, %v2319_v30  ;;  %v5101_v4 = vcombine.high %v1996_v32, %v2000_v53  ;;  %v2132_v29 = vld [vmem:[#allocation10 + $0x510] sm:$0xff]  ;;  %v5244_v53 = vcombine.low %v2140_v19, %v2144_v20 }
 0x3b3   :  { %4506 = vmatprep.subr.bf16.mxu1 %v5283_v58  ;;  %4531 = vmatprep.subr.bf16.mxu0 %v5347_v37  ;;  %v2307_v58 = vld [vmem:[#allocation10 + $0xa88] sm:$0xff]  ;;  %v2136_v30 = vld [vmem:[#allocation10 + $0x530] sm:$0xff] }
 0x3b4   :  { %v2311_v37 = vld [vmem:[#allocation10 + $0xaa8] sm:$0xff] }
 0x3b5   :  { %v5410_v48 = vcombine.low %v2307_v58, %v2311_v37 }
 0x3b6   :  { %4507 = vmatpush2.bf16.msra.mxu1 %v5282_v25  ;;  %4532 = vmatpush1.bf16.msra.mxu0 %v5346_v41  ;;  %v5411_v25 = vcombine.high %v2307_v58, %v2311_v37  ;;  %v5093_v41 = vcombine.high %v1988_v38, %v1992_v40  ;;  %v2124_v58 = vld [vmem:[#allocation10 + $0x4d0] sm:$0xff]  ;;  %v5236_v40 = vcombine.low %v2132_v29, %v2136_v30 }
 0x3b7   :  { %4508 = vmatprep.subr.bf16.mxu1 %v5275_v31  ;;  %4533 = vmatprep.subr.bf16.mxu0 %v5339_v42  ;;  %v2299_v31 = vld [vmem:[#allocation10 + $0xa48] sm:$0xff]  ;;  %v2128_v37 = vld [vmem:[#allocation10 + $0x4f0] sm:$0xff] }
 0x3b8   :  { %v2303_v42 = vld [vmem:[#allocation10 + $0xa68] sm:$0xff] }
 0x3b9   :  { %v5402_v61 = vcombine.low %v2299_v31, %v2303_v42 }
 0x3ba   :  { %4509 = vmatpush2.bf16.msra.mxu1 %v5274_v50  ;;  %4534 = vmatpush1.bf16.msra.mxu0 %v5338_v51  ;;  %v5403_v50 = vcombine.high %v2299_v31, %v2303_v42  ;;  %v5085_v51 = vcombine.high %v1980_v45, %v1984_v47  ;;  %v2116_v31 = vld [vmem:[#allocation10 + $0x490] sm:$0xff]  ;;  %v5228_v47 = vcombine.low %v2124_v58, %v2128_v37 }
 0x3bb   :  { %4510 = vmatprep.subr.bf16.mxu1 %v5267_v39  ;;  %4535 = vmatprep.subr.bf16.mxu0 %v5331_v22  ;;  %v2291_v39 = vld [vmem:[#allocation10 + $0xa08] sm:$0xff]  ;;  %v2120_v42 = vld [vmem:[#allocation10 + $0x4b0] sm:$0xff] }
 0x3bc   :  { %v2295_v22 = vld [vmem:[#allocation10 + $0xa28] sm:$0xff] }
 0x3bd   :  { %v5394_v14 = vcombine.low %v2291_v39, %v2295_v22 }
 0x3be   :  { %4511 = vmatpush2.bf16.msra.mxu1 %v5266_v63  ;;  %4536 = vmatpush1.bf16.msra.mxu0 %v5330_v0  ;;  %v5395_v63 = vcombine.high %v2291_v39, %v2295_v22  ;;  %v5077_v0 = vcombine.high %v1972_v56, %v1976_v59  ;;  %v2108_v39 = vld [vmem:[#allocation10 + $0x450] sm:$0xff]  ;;  %v5220_v59 = vcombine.low %v2116_v31, %v2120_v42 }
 0x3bf   :  { %4537 = vmatprep.subr.bf16.mxu0 %v5451_v1  ;;  %4562 = vmatprep.subr.bf16.mxu1 %v5133_v2  ;;  %v2092_v1 = vld [vmem:[#allocation10 + $0x3d0] sm:$0xff] }
 0x3c0   :  { %v2096_v2 = vld [vmem:[#allocation10 + $0x3f0] sm:$0xff] }
 0x3c1   :  { %4513 = vmatmul.mubr.bf16.vlgmr.msra.gmra.mxu1 %v6200_v46  ;;  %v5196_v16 = vcombine.low %v2092_v1, %v2096_v2  ;;  %v2112_v22 = vld [vmem:[#allocation10 + $0x470] sm:$0xff] }
 0x3c2   :  { %4538 = vmatpush2.bf16.msra.mxu0 %v5450_v15  ;;  %4563 = vmatpush1.bf16.msra.mxu1 %v5132_v6  ;;  %v5197_v15 = vcombine.high %v2092_v1, %v2096_v2  ;;  %v5261_v6 = vcombine.high %v2156_v3, %v2160_v5  ;;  %v2100_v1 = vld [vmem:[#allocation10 + $0x410] sm:$0xff]  ;;  %v5212_v5 = vcombine.low %v2108_v39, %v2112_v22 }
 0x3c3   :  { %4594 = vmatprep.mubr.bf16.mxu1 %v6181_v54  ;;  %4539 = vmatprep.subr.bf16.mxu0 %v5443_v7  ;;  %v2084_v7 = vld [vmem:[#allocation10 + $0x390] sm:$0xff] }
 0x3c4   :  { %4564 = vmatprep.subr.bf16.mxu1 %v5125_v9  ;;  %v2148_v9 = vld [vmem:[#allocation10 + $0x590] sm:$0xff]  ;;  %v5188_v21 = vcombine.low %v2084_v7, %v2088_v8 }
 0x3c5   :  { %v5252_v23 = vcombine.low %v2148_v9, %v2152_v11  ;;  %v2104_v2 = vld [vmem:[#allocation10 + $0x430] sm:$0xff] }
 0x3c6   :  { %4540 = vmatpush2.bf16.msra.mxu0 %v5442_v10  ;;  %4565 = vmatpush1.bf16.msra.mxu1 %v5124_v13  ;;  %v5189_v10 = vcombine.high %v2084_v7, %v2088_v8  ;;  %v2076_v13 = vld [vmem:[#allocation10 + $0x350] sm:$0xff] }
 0x3c7   :  { %4541 = vmatprep.subr.bf16.mxu0 %v5435_v57  ;;  %4566 = vmatprep.subr.bf16.mxu1 %v5117_v17  ;;  %v5253_v57 = vcombine.high %v2148_v9, %v2152_v11  ;;  %v2080_v17 = vld [vmem:[#allocation10 + $0x370] sm:$0xff]  ;;  %v5204_v11 = vcombine.low %v2100_v1, %v2104_v2 }
 0x3c8   :  { %v5180_v32 = vcombine.low %v2076_v13, %v2080_v17  ;;  %v2284_v7 = vld [vmem:[#allocation10 + $0x9d0] sm:$0xff] }
 0x3c9   :  { %v2288_v8 = vld [vmem:[#allocation10 + $0x9f0] sm:$0xff] }
 0x3ca   :  { %4542 = vmatpush2.bf16.msra.mxu0 %v5434_v26  ;;  %4567 = vmatpush1.bf16.msra.mxu1 %v5116_v27  ;;  %v5181_v26 = vcombine.high %v2076_v13, %v2080_v17  ;;  %v5245_v27 = vcombine.high %v2140_v19, %v2144_v20  ;;  %v2216_v13 = vld [vmem:[#allocation10 + $0x7b0] sm:$0xff]  ;;  %v5388_v20 = vcombine.low %v2284_v7, %v2288_v8 }
 0x3cb   :  { %4543 = vmatprep.subr.bf16.mxu0 %v5427_v28  ;;  %4568 = vmatprep.subr.bf16.mxu1 %v5109_v12  ;;  %v2068_v28 = vld [vmem:[#allocation10 + $0x310] sm:$0xff] }
 0x3cc   :  { %v2072_v12 = vld [vmem:[#allocation10 + $0x330] sm:$0xff] }
 0x3cd   :  { %v5172_v38 = vcombine.low %v2068_v28, %v2072_v12  ;;  %v2280_v17 = vld [vmem:[#allocation10 + $0x9b0] sm:$0xff] }
 0x3ce   :  { %4544 = vmatpush2.bf16.msra.mxu0 %v5426_v34  ;;  %4569 = vmatpush1.bf16.msra.mxu1 %v5108_v35  ;;  %v5173_v34 = vcombine.high %v2068_v28, %v2072_v12  ;;  %v5237_v35 = vcombine.high %v2132_v29, %v2136_v30  ;;  %v2268_v28 = vld [vmem:[#allocation10 + $0x950] sm:$0xff] }
 0x3cf   :  { %4545 = vmatprep.subr.bf16.mxu0 %v5419_v36  ;;  %4570 = vmatprep.subr.bf16.mxu1 %v5101_v4  ;;  %v2060_v36 = vld [vmem:[#allocation10 + $0x2d0] sm:$0xff] }
 0x3d0   :  { %v2064_v4 = vld [vmem:[#allocation10 + $0x2f0] sm:$0xff] }
 0x3d1   :  { %v5164_v45 = vcombine.low %v2060_v36, %v2064_v4  ;;  %v2272_v12 = vld [vmem:[#allocation10 + $0x970] sm:$0xff] }
 0x3d2   :  { %4546 = vmatpush2.bf16.msra.mxu0 %v5418_v24  ;;  %4571 = vmatpush1.bf16.msra.mxu1 %v5100_v33  ;;  %v5165_v24 = vcombine.high %v2060_v36, %v2064_v4  ;;  %v5229_v33 = vcombine.high %v2124_v58, %v2128_v37  ;;  %v2196_v36 = vld [vmem:[#allocation10 + $0x710] sm:$0xff] }
 0x3d3   :  { %4547 = vmatprep.subr.bf16.mxu0 %v5411_v25  ;;  %4572 = vmatprep.subr.bf16.mxu1 %v5093_v41  ;;  %v2052_v25 = vld [vmem:[#allocation10 + $0x290] sm:$0xff] }
 0x3d4   :  { %v2056_v41 = vld [vmem:[#allocation10 + $0x2b0] sm:$0xff] }
 0x3d5   :  { %v5156_v56 = vcombine.low %v2052_v25, %v2056_v41  ;;  %v2200_v4 = vld [vmem:[#allocation10 + $0x730] sm:$0xff] }
 0x3d6   :  { %4548 = vmatpush2.bf16.msra.mxu0 %v5410_v48  ;;  %4573 = vmatpush1.bf16.msra.mxu1 %v5092_v49  ;;  %v5157_v48 = vcombine.high %v2052_v25, %v2056_v41  ;;  %v5221_v49 = vcombine.high %v2116_v31, %v2120_v42  ;;  %v2260_v58 = vld [vmem:[#allocation10 + $0x910] sm:$0xff]  ;;  %v5301_v25 = vcombine.high %v2196_v36, %v2200_v4 }
 0x3d7   :  { %4549 = vmatprep.subr.bf16.mxu0 %v5403_v50  ;;  %4574 = vmatprep.subr.bf16.mxu1 %v5085_v51  ;;  %v2044_v50 = vld [vmem:[#allocation10 + $0x250] sm:$0xff] }
 0x3d8   :  { %v2048_v51 = vld [vmem:[#allocation10 + $0x270] sm:$0xff] }
 0x3d9   :  { %v5148_v3 = vcombine.low %v2044_v50, %v2048_v51  ;;  %v2264_v37 = vld [vmem:[#allocation10 + $0x930] sm:$0xff] }
 0x3da   :  { %4550 = vmatpush2.bf16.msra.mxu0 %v5402_v61  ;;  %4575 = vmatpush1.bf16.msra.mxu1 %v5084_v62  ;;  %v5149_v61 = vcombine.high %v2044_v50, %v2048_v51  ;;  %v5213_v62 = vcombine.high %v2108_v39, %v2112_v22  ;;  %v5365_v41 = vcombine.high %v2260_v58, %v2264_v37  ;;  %v2188_v31 = vld [vmem:[#allocation10 + $0x6d0] sm:$0xff] }
 0x3db   :  { %4551 = vmatprep.subr.bf16.mxu0 %v5395_v63  ;;  %4576 = vmatprep.subr.bf16.mxu1 %v5077_v0  ;;  %v2036_v63 = vld [vmem:[#allocation10 + $0x210] sm:$0xff] }
 0x3dc   :  { %v2040_v0 = vld [vmem:[#allocation10 + $0x230] sm:$0xff] }
 0x3dd   :  { %v5140_v9 = vcombine.low %v2036_v63, %v2040_v0  ;;  %v2192_v42 = vld [vmem:[#allocation10 + $0x6f0] sm:$0xff] }
 0x3de   :  { %4552 = vmatpush2.bf16.msra.mxu0 %v5394_v14  ;;  %4577 = vmatpush1.bf16.msra.mxu1 %v5076_v52  ;;  %v5141_v14 = vcombine.high %v2036_v63, %v2040_v0  ;;  %v5205_v52 = vcombine.high %v2100_v1, %v2104_v2  ;;  %v5293_v50 = vcombine.high %v2188_v31, %v2192_v42  ;;  %v2180_v39 = vld [vmem:[#allocation10 + $0x690] sm:$0xff]  ;;  %v2356_v2 = vlaneseq }
 0x3df   :  { %4578 = vmatprep.subr.bf16.mxu1 %v5197_v15  ;;  %4603 = vmatprep.subr.bf16.mxu0 %v5261_v6  ;;  %v2220_v15 = vld [vmem:[#allocation10 + $0x7d0] sm:$0xff] }
 0x3e0   :  { %v2224_v6 = vld [vmem:[#allocation10 + $0x7f0] sm:$0xff] }
 0x3e1   :  { %4554 = vmatmul.mubr.bf16.vlgmr.msra.gmra.mxu0 %v6211_v60  ;;  %v5324_v19 = vcombine.low %v2220_v15, %v2224_v6  ;;  %v2184_v22 = vld [vmem:[#allocation10 + $0x6b0] sm:$0xff] }
 0x3e2   :  { %4579 = vmatpush2.bf16.msra.mxu1 %v5196_v16  ;;  %4604 = vmatpush1.bf16.msra.mxu0 %v5260_v18  ;;  %v5325_v16 = vcombine.high %v2220_v15, %v2224_v6  ;;  %v5389_v18 = vcombine.high %v2284_v7, %v2288_v8  ;;  %v5285_v63 = vcombine.high %v2180_v39, %v2184_v22  ;;  %v2172_v1 = vld [vmem:[#allocation10 + $0x650] sm:$0xff] }
 0x3e3   :  { %4635 = vmatprep.mubr.bf16.mxu0 %v6196_v43  ;;  %4580 = vmatprep.subr.bf16.mxu1 %v5189_v10  ;;  %v2212_v10 = vld [vmem:[#allocation10 + $0x790] sm:$0xff] }
 0x3e4   :  { %4605 = vmatprep.subr.bf16.mxu0 %v5253_v57  ;;  %v2276_v57 = vld [vmem:[#allocation10 + $0x990] sm:$0xff]  ;;  %v5316_v30 = vcombine.low %v2212_v10, %v2216_v13 }
 0x3e5   :  { %v2164_v8 = vld [vmem:[#allocation10 + $0x610] sm:$0xff] }
 0x3e6   :  { %4581 = vmatpush2.bf16.msra.mxu1 %v5188_v21  ;;  %4606 = vmatpush1.bf16.msra.mxu0 %v5252_v23  ;;  %v5317_v21 = vcombine.high %v2212_v10, %v2216_v13  ;;  %v2204_v23 = vld [vmem:[#allocation10 + $0x750] sm:$0xff] }
 0x3e7   :  { %4582 = vmatprep.subr.bf16.mxu1 %v5181_v26  ;;  %4607 = vmatprep.subr.bf16.mxu0 %v5245_v27  ;;  %v5381_v26 = vcombine.high %v2276_v57, %v2280_v17  ;;  %v2208_v27 = vld [vmem:[#allocation10 + $0x770] sm:$0xff] }
 0x3ea   :  { %4583 = vmatpush2.bf16.msra.mxu1 %v5180_v32  ;;  %4608 = vmatpush1.bf16.msra.mxu0 %v5244_v53  ;;  %v5380_v32 = vcombine.low %v2276_v57, %v2280_v17 }
 0x3eb   :  { %4584 = vmatprep.subr.bf16.mxu1 %v5173_v34  ;;  %4609 = vmatprep.subr.bf16.mxu0 %v5237_v35  ;;  %v5309_v34 = vcombine.high %v2204_v23, %v2208_v27  ;;  %v5373_v35 = vcombine.high %v2268_v28, %v2272_v12 }
 0x3ee   :  { %4585 = vmatpush2.bf16.msra.mxu1 %v5172_v38  ;;  %4610 = vmatpush1.bf16.msra.mxu0 %v5236_v40  ;;  %v5308_v40 = vcombine.low %v2204_v23, %v2208_v27  ;;  %v2029_v23 = vld [vmem:[#allocation10 + $0x1d8] sm:$0xff]  ;;  %v6230_v27 = vld [vmem:[#allocation11] sm:$0xff] }
 0x3ef   :  { %4586 = vmatprep.subr.bf16.mxu1 %v5165_v24  ;;  %4611 = vmatprep.subr.bf16.mxu0 %v5229_v33  ;;  %v5372_v24 = vcombine.low %v2268_v28, %v2272_v12 }
 0x3f2   :  { %4587 = vmatpush2.bf16.msra.mxu1 %v5164_v45  ;;  %4612 = vmatpush1.bf16.msra.mxu0 %v5228_v47  ;;  %v2252_v45 = vld [vmem:[#allocation10 + $0x8d0] sm:$0xff] }
 0x3f3   :  { %4588 = vmatprep.subr.bf16.mxu1 %v5157_v48  ;;  %4613 = vmatprep.subr.bf16.mxu0 %v5221_v49  ;;  %v2256_v47 = vld [vmem:[#allocation10 + $0x8f0] sm:$0xff]  ;;  %v5300_v48 = vcombine.low %v2196_v36, %v2200_v4  ;;  %v5364_v49 = vcombine.low %v2260_v58, %v2264_v37  ;;  %v2021_v58 = vld [vmem:[#allocation10 + $0x198] sm:$0xff] }
 0x3f4   :  { %v5357_v51 = vcombine.high %v2252_v45, %v2256_v47  ;;  %v2340_v36 = vld [vmem:[#allocation10 + $0xb90] sm:$0xff]  ;;  %v2025_v37 = vld [vmem:[#allocation10 + $0x1b8] sm:$0xff] }
 0x3f5   :  { %v2344_v4 = vld [vmem:[#allocation10 + $0xbb0] sm:$0xff] }
 0x3f6   :  { %4589 = vmatpush2.bf16.msra.mxu1 %v5156_v56  ;;  %4614 = vmatpush1.bf16.msra.mxu0 %v5220_v59  ;;  %v2244_v56 = vld [vmem:[#allocation10 + $0x890] sm:$0xff] }
 0x3f7   :  { %4590 = vmatprep.subr.bf16.mxu1 %v5149_v61  ;;  %4615 = vmatprep.subr.bf16.mxu0 %v5213_v62  ;;  %v2248_v59 = vld [vmem:[#allocation10 + $0x8b0] sm:$0xff]  ;;  %v5292_v61 = vcombine.low %v2188_v31, %v2192_v42  ;;  %v5356_v62 = vcombine.low %v2252_v45, %v2256_v47  ;;  %v5127_v31 = vcombine.high %v2021_v58, %v2025_v37  ;;  %v2013_v45 = vld [vmem:[#allocation10 + $0x158] sm:$0xff] }
 0x3f8   :  { %v5349_v0 = vcombine.high %v2244_v56, %v2248_v59  ;;  %v5348_v15 = vcombine.low %v2244_v56, %v2248_v59  ;;  %v2336_v42 = vld [vmem:[#allocation10 + $0xb70] sm:$0xff]  ;;  %v2017_v47 = vld [vmem:[#allocation10 + $0x178] sm:$0xff] }
 0x3f9   :  { %v5119_v56 = vcombine.high %v2013_v45, %v2017_v47  ;;  %v2324_v59 = vld [vmem:[#allocation10 + $0xb10] sm:$0xff] }
 0x3fa   :  { %4591 = vmatpush2.bf16.msra.mxu1 %v5148_v3  ;;  %4616 = vmatpush1.bf16.msra.mxu0 %v5212_v5  ;;  %v2176_v3 = vld [vmem:[#allocation10 + $0x670] sm:$0xff] }
 0x3fb   :  { %4592 = vmatprep.subr.bf16.mxu1 %v5141_v14  ;;  %4617 = vmatprep.subr.bf16.mxu0 %v5205_v52  ;;  %v2236_v5 = vld [vmem:[#allocation10 + $0x850] sm:$0xff]  ;;  %v5284_v52 = vcombine.low %v2180_v39, %v2184_v22  ;;  %v5277_v6 = vcombine.high %v2172_v1, %v2176_v3  ;;  %v5276_v10 = vcombine.low %v2172_v1, %v2176_v3 }
 0x3fc   :  { %v2240_v14 = vld [vmem:[#allocation10 + $0x870] sm:$0xff]  ;;  %v5126_v39 = vcombine.low %v2021_v58, %v2025_v37  ;;  %v1973_v58 = vld [vmem:[#allocation10 + $0x18] sm:$0xff] }
 0x3fd   :  { %v5341_v7 = vcombine.high %v2236_v5, %v2240_v14  ;;  %v5340_v13 = vcombine.low %v2236_v5, %v2240_v14  ;;  %v2316_v14 = vld [vmem:[#allocation10 + $0xad0] sm:$0xff]  ;;  %v1977_v37 = vld [vmem:[#allocation10 + $0x38] sm:$0xff] }
 0x3fe   :  { %4593 = vmatpush2.bf16.msra.mxu1 %v5140_v9  ;;  %4618 = vmatpush1.bf16.msra.mxu0 %v5204_v11  ;;  %v6227_v9 = vshrl.u32 %v2356_v2, 7  ;;  %v2168_v11 = vld [vmem:[#allocation10 + $0x630] sm:$0xff]  ;;  %v5118_v2 = vcombine.low %v2013_v45, %v2017_v47  ;;  %v5078_v47 = vcombine.low %v1973_v58, %v1977_v37 }
 0x3ff   :  { %4619 = vmatprep.subr.bf16.mxu0 %v5325_v16  ;;  %4644 = vmatprep.subr.bf16.mxu1 %v5389_v18  ;;  %v2228_v16 = vld [vmem:[#allocation10 + $0x810] sm:$0xff]  ;;  %v5269_v57 = vcombine.high %v2164_v8, %v2168_v11  ;;  %v5268_v12 = vcombine.low %v2164_v8, %v2168_v11 }
 0x400   :  { %v2232_v18 = vld [vmem:[#allocation10 + $0x830] sm:$0xff]  ;;  %v2362_v28 = vsub.s32 1, %v6227_v9 }
 0x401   :  { %4595 = vmatmul.mubr.bf16.vlgmr.msra.gmra.mxu1 %v6183_v55  ;;  %v6222_v29 = vpop.f32.mrf.mxu1  ;;  %v5333_v17 = vcombine.high %v2228_v16, %v2232_v18 }
 0x402   :  { %4620 = vmatpush2.bf16.msra.mxu0 %v5324_v19  ;;  %4645 = vmatpush1.bf16.msra.mxu1 %v5388_v20  ;;  %v2348_v19 = vld [vmem:[#allocation10 + $0xbd0] sm:$0xff]  ;;  %v2358_v20 = vsub.s32 0, %v6227_v9 }
 0x403   :  { %4676 = vmatprep.mubr.bf16.mxu1 %v6198_v44  ;;  %v6225_v53 = vpop.f32.mrf.mxu1  ;;  %4621 = vmatprep.subr.bf16.mxu0 %v5317_v21  ;;  %v2352_v21 = vld [vmem:[#allocation10 + $0xbf0] sm:$0xff] }
 0x404   :  { %4646 = vmatprep.subr.bf16.mxu1 %v5381_v26  ;;  %v2033_v26 = vld [vmem:[#allocation10 + $0x1f8] sm:$0xff] }
 0x405   :  { %v4354_v38 = vpop.f32.mrf.mxu1 }
 0x406   :  { %4622 = vmatpush2.bf16.msra.mxu0 %v5316_v30  ;;  %4647 = vmatpush1.bf16.msra.mxu1 %v5380_v32  ;;  %v5332_v30 = vcombine.low %v2228_v16, %v2232_v18  ;;  %v5453_v32 = vcombine.high %v2348_v19, %v2352_v21  ;;  %v2363_v38 = vrot.slane %v6230_v27, %v2362_v28  ;;  %v2308_v18 = vld [vmem:[#allocation10 + $0xa90] sm:$0xff]  ;;  %v1981_v28 = vld [vmem:[#allocation10 + $0x58] sm:$0xff] }
 0x407   :  { %v4355_v33 = vpop.f32.mrf.mxu1  ;;  %4623 = vmatprep.subr.bf16.mxu0 %v5309_v34  ;;  %4648 = vmatprep.subr.bf16.mxu1 %v5373_v35  ;;  %v5135_v34 = vcombine.high %v2029_v23, %v2033_v26  ;;  %v2359_v35 = vrot.slane %v6230_v27, %v2358_v20 }
 0x408   :  { %v5445_v33 = vcombine.high %v2340_v36, %v2344_v4 }
 0x40a   :  { %4624 = vmatpush2.bf16.msra.mxu0 %v5308_v40  ;;  %4649 = vmatpush1.bf16.msra.mxu1 %v5372_v24  ;;  %v5452_v40 = vcombine.low %v2348_v19, %v2352_v21  ;;  %v5134_v24 = vcombine.low %v2029_v23, %v2033_v26  ;;  %v2300_v23 = vld [vmem:[#allocation10 + $0xa50] sm:$0xff] }
 0x40b   :  { %4625 = vmatprep.subr.bf16.mxu0 %v5301_v25  ;;  %4650 = vmatprep.subr.bf16.mxu1 %v5365_v41  ;;  %v2332_v25 = vld [vmem:[#allocation10 + $0xb50] sm:$0xff]  ;;  %v4351_v41 = vadd.f32 %v6222_v29, %v2359_v35 }
 0x40c   :  { %v5437_v29 = vcombine.high %v2332_v25, %v2336_v42  ;;  %v2304_v26 = vld [vmem:[#allocation10 + $0xa70] sm:$0xff] }
 0x40e   :  { %4626 = vmatpush2.bf16.msra.mxu0 %v5300_v48  ;;  %4651 = vmatpush1.bf16.msra.mxu1 %v5364_v49  ;;  %v5444_v49 = vcombine.low %v2340_v36, %v2344_v4  ;;  %v2292_v36 = vld [vmem:[#allocation10 + $0xa10] sm:$0xff] }
 0x40f   :  { %4627 = vmatprep.subr.bf16.mxu0 %v5293_v50  ;;  %4652 = vmatprep.subr.bf16.mxu1 %v5357_v51  ;;  %v4353_v50 = vadd.f32 %v6225_v53, %v2363_v38  ;;  %v5436_v53 = vcombine.low %v2332_v25, %v2336_v42  ;;  %v2296_v4 = vld [vmem:[#allocation10 + $0xa30] sm:$0xff]  ;;  %v5404_v38 = vcombine.low %v2300_v23, %v2304_v26  ;;  %v2093_v25 = vld [vmem:[#allocation10 + $0x3d8] sm:$0xff] }
 0x410   :  { %v2161_v42 = vld [vmem:[#allocation10 + $0x5f8] sm:$0xff]  ;;  %v5396_v45 = vcombine.low %v2292_v36, %v2296_v4 }
 0x412   :  { %4628 = vmatpush2.bf16.msra.mxu0 %v5292_v61  ;;  %4653 = vmatpush1.bf16.msra.mxu1 %v5356_v62  ;;  %v2328_v62 = vld [vmem:[#allocation10 + $0xb30] sm:$0xff] }
 0x413   :  { %4629 = vmatprep.subr.bf16.mxu0 %v5285_v63  ;;  %4654 = vmatprep.subr.bf16.mxu1 %v5349_v0  ;;  %v2005_v63 = vld [vmem:[#allocation10 + $0x118] sm:$0xff] }
 0x414   :  { %v2009_v0 = vld [vmem:[#allocation10 + $0x138] sm:$0xff] }
 0x415   :  { %v5111_v5 = vcombine.high %v2005_v63, %v2009_v0  ;;  %v5110_v8 = vcombine.low %v2005_v63, %v2009_v0  ;;  %v2077_v63 = vld [vmem:[#allocation10 + $0x358] sm:$0xff] }
 0x416   :  { %4630 = vmatpush2.bf16.msra.mxu0 %v5284_v52  ;;  %4655 = vmatpush1.bf16.msra.mxu1 %v5348_v15  ;;  %v2320_v52 = vld [vmem:[#allocation10 + $0xaf0] sm:$0xff]  ;;  %v1997_v15 = vld [vmem:[#allocation10 + $0xd8] sm:$0xff] }
 0x417   :  { %4631 = vmatprep.subr.bf16.mxu0 %v5277_v6  ;;  %4656 = vmatprep.subr.bf16.mxu1 %v5341_v7  ;;  %v2001_v6 = vld [vmem:[#allocation10 + $0xf8] sm:$0xff]  ;;  %v5428_v7 = vcombine.low %v2324_v59, %v2328_v62  ;;  %v5421_v11 = vcombine.high %v2316_v14, %v2320_v52 }
 0x418   :  { %v5103_v16 = vcombine.high %v1997_v15, %v2001_v6  ;;  %v5102_v19 = vcombine.low %v1997_v15, %v2001_v6 }
 0x41a   :  { %4632 = vmatpush2.bf16.msra.mxu0 %v5276_v10  ;;  %4657 = vmatpush1.bf16.msra.mxu1 %v5340_v13  ;;  %v2312_v10 = vld [vmem:[#allocation10 + $0xab0] sm:$0xff]  ;;  %v1989_v13 = vld [vmem:[#allocation10 + $0x98] sm:$0xff] }
 0x41b   :  { %4633 = vmatprep.subr.bf16.mxu0 %v5269_v57  ;;  %4658 = vmatprep.subr.bf16.mxu1 %v5333_v17  ;;  %v1993_v57 = vld [vmem:[#allocation10 + $0xb8] sm:$0xff]  ;;  %v5420_v17 = vcombine.low %v2316_v14, %v2320_v52  ;;  %v5413_v20 = vcombine.high %v2308_v18, %v2312_v10 }
 0x41c   :  { %v5095_v21 = vcombine.high %v1989_v13, %v1993_v57 }
 0x41e   :  { %4634 = vmatpush2.bf16.msra.mxu0 %v5268_v12  ;;  %4659 = vmatpush1.bf16.msra.mxu1 %v5332_v30  ;;  %v1985_v12 = vld [vmem:[#allocation10 + $0x78] sm:$0xff]  ;;  %v5412_v30 = vcombine.low %v2308_v18, %v2312_v10 }
 0x41f   :  { %4660 = vmatprep.subr.bf16.mxu1 %v5453_v32  ;;  %4685 = vmatprep.subr.bf16.mxu0 %v5135_v34  ;;  %v5094_v32 = vcombine.low %v1989_v13, %v1993_v57  ;;  %v5405_v34 = vcombine.high %v2300_v23, %v2304_v26  ;;  %v5087_v35 = vcombine.high %v1981_v28, %v1985_v12  ;;  %v2137_v18 = vld [vmem:[#allocation10 + $0x538] sm:$0xff] }
 0x420   :  { %v2129_v23 = vld [vmem:[#allocation10 + $0x4f8] sm:$0xff] }
 0x421   :  { %4636 = vmatmul.mubr.bf16.vlgmr.msra.gmra.mxu0 %v6200_v46  ;;  %v4391_v48 = vpop.f32.mrf.mxu0 }
 0x422   :  { %v6238_v51 = vadd.f32 %v4391_v48, %v4351_v41  ;;  %4661 = vmatpush2.bf16.msra.mxu1 %v5452_v40  ;;  %4686 = vmatpush1.bf16.msra.mxu0 %v5134_v24  ;;  %v5086_v40 = vcombine.low %v1981_v28, %v1985_v12  ;;  %v5397_v24 = vcombine.high %v2292_v36, %v2296_v4  ;;  %v2097_v41 = vld [vmem:[#allocation10 + $0x3f8] sm:$0xff] }
 0x423   :  { %4717 = vmatprep.mubr.bf16.mxu0 %v6181_v54  ;;  %v4393_v22 = vpop.f32.mrf.mxu0  ;;  %4662 = vmatprep.subr.bf16.mxu1 %v5445_v33  ;;  %v5429_v54 = vcombine.high %v2324_v59, %v2328_v62  ;;  %v5079_v33 = vcombine.high %v1973_v58, %v1977_v37  ;;  %v5199_v48 = vcombine.high %v2093_v25, %v2097_v41  ;;  %v2121_v36 = vld [vmem:[#allocation10 + $0x4b8] sm:$0xff] }
 0x424   :  { %v6241_v61 = vadd.f32 %v4393_v22, %v4353_v50  ;;  %4687 = vmatprep.subr.bf16.mxu0 %v5127_v31  ;;  %v2157_v31 = vld [vmem:[#allocation10 + $0x5d8] sm:$0xff] }
 0x425   :  { %v4395_v1 = vpop.f32.mrf.mxu0  ;;  %v2085_v50 = vld [vmem:[#allocation10 + $0x398] sm:$0xff]  ;;  %v5262_v59 = vcombine.low %v2157_v31, %v2161_v42 }
 0x426   :  { %4663 = vmatpush2.bf16.msra.mxu1 %v5444_v49  ;;  %4688 = vmatpush1.bf16.msra.mxu0 %v5126_v39  ;;  %v5263_v49 = vcombine.high %v2157_v31, %v2161_v42  ;;  %v2089_v39 = vld [vmem:[#allocation10 + $0x3b8] sm:$0xff] }
 0x427   :  { %v4396_v3 = vpop.f32.mrf.mxu0  ;;  %4664 = vmatprep.subr.bf16.mxu1 %v5437_v29  ;;  %4689 = vmatprep.subr.bf16.mxu0 %v5119_v56  ;;  %v2149_v22 = vld [vmem:[#allocation10 + $0x598] sm:$0xff]  ;;  %v5198_v56 = vcombine.low %v2093_v25, %v2097_v41  ;;  %v5191_v62 = vcombine.high %v2085_v50, %v2089_v39 }
 0x428   :  { %v2153_v29 = vld [vmem:[#allocation10 + $0x5b8] sm:$0xff] }
 0x429   :  { %v5255_v0 = vcombine.high %v2149_v22, %v2153_v29  ;;  %v2081_v1 = vld [vmem:[#allocation10 + $0x378] sm:$0xff]  ;;  %v5254_v14 = vcombine.low %v2149_v22, %v2153_v29 }
 0x42a   :  { %4665 = vmatpush2.bf16.msra.mxu1 %v5436_v53  ;;  %4690 = vmatpush1.bf16.msra.mxu0 %v5118_v2  ;;  %v2141_v53 = vld [vmem:[#allocation10 + $0x558] sm:$0xff]  ;;  %v5183_v15 = vcombine.high %v2077_v63, %v2081_v1  ;;  %v5182_v13 = vcombine.low %v2077_v63, %v2081_v1 }
 0x42b   :  { %4666 = vmatprep.subr.bf16.mxu1 %v5429_v54  ;;  %4691 = vmatprep.subr.bf16.mxu0 %v5111_v5  ;;  %v2145_v2 = vld [vmem:[#allocation10 + $0x578] sm:$0xff]  ;;  %v5190_v5 = vcombine.low %v2085_v50, %v2089_v39 }
 0x42c   :  { %v5247_v6 = vcombine.high %v2141_v53, %v2145_v2  ;;  %v2113_v25 = vld [vmem:[#allocation10 + $0x478] sm:$0xff] }
 0x42d   :  { %v2105_v50 = vld [vmem:[#allocation10 + $0x438] sm:$0xff] }
 0x42e   :  { %4667 = vmatpush2.bf16.msra.mxu1 %v5428_v7  ;;  %4692 = vmatpush1.bf16.msra.mxu0 %v5110_v8  ;;  %v2069_v7 = vld [vmem:[#allocation10 + $0x318] sm:$0xff] }
 0x42f   :  { %4668 = vmatprep.subr.bf16.mxu1 %v5421_v11  ;;  %4693 = vmatprep.subr.bf16.mxu0 %v5103_v16  ;;  %v2073_v11 = vld [vmem:[#allocation10 + $0x338] sm:$0xff] }
 0x430   :  { %v2133_v16 = vld [vmem:[#allocation10 + $0x518] sm:$0xff]  ;;  %v5174_v26 = vcombine.low %v2069_v7, %v2073_v11 }
 0x431   :  { %v5238_v28 = vcombine.low %v2133_v16, %v2137_v18  ;;  %v2285_v63 = vld [vmem:[#allocation10 + $0x9d8] sm:$0xff] }
 0x432   :  { %4669 = vmatpush2.bf16.msra.mxu1 %v5420_v17  ;;  %4694 = vmatpush1.bf16.msra.mxu0 %v5102_v19  ;;  %v5175_v17 = vcombine.high %v2069_v7, %v2073_v11  ;;  %v5239_v19 = vcombine.high %v2133_v16, %v2137_v18  ;;  %v2205_v16 = vld [vmem:[#allocation10 + $0x758] sm:$0xff] }
 0x433   :  { %4670 = vmatprep.subr.bf16.mxu1 %v5413_v20  ;;  %4695 = vmatprep.subr.bf16.mxu0 %v5095_v21  ;;  %v2061_v20 = vld [vmem:[#allocation10 + $0x2d8] sm:$0xff] }
 0x434   :  { %v2125_v21 = vld [vmem:[#allocation10 + $0x4d8] sm:$0xff] }
 0x435   :  { %v5230_v58 = vcombine.low %v2125_v21, %v2129_v23 }
 0x436   :  { %4671 = vmatpush2.bf16.msra.mxu1 %v5412_v30  ;;  %4696 = vmatpush1.bf16.msra.mxu0 %v5094_v32  ;;  %v5231_v30 = vcombine.high %v2125_v21, %v2129_v23  ;;  %v2053_v32 = vld [vmem:[#allocation10 + $0x298] sm:$0xff] }
 0x437   :  { %4672 = vmatprep.subr.bf16.mxu1 %v5405_v34  ;;  %4697 = vmatprep.subr.bf16.mxu0 %v5087_v35  ;;  %v2057_v34 = vld [vmem:[#allocation10 + $0x2b8] sm:$0xff] }
 0x438   :  { %v2117_v35 = vld [vmem:[#allocation10 + $0x498] sm:$0xff]  ;;  %v5159_v37 = vcombine.high %v2053_v32, %v2057_v34  ;;  %v5158_v41 = vcombine.low %v2053_v32, %v2057_v34 }
 0x439   :  { %v5222_v31 = vcombine.low %v2117_v35, %v2121_v36  ;;  %v2197_v23 = vld [vmem:[#allocation10 + $0x718] sm:$0xff] }
 0x43a   :  { %4673 = vmatpush2.bf16.msra.mxu1 %v5404_v38  ;;  %4698 = vmatpush1.bf16.msra.mxu0 %v5086_v40  ;;  %v5223_v38 = vcombine.high %v2117_v35, %v2121_v36  ;;  %v2045_v40 = vld [vmem:[#allocation10 + $0x258] sm:$0xff] }
 0x43b   :  { %4674 = vmatprep.subr.bf16.mxu1 %v5397_v24  ;;  %4699 = vmatprep.subr.bf16.mxu0 %v5079_v33  ;;  %v2049_v24 = vld [vmem:[#allocation10 + $0x278] sm:$0xff] }
 0x43c   :  { %v2109_v33 = vld [vmem:[#allocation10 + $0x458] sm:$0xff]  ;;  %v5151_v42 = vcombine.high %v2045_v40, %v2049_v24  ;;  %v5150_v39 = vcombine.low %v2045_v40, %v2049_v24 }
 0x43d   :  { %v5214_v22 = vcombine.low %v2109_v33, %v2113_v25  ;;  %v2189_v36 = vld [vmem:[#allocation10 + $0x6d8] sm:$0xff] }
 0x43e   :  { %4675 = vmatpush2.bf16.msra.mxu1 %v5396_v45  ;;  %4700 = vmatpush1.bf16.msra.mxu0 %v5078_v47  ;;  %v5215_v45 = vcombine.high %v2109_v33, %v2113_v25  ;;  %v2037_v47 = vld [vmem:[#allocation10 + $0x218] sm:$0xff] }
 0x43f   :  { %4701 = vmatprep.subr.bf16.mxu0 %v5199_v48  ;;  %4726 = vmatprep.subr.bf16.mxu1 %v5263_v49  ;;  %v2041_v48 = vld [vmem:[#allocation10 + $0x238] sm:$0xff] }
 0x440   :  { %v2101_v49 = vld [vmem:[#allocation10 + $0x418] sm:$0xff]  ;;  %v5143_v29 = vcombine.high %v2037_v47, %v2041_v48  ;;  %v5142_v1 = vcombine.low %v2037_v47, %v2041_v48 }
 0x441   :  { %v4432_v3 = vpop.f32.mrf.mxu1  ;;  %4677 = vmatmul.mubr.bf16.vlgmr.msra.gmra.mxu1 %v6211_v60  ;;  %v2181_v25 = vld [vmem:[#allocation10 + $0x698] sm:$0xff] }
 0x442   :  { %v6245_v54 = vadd.f32 %v4432_v3, %v6238_v51  ;;  %4702 = vmatpush2.bf16.msra.mxu0 %v5198_v56  ;;  %4727 = vmatpush1.bf16.msra.mxu1 %v5262_v59  ;;  %v5207_v56 = vcombine.high %v2101_v49, %v2105_v50  ;;  %v2221_v59 = vld [vmem:[#allocation10 + $0x7d8] sm:$0xff] }
 0x443   :  { %4758 = vmatprep.mubr.bf16.mxu1 %v6196_v43  ;;  %v4434_v52 = vpop.f32.mrf.mxu1  ;;  %4703 = vmatprep.subr.bf16.mxu0 %v5191_v62  ;;  %v5246_v43 = vcombine.low %v2141_v53, %v2145_v2  ;;  %v2225_v62 = vld [vmem:[#allocation10 + $0x7f8] sm:$0xff]  ;;  %v5206_v53 = vcombine.low %v2101_v49, %v2105_v50 }
 0x444   :  { %v6249_v8 = vadd.f32 %v4434_v52, %v6241_v61  ;;  %4728 = vmatprep.subr.bf16.mxu1 %v5255_v0  ;;  %v2065_v61 = vld [vmem:[#allocation10 + $0x2f8] sm:$0xff]  ;;  %v5327_v2 = vcombine.high %v2221_v59, %v2225_v62 }
 0x445   :  { %v4436_v51 = vpop.f32.mrf.mxu1  ;;  %v5167_v12 = vcombine.high %v2061_v20, %v2065_v61  ;;  %v5166_v4 = vcombine.low %v2061_v20, %v2065_v61  ;;  %v2289_v0 = vld [vmem:[#allocation10 + $0x9f8] sm:$0xff] }
 0x446   :  { %v4816_v10 = vcombine.low %v6245_v54, %v6249_v8  ;;  %4704 = vmatpush2.bf16.msra.mxu0 %v5190_v5  ;;  %4729 = vmatpush1.bf16.msra.mxu1 %v5254_v14  ;;  %v5391_v3 = vcombine.high %v2285_v63, %v2289_v0  ;;  %v2213_v5 = vld [vmem:[#allocation10 + $0x798] sm:$0xff]  ;;  %v5390_v7 = vcombine.low %v2285_v63, %v2289_v0 }
 0x447   :  { %v4437_v57 = vpop.f32.mrf.mxu1  ;;  %4705 = vmatprep.subr.bf16.mxu0 %v5183_v15  ;;  %4730 = vmatprep.subr.bf16.mxu1 %v5247_v6  ;;  %v2217_v14 = vld [vmem:[#allocation10 + $0x7b8] sm:$0xff]  ;;  %v5326_v6 = vcombine.low %v2221_v59, %v2225_v62 }
 0x448   :  { %v2277_v52 = vld [vmem:[#allocation10 + $0x998] sm:$0xff]  ;;  %v5319_v11 = vcombine.high %v2213_v5, %v2217_v14 }
 0x449   :  { %v2281_v15 = vld [vmem:[#allocation10 + $0x9b8] sm:$0xff] }
 0x44a   :  { %4706 = vmatpush2.bf16.msra.mxu0 %v5182_v13  ;;  %4731 = vmatpush1.bf16.msra.mxu1 %v5246_v43  ;;  %v5383_v18 = vcombine.high %v2277_v52, %v2281_v15  ;;  %v2209_v51 = vld [vmem:[#allocation10 + $0x778] sm:$0xff] }
 0x44b   :  { %4707 = vmatprep.subr.bf16.mxu0 %v5175_v17  ;;  %4732 = vmatprep.subr.bf16.mxu1 %v5239_v19  ;;  %v2269_v13 = vld [vmem:[#allocation10 + $0x958] sm:$0xff]  ;;  %v5318_v17 = vcombine.low %v2213_v5, %v2217_v14  ;;  %v5382_v19 = vcombine.low %v2277_v52, %v2281_v15  ;;  %v5311_v61 = vcombine.high %v2205_v16, %v2209_v51 }
 0x44c   :  { %v2273_v43 = vld [vmem:[#allocation10 + $0x978] sm:$0xff] }
 0x44d   :  { %v5375_v21 = vcombine.high %v2269_v13, %v2273_v43  ;;  %v5374_v32 = vcombine.low %v2269_v13, %v2273_v43  ;;  %v2173_v50 = vld [vmem:[#allocation10 + $0x658] sm:$0xff] }
 0x44e   :  { %4708 = vmatpush2.bf16.msra.mxu0 %v5174_v26  ;;  %4733 = vmatpush1.bf16.msra.mxu1 %v5238_v28  ;;  %v2201_v26 = vld [vmem:[#allocation10 + $0x738] sm:$0xff] }
 0x44f   :  { %4709 = vmatprep.subr.bf16.mxu0 %v5167_v12  ;;  %4734 = vmatprep.subr.bf16.mxu1 %v5231_v30  ;;  %v2261_v28 = vld [vmem:[#allocation10 + $0x918] sm:$0xff]  ;;  %v5303_v35 = vcombine.high %v2197_v23, %v2201_v26 }
 0x450   :  { %v2265_v12 = vld [vmem:[#allocation10 + $0x938] sm:$0xff] }
 0x451   :  { %v5366_v40 = vcombine.low %v2261_v28, %v2265_v12  ;;  %v2165_v0 = vld [vmem:[#allocation10 + $0x618] sm:$0xff] }
 0x452   :  { %4710 = vmatpush2.bf16.msra.mxu0 %v5166_v4  ;;  %4735 = vmatpush1.bf16.msra.mxu1 %v5230_v58  ;;  %v2193_v4 = vld [vmem:[#allocation10 + $0x6f8] sm:$0xff] }
 0x453   :  { %4711 = vmatprep.subr.bf16.mxu0 %v5159_v37  ;;  %4736 = vmatprep.subr.bf16.mxu1 %v5223_v38  ;;  %v2253_v58 = vld [vmem:[#allocation10 + $0x8d8] sm:$0xff]  ;;  %v5302_v38 = vcombine.low %v2197_v23, %v2201_v26  ;;  %v5295_v24 = vcombine.high %v2189_v36, %v2193_v4 }
 0x454   :  { %v2257_v37 = vld [vmem:[#allocation10 + $0x8f8] sm:$0xff] }
 0x455   :  { %v5359_v33 = vcombine.high %v2253_v58, %v2257_v37  ;;  %v5358_v47 = vcombine.low %v2253_v58, %v2257_v37  ;;  %v2349_v15 = vld [vmem:[#allocation10 + $0xbd8] sm:$0xff] }
 0x456   :  { %4712 = vmatpush2.bf16.msra.mxu0 %v5158_v41  ;;  %4737 = vmatpush1.bf16.msra.mxu1 %v5222_v31  ;;  %v2185_v41 = vld [vmem:[#allocation10 + $0x6b8] sm:$0xff] }
 0x457   :  { %4713 = vmatprep.subr.bf16.mxu0 %v5151_v42  ;;  %4738 = vmatprep.subr.bf16.mxu1 %v5215_v45  ;;  %v2245_v31 = vld [vmem:[#allocation10 + $0x898] sm:$0xff]  ;;  %v5294_v45 = vcombine.low %v2189_v36, %v2193_v4  ;;  %v5287_v48 = vcombine.high %v2181_v25, %v2185_v41 }
 0x458   :  { %v2249_v42 = vld [vmem:[#allocation10 + $0x8b8] sm:$0xff] }
 0x459   :  { %v5351_v49 = vcombine.high %v2245_v31, %v2249_v42  ;;  %v5350_v59 = vcombine.low %v2245_v31, %v2249_v42  ;;  %v2313_v58 = vld [vmem:[#allocation10 + $0xab8] sm:$0xff] }
 0x45a   :  { %4714 = vmatpush2.bf16.msra.mxu0 %v5150_v39  ;;  %4739 = vmatpush1.bf16.msra.mxu1 %v5214_v22  ;;  %v2177_v39 = vld [vmem:[#allocation10 + $0x678] sm:$0xff] }
 0x45b   :  { %4715 = vmatprep.subr.bf16.mxu0 %v5143_v29  ;;  %4740 = vmatprep.subr.bf16.mxu1 %v5207_v56  ;;  %v2237_v22 = vld [vmem:[#allocation10 + $0x858] sm:$0xff]  ;;  %v5286_v56 = vcombine.low %v2181_v25, %v2185_v41  ;;  %v5279_v62 = vcombine.high %v2173_v50, %v2177_v39 }
 0x45c   :  { %v2241_v29 = vld [vmem:[#allocation10 + $0x878] sm:$0xff] }
 0x45d   :  { %v5343_v63 = vcombine.high %v2237_v22, %v2241_v29  ;;  %v5342_v5 = vcombine.low %v2237_v22, %v2241_v29  ;;  %v2293_v41 = vld [vmem:[#allocation10 + $0xa18] sm:$0xff] }
 0x45e   :  { %4716 = vmatpush2.bf16.msra.mxu0 %v5142_v1  ;;  %4741 = vmatpush1.bf16.msra.mxu1 %v5206_v53  ;;  %v2169_v1 = vld [vmem:[#allocation10 + $0x638] sm:$0xff] }
 0x45f   :  { %4742 = vmatprep.subr.bf16.mxu1 %v5327_v2  ;;  %4767 = vmatprep.subr.bf16.mxu0 %v5391_v3  ;;  %v2229_v53 = vld [vmem:[#allocation10 + $0x818] sm:$0xff]  ;;  %v5278_v3 = vcombine.low %v2173_v50, %v2177_v39  ;;  %v5271_v14 = vcombine.high %v2165_v0, %v2169_v1  ;;  %v5990_v50 = vmov 1983009808  }
 0x460   :  { %v2233_v2 = vld [vmem:[#allocation10 + $0x838] sm:$0xff]  ;;  %v4819_v39 = vunpack.c.l.s4 %v5990_v50 }
 0x461   :  { %v6253_v57 = vpop.f32.mrf.mxu0  ;;  %4718 = vmatmul.mubr.bf16.vlgmr.msra.gmra.mxu0 %v6183_v55  ;;  %v5310_v55 = vcombine.low %v2205_v16, %v2209_v51  ;;  %v5335_v52 = vcombine.high %v2229_v53, %v2233_v2  ;;  %v2345_v51 = vld [vmem:[#allocation10 + $0xbb8] sm:$0xff] }
 0x462   :  { %4743 = vmatpush2.bf16.msra.mxu1 %v5326_v6  ;;  %4768 = vmatpush1.bf16.msra.mxu0 %v5390_v7  ;;  %v2353_v6 = vld [vmem:[#allocation10 + $0xbf8] sm:$0xff]  ;;  %v5270_v7 = vcombine.low %v2165_v0, %v2169_v1 }
 0x463   :  { %4799 = vmatprep.mubr.bf16.mxu0 %v6198_v44  ;;  %v6257_v20 = vpop.f32.mrf.mxu0  ;;  %4744 = vmatprep.subr.bf16.mxu1 %v5319_v11  ;;  %v5367_v44 = vcombine.high %v2261_v28, %v2265_v12  ;;  %v5334_v11 = vcombine.low %v2229_v53, %v2233_v2  ;;  %v5455_v16 = vcombine.high %v2349_v15, %v2353_v6  ;;  %v2325_v28 = vld [vmem:[#allocation10 + $0xb18] sm:$0xff] }
 0x464   :  { %4769 = vmatprep.subr.bf16.mxu0 %v5383_v18  ;;  %v2341_v18 = vld [vmem:[#allocation10 + $0xb98] sm:$0xff]  ;;  %v5454_v13 = vcombine.low %v2349_v15, %v2353_v6 }
 0x465   :  { %v4477_v30 = vpop.f32.mrf.mxu0  ;;  %v5447_v43 = vcombine.high %v2341_v18, %v2345_v51  ;;  %v2329_v12 = vld [vmem:[#allocation10 + $0xb38] sm:$0xff] }
 0x466   :  { %4745 = vmatpush2.bf16.msra.mxu1 %v5318_v17  ;;  %4770 = vmatpush1.bf16.msra.mxu0 %v5382_v19  ;;  %v2333_v17 = vld [vmem:[#allocation10 + $0xb58] sm:$0xff]  ;;  %v5430_v36 = vcombine.low %v2325_v28, %v2329_v12 }
 0x467   :  { %v4478_v34 = vpop.f32.mrf.mxu0  ;;  %4746 = vmatprep.subr.bf16.mxu1 %v5311_v61  ;;  %4771 = vmatprep.subr.bf16.mxu0 %v5375_v21  ;;  %v2337_v19 = vld [vmem:[#allocation10 + $0xb78] sm:$0xff]  ;;  %v5446_v21 = vcombine.low %v2341_v18, %v2345_v51  ;;  %v2374_v18 = vsub.s32 4, %v6227_v9  ;;  %v2378_v51 = vsub.s32 5, %v6227_v9 }
 0x468   :  { %v5439_v26 = vcombine.high %v2333_v17, %v2337_v19  ;;  %v5431_v34 = vcombine.high %v2325_v28, %v2329_v12  ;;  %v2297_v31 = vld [vmem:[#allocation10 + $0xa38] sm:$0xff] }
 0x46a   :  { %4747 = vmatpush2.bf16.msra.mxu1 %v5310_v55  ;;  %4772 = vmatpush1.bf16.msra.mxu0 %v5374_v32  ;;  %v5438_v55 = vcombine.low %v2333_v17, %v2337_v19 }
 0x46b   :  { %4748 = vmatprep.subr.bf16.mxu1 %v5303_v35  ;;  %4773 = vmatprep.subr.bf16.mxu0 %v5367_v44  ;;  %v2317_v35 = vld [vmem:[#allocation10 + $0xad8] sm:$0xff] }
 0x46c   :  { %v2321_v44 = vld [vmem:[#allocation10 + $0xaf8] sm:$0xff] }
 0x46d   :  { %v5423_v4 = vcombine.high %v2317_v35, %v2321_v44  ;;  %v5422_v37 = vcombine.low %v2317_v35, %v2321_v44 }
 0x46e   :  { %4749 = vmatpush2.bf16.msra.mxu1 %v5302_v38  ;;  %4774 = vmatpush1.bf16.msra.mxu0 %v5366_v40  ;;  %v2301_v40 = vld [vmem:[#allocation10 + $0xa58] sm:$0xff] }
 0x46f   :  { %4750 = vmatprep.subr.bf16.mxu1 %v5295_v24  ;;  %4775 = vmatprep.subr.bf16.mxu0 %v5359_v33  ;;  %v2305_v24 = vld [vmem:[#allocation10 + $0xa78] sm:$0xff] }
 0x470   :  { %v5407_v25 = vcombine.high %v2301_v40, %v2305_v24  ;;  %v5406_v42 = vcombine.low %v2301_v40, %v2305_v24  ;;  %v2382_v40 = vsub.s32 6, %v6227_v9  ;;  %v2386_v24 = vsub.s32 7, %v6227_v9 }
 0x472   :  { %4751 = vmatpush2.bf16.msra.mxu1 %v5294_v45  ;;  %4776 = vmatpush1.bf16.msra.mxu0 %v5358_v47  ;;  %v5399_v45 = vcombine.high %v2293_v41, %v2297_v31  ;;  %v2366_v47 = vsub.s32 2, %v6227_v9 }
 0x473   :  { %4752 = vmatprep.subr.bf16.mxu1 %v5287_v48  ;;  %4777 = vmatprep.subr.bf16.mxu0 %v5351_v49  ;;  %v2370_v48 = vsub.s32 3, %v6227_v9  ;;  %v5398_v49 = vcombine.low %v2293_v41, %v2297_v31 }
 0x474   :  { %v2367_v22 = vrot.slane %v6230_v27, %v2366_v47 }
 0x475   :  { %v2371_v29 = vrot.slane %v6230_v27, %v2370_v48 }
 0x476   :  { %4753 = vmatpush2.bf16.msra.mxu1 %v5286_v56  ;;  %4778 = vmatpush1.bf16.msra.mxu0 %v5350_v59  ;;  %v4820_v56 = vunpack.c.0.s8 %v4819_v39  ;;  %v4474_v59 = vadd.f32 %v6253_v57, %v2367_v22 }
 0x477   :  { %4754 = vmatprep.subr.bf16.mxu1 %v5279_v62  ;;  %4779 = vmatprep.subr.bf16.mxu0 %v5343_v63  ;;  %v4476_v62 = vadd.f32 %v6257_v20, %v2371_v29 }
 0x478   :  { %v4823_v2 = vsub.s32 %v4820_v56, %v6227_v9 }
 0x47a   :  { %4755 = vmatpush2.bf16.msra.mxu1 %v5278_v3  ;;  %4780 = vmatpush1.bf16.msra.mxu0 %v5342_v5  ;;  %v4824_v6 = vrot.slane %v4816_v10, %v4823_v2 }
 0x47b   :  { %4756 = vmatprep.subr.bf16.mxu1 %v5271_v14  ;;  %4781 = vmatprep.subr.bf16.mxu0 %v5335_v52 }
 0x47e   :  { %4757 = vmatpush2.bf16.msra.mxu1 %v5270_v7  ;;  %4782 = vmatpush1.bf16.msra.mxu0 %v5334_v11 }
 0x47f   :  { %4783 = vmatprep.subr.bf16.mxu0 %v5455_v16 }
 0x481   :  { %v4514_v61 = vpop.f32.mrf.mxu1  ;;  %4759 = vmatmul.mubr.bf16.vlgmr.msra.gmra.mxu1 %v6200_v46  ;;  %v2309_v46 = vld [vmem:[#allocation10 + $0xa98] sm:$0xff] }
 0x482   :  { %4784 = vmatpush2.bf16.msra.mxu0 %v5454_v13  ;;  %v5415_v38 = vcombine.high %v2309_v46, %v2313_v58  ;;  %v5414_v33 = vcombine.low %v2309_v46, %v2313_v58  ;;  %v4515_v0 = vadd.f32 %v4514_v61, %v4474_v59  ;;  %v2375_v13 = vrot.slane %v6230_v27, %v2374_v18 }
 0x483   :  { %v4516_v23 = vpop.f32.mrf.mxu1  ;;  %4785 = vmatprep.subr.bf16.mxu0 %v5447_v43  ;;  %v2379_v43 = vrot.slane %v6230_v27, %v2378_v51 }
 0x484   :  { %v4517_v1 = vadd.f32 %v4516_v23, %v4476_v62 }
 0x485   :  { %v4518_v30 = vpop.f32.mrf.mxu1 }
 0x486   :  { %4786 = vmatpush2.bf16.msra.mxu0 %v5446_v21 }
 0x487   :  { %v4519_v32 = vpop.f32.mrf.mxu1  ;;  %4787 = vmatprep.subr.bf16.mxu0 %v5439_v26 }
 0x48a   :  { %4788 = vmatpush2.bf16.msra.mxu0 %v5438_v55 }
 0x48b   :  { %4789 = vmatprep.subr.bf16.mxu0 %v5431_v34 }
 0x48e   :  { %4790 = vmatpush2.bf16.msra.mxu0 %v5430_v36 }
 0x48f   :  { %4791 = vmatprep.subr.bf16.mxu0 %v5423_v4 }
 0x492   :  { %4792 = vmatpush2.bf16.msra.mxu0 %v5422_v37 }
 0x493   :  { %4793 = vmatprep.subr.bf16.mxu0 %v5415_v38 }
 0x496   :  { %4794 = vmatpush2.bf16.msra.mxu0 %v5414_v33  ;;  %v2383_v33 = vrot.slane %v6230_v27, %v2382_v40 }
 0x497   :  { %4795 = vmatprep.subr.bf16.mxu0 %v5407_v25  ;;  %v2387_v25 = vrot.slane %v6230_v27, %v2386_v24 }
 0x49a   :  { %4796 = vmatpush2.bf16.msra.mxu0 %v5406_v42 }
 0x49b   :  { %4797 = vmatprep.subr.bf16.mxu0 %v5399_v45 }
 0x49e   :  { %4798 = vmatpush2.bf16.msra.mxu0 %v5398_v49 }
 0x4a1   :  { %v4555_v63 = vpop.f32.mrf.mxu0  ;;  %4800 = vmatmul.mubr.bf16.vlgmr.msra.gmra.mxu0 %v6211_v60 }
 0x4a2   :  { %v4556_v3 = vadd.f32 %v4555_v63, %v4515_v0 }
 0x4a3   :  { %v4557_v53 = vpop.f32.mrf.mxu0 }
 0x4a4   :  { %v4558_v5 = vadd.f32 %v4557_v53, %v4517_v1 }
 0x4a5   :  { %v4559_v14 = vpop.f32.mrf.mxu0 }
 0x4a6   :  { %v4817_v52 = vcombine.low %v4556_v3, %v4558_v5 }
 0x4a7   :  { %v4560_v15 = vpop.f32.mrf.mxu0 }
 0x4a8   :  { %v4831_v57 = vrot.slane %v4817_v52, %v4823_v2 }
 0x4aa   :  { %v4832_v7 = vcombine.low %v4824_v6, %v4831_v57 }
 0x4ac   :  { %4852 = vst [vmem:[#allocation13] sm:$0xff] %v4832_v7 }
 0x4c1   :  { %v4596_v20 = vpop.f32.mrf.mxu1 }
 0x4c2   :  { %v4597_v17 = vadd.f32 %v4596_v20, %v2375_v13 }
 0x4c3   :  { %v4598_v11 = vpop.f32.mrf.mxu1 }
 0x4c4   :  { %v4599_v61 = vadd.f32 %v4598_v11, %v2379_v43 }
 0x4c5   :  { %v4600_v60 = vpop.f32.mrf.mxu1 }
 0x4c7   :  { %v4601_v16 = vpop.f32.mrf.mxu1 }
 0x4e1   :  { %v4637_v19 = vpop.f32.mrf.mxu0 }
 0x4e2   :  { %v4638_v54 = vadd.f32 %v4637_v19, %v4597_v17 }
 0x4e3   :  { %v4639_v8 = vpop.f32.mrf.mxu0 }
 0x4e4   :  { %v4640_v10 = vadd.f32 %v4639_v8, %v4599_v61 }
 0x4e5   :  { %v4641_v21 = vpop.f32.mrf.mxu0 }
 0x4e7   :  { %v4642_v23 = vpop.f32.mrf.mxu0 }
 0x501   :  { %v4678_v26 = vpop.f32.mrf.mxu1 }
 0x502   :  { %v4679_v28 = vadd.f32 %v4678_v26, %v4638_v54 }
 0x503   :  { %v4680_v12 = vpop.f32.mrf.mxu1 }
 0x504   :  { %v4681_v30 = vadd.f32 %v4680_v12, %v4640_v10 }
 0x505   :  { %v4682_v55 = vpop.f32.mrf.mxu1 }
 0x506   :  { %v4833_v32 = vcombine.low %v4679_v28, %v4681_v30 }
 0x507   :  { %v4683_v34 = vpop.f32.mrf.mxu1 }
 0x508   :  { %v4841_v56 = vrot.slane %v4833_v32, %v4823_v2 }
 0x521   :  { %v4719_v35 = vpop.f32.mrf.mxu0 }
 0x522   :  { %v4720_v41 = vadd.f32 %v4719_v35, %v2383_v33 }
 0x523   :  { %v4721_v44 = vpop.f32.mrf.mxu0 }
 0x524   :  { %v4722_v31 = vadd.f32 %v4721_v44, %v2387_v25 }
 0x525   :  { %v4723_v36 = vpop.f32.mrf.mxu0 }
 0x527   :  { %v4724_v4 = vpop.f32.mrf.mxu0 }
 0x541   :  { %v4760_v46 = vpop.f32.mrf.mxu1 }
 0x542   :  { %v4761_v45 = vadd.f32 %v4760_v46, %v4720_v41 }
 0x543   :  { %v4762_v58 = vpop.f32.mrf.mxu1 }
 0x544   :  { %v4763_v47 = vadd.f32 %v4762_v58, %v4722_v31 }
 0x545   :  { %v4764_v37 = vpop.f32.mrf.mxu1 }
 0x547   :  { %v4765_v38 = vpop.f32.mrf.mxu1 }
 0x561   :  { %v4801_v42 = vpop.f32.mrf.mxu0 }
 0x562   :  { %v4802_v49 = vadd.f32 %v4801_v42, %v4761_v45 }
 0x563   :  { %v4803_v48 = vpop.f32.mrf.mxu0 }
 0x564   :  { %v4804_v50 = vadd.f32 %v4803_v48, %v4763_v47 }
 0x565   :  { %v4805_v39 = vpop.f32.mrf.mxu0 }
 0x566   :  { %v4834_v22 = vcombine.low %v4802_v49, %v4804_v50 }
 0x567   :  { %v4806_v29 = vpop.f32.mrf.mxu0 }
 0x568   :  { %v4848_v59 = vrot.slane %v4834_v22, %v4823_v2 }
 0x56a   :  { %v4849_v9 = vcombine.low %v4841_v56, %v4848_v59 }
 0x56c   :  { %4853 = vst [vmem:[#allocation13 + $0x8] sm:$0xff] %v4849_v9 }
 0x56d   :  { %5956 = shalt.err (!%p5953_p6)
}
 0x56e   :  { %4863 = dma.vmem_to_hbm [thread:$0]  %s4861_s3, 256, %s6289_s7, [#allocation4]  }
 0x56f   :  { %5973 = dma.done.wait [#allocation4], 256  }
 0x570   :  { %5974 = vsyncadd [#allocation4], 4294967040 }
 0x571   :  { %4867 = vsyncpa [#allocation3], 1 }
 0x572   :  { %4868 = vsyncpa [#allocation6], 1 }
 0x573   :  { %4869 = vsyncpa [#allocation9], 1 }
 0x574   :  { %4870 = vsyncpa [#allocation12], 1 }
 0x575   :  { %4871 = vsyncpa [#allocation4], 1 }

</bundles_post_ra>
